<compile_context>
chip_gen: v7x
topology: tpu7x:2x2x1
jax: 0.10.0
libtpu: 0.0.40
codegen_flags: <defaults>
</compile_context>

<pallas_src>
import functools

import jax
import jax.numpy as jnp
from jax.experimental import pallas as pl
from jax.experimental.pallas import tpu as pltpu

C_OUT = 10
OH = OW = 14
HW = OH * OW            # 196
N_CLASSES = 10
N_TAPS = 9


# ------------------------------ fused kernel --------------------------------

def fused_cnn_kernel(xs_ref, cw_ref, cb_ref, w4_ref, fb_ref, out_ref):
    """Fused conv3x3(s=2,p=1) + ReLU + flatten + Linear + log_softmax, one batch tile.

    xs_ref : (9, tb, 196) VMEM  lane-dense conv taps: xs[k, b, s] with
             k = kh*3 + kw, s = oi*14 + oj, value = x_padded[b, 2*oi+kh, 2*oj+kw]
    cw_ref : (90,)  SMEM  conv weight, flat index c*9 + kh*3 + kw
    cb_ref : (10,)  SMEM  conv bias
    w4_ref : (10, 196, 10) VMEM  fc weight as [c, s, n] = fc_w[n, c*196 + s]
    fb_ref : (1, 10) VMEM  fc bias
    out_ref: (tb, 10) VMEM  log-probabilities
    """
    tb = out_ref.shape[0]

    logits = jnp.zeros((tb, N_CLASSES), jnp.float32)
    for c in range(C_OUT):
        # Conv channel c: 9 scalar * (tb,196) lane-dense FMAs on the VPU.
        # Taps are re-loaded from VMEM per (c, k) to keep live ranges short
        # (3 vld slots/cycle make the loads cheap; spills are not).
        acc = jnp.zeros((tb, HW), jnp.float32)
        for k in range(N_TAPS):
            acc = acc + cw_ref[c * N_TAPS + k] * xs_ref[k]
        h_c = jnp.maximum(acc + cb_ref[c], 0.0)                          # (tb, 196)

        # FC contribution of channel c: MXU contraction (tb,196) x (196,10).
        logits = logits + jnp.dot(h_c, w4_ref[c],
                                  preferred_element_type=jnp.float32)

    logits = logits + fb_ref[...]

    # Numerically-stable log_softmax over the 10 classes.
    # (tb,10) output store is masked (10 < 128 lanes) but negligible here.
    m = jnp.max(logits, axis=-1, keepdims=True)
    z = logits - m
    lse = jnp.log(jnp.sum(jnp.exp(z), axis=-1, keepdims=True))
    out_ref[...] = (z - lse).astype(out_ref.dtype)


# ----------------------------- pallas_call glue ------------------------------

def _fused_forward(xs, cw, cb, w4, fb, tb):
    bp = xs.shape[1]
    n_tiles = bp // tb
    flops = bp * (2 * N_TAPS * C_OUT * HW          # conv FMAs (VPU)
                  + 2 * C_OUT * HW * N_CLASSES     # FC contraction (MXU)
                  + 6 * N_CLASSES)                 # bias + softmax arithmetic
    bytes_accessed = (xs.size + w4.size + cw.size + cb.size + fb.size) * 4 \
        + bp * N_CLASSES * 4
    return pl.pallas_call(
        fused_cnn_kernel,
        out_shape=jax.ShapeDtypeStruct((bp, N_CLASSES), jnp.float32),
        grid=(n_tiles,),
        in_specs=[
            pl.BlockSpec((N_TAPS, tb, HW), lambda i: (0, i, 0)),          # taps
            pl.BlockSpec(memory_space=pltpu.MemorySpace.SMEM),            # conv w
            pl.BlockSpec(memory_space=pltpu.MemorySpace.SMEM),            # conv b
            pl.BlockSpec((C_OUT, HW, N_CLASSES), lambda i: (0, 0, 0)),    # fc w (resident)
            pl.BlockSpec((1, N_CLASSES), lambda i: (0, 0)),               # fc b (resident)
        ],
        out_specs=pl.BlockSpec((tb, N_CLASSES), lambda i: (i, 0)),
        compiler_params=pltpu.CompilerParams(
            dimension_semantics=("parallel",)),
        cost_estimate=pl.CostEstimate(
            flops=flops,
            transcendentals=bp * (N_CLASSES + 1),
            bytes_accessed=bytes_accessed),
    )(xs, cw, cb, w4, fb)


# ------------------------------- model glue ----------------------------------

def init_params(key):
    k1, k2, k3, k4 = jax.random.split(key, 4)
    conv_w = 0.1 * jax.random.normal(k1, (C_OUT, 1, 3, 3), jnp.float32)   # (Cout,Cin,KH,KW)
    conv_b = 0.1 * jax.random.normal(k2, (C_OUT,), jnp.float32)
    fc_w = 0.05 * jax.random.normal(k3, (N_CLASSES, C_OUT * HW), jnp.float32)
    fc_b = 0.05 * jax.random.normal(k4, (N_CLASSES,), jnp.float32)
    return dict(conv_w=conv_w, conv_b=conv_b, fc_w=fc_w, fc_b=fc_b)


def prepare_params(params):
    """One-time parameter layout prep, hoisted out of the jitted forward."""
    w4 = params["fc_w"].reshape(N_CLASSES, C_OUT, HW).transpose(1, 2, 0)  # (c, s, n)
    return dict(
        cw=params["conv_w"].reshape(-1).astype(jnp.float32),              # (90,)
        cb=params["conv_b"].astype(jnp.float32),                          # (10,)
        w4=w4.astype(jnp.float32),                                        # (10,196,10)
        fb=params["fc_b"].reshape(1, N_CLASSES).astype(jnp.float32),      # (1,10)
    )


def _round_up(a, m):
    return (a + m - 1) // m * m


@functools.partial(jax.jit, static_argnames=("tb",))
def simple_cnn_forward(x, prepped, tb=128):
    """x: (B, 1, 28, 28) NCHW float32 -> (B, 10) log-probabilities."""
    B, C, H, W = x.shape
    assert C == 1 and H == 28 and W == 28, "SimpleCNN is defined for 1x28x28 inputs"
    assert tb % 8 == 0, "batch tile must be a multiple of 8"

    # Lane-dense tap extraction: xs[k, b, s] = x_padded[b, 2*oi+kh, 2*oj+kw],
    # k = kh*3+kw, s = oi*14+oj.  ~7 KB/sample in HBM, fully contiguous (tb,196)
    # slabs in VMEM (no 15-wide minor dims, no sublane-gather on load).
    xp = jnp.pad(x[:, 0], ((0, 0), (1, 1), (1, 1)))                    # (B, 30, 30)
    taps = [xp[:, kh:kh + 2 * OH:2, kw:kw + 2 * OW:2]                  # (B, 14, 14)
            for kh in range(3) for kw in range(3)]
    xs = jnp.stack(taps, axis=0).reshape(N_TAPS, B, HW)                # (9, B, 196)

    # Batch tiling: big tiles amortize the ~0.35us/step grid overhead and fill
    # the MXU M dimension; for moderate B make >=2 tiles so both v7x cores work.
    bp0 = _round_up(B, 8)
    if bp0 > tb:
        tb_eff = tb
        bp = _round_up(B, tb)
    elif bp0 >= 16:
        tb_eff = _round_up((bp0 + 1) // 2, 8)   # >= 2 parallel grid tiles
        bp = 2 * tb_eff
    else:
        tb_eff = bp0                            # tiny batch: single small tile
        bp = bp0
    if bp != B:
        xs = jnp.pad(xs, ((0, 0), (0, bp - B), (0, 0)))

    out = _fused_forward(xs, prepped["cw"], prepped["cb"], prepped["w4"],
                         prepped["fb"], tb_eff)
    return out[:B]


def reference_forward(x, params):
    """Pure-JAX reference mirroring the PyTorch module (f32, HIGHEST precision)."""
    y = jax.lax.conv_general_dilated(
        x, params["conv_w"], window_strides=(2, 2), padding=((1, 1), (1, 1)),
        dimension_numbers=("NCHW", "OIHW", "NCHW"),
        precision=jax.lax.Precision.HIGHEST)
    y = y + params["conv_b"].reshape(1, -1, 1, 1)
    y = jnp.maximum(y, 0.0)
    y = y.reshape(y.shape[0], -1)
    logits = jnp.dot(y, params["fc_w"].T,
                     precision=jax.lax.Precision.HIGHEST) + params["fc_b"]
    return jax.nn.log_softmax(logits, axis=1)


if __name__ == "__main__":
    key = jax.random.PRNGKey(0)
    kx, kp = jax.random.split(key)
    x = jax.random.normal(kx, (2, 1, 28, 28), jnp.float32)   # NCHW, MNIST-like
    params = init_params(kp)
    prepped = prepare_params(params)

    out = simple_cnn_forward(x, prepped)
    out = jax.block_until_ready(out)

    ref = reference_forward(x, params)
    assert out.shape == (2, 10)
    # Tolerance covers the MXU's default f32-operand contraction precision on all
    # generations while still catching any structural/layout bug (those are O(0.1+)).
    err = jnp.max(jnp.abs(out - ref))
    assert jnp.allclose(out, ref, atol=5e-3, rtol=5e-3), f"mismatch vs reference: {err}"
    print("KERNEL_OK")
</pallas_src>

<mosaic_0001>
module attributes {stable_mosaic.version = 11 : i64} {
  func.func @fused_cnn_kernel(%arg0: i32, %arg1: memref<9x8x196xf32, #tpu.memory_space<vmem>>, %arg2: memref<90xf32, #tpu.memory_space<smem>>, %arg3: memref<10xf32, #tpu.memory_space<smem>>, %arg4: memref<10x196x10xf32, #tpu.memory_space<vmem>>, %arg5: memref<1x10xf32, #tpu.memory_space<vmem>>, %arg6: memref<8x10xf32, #tpu.memory_space<vmem>>) attributes {dimension_semantics = [#tpu.dimension_semantics<parallel>], iteration_bounds = array<i64: 1>, scalar_prefetch = 0 : i64, scratch_operands = 0 : i64, tpu.core_type = #tpu.core_type<tc>, window_params = [{transform_indices = @transform_0, window_bounds = array<i64: 9, 8, 196>}, {transform_indices = @transform_1, window_bounds = array<i64: 90>}, {transform_indices = @transform_2, window_bounds = array<i64: 10>}, {pipeline_mode = #tpu.pipeline_mode<synchronous>, transform_indices = @transform_3, window_bounds = array<i64: 10, 196, 10>}, {pipeline_mode = #tpu.pipeline_mode<synchronous>, transform_indices = @transform_4, window_bounds = array<i64: 1, 10>}, {transform_indices = @transform_5, window_bounds = array<i64: 8, 10>}]} {
    %cst = arith.constant 0.000000e+00 : f32
    %0 = vector.broadcast %cst : f32 to vector<8x10xf32>
    %cst_0 = arith.constant 0.000000e+00 : f32
    %1 = vector.broadcast %cst_0 : f32 to vector<8x196xf32>
    %c0 = arith.constant 0 : index
    %2 = memref.load %arg2[%c0] : memref<90xf32, #tpu.memory_space<smem>>
    %c0_1 = arith.constant 0 : index
    %c0_2 = arith.constant 0 : index
    %c0_3 = arith.constant 0 : index
    %3 = vector.load %arg1[%c0_1, %c0_2, %c0_3] : memref<9x8x196xf32, #tpu.memory_space<vmem>>, vector<1x8x196xf32>
    %4 = vector.shape_cast %3 : vector<1x8x196xf32> to vector<8x196xf32>
    %5 = vector.broadcast %2 : f32 to vector<8x196xf32>
    %6 = arith.mulf %5, %4 : vector<8x196xf32>
    %7 = arith.addf %1, %6 : vector<8x196xf32>
    %c1 = arith.constant 1 : index
    %8 = memref.load %arg2[%c1] : memref<90xf32, #tpu.memory_space<smem>>
    %c1_4 = arith.constant 1 : index
    %c0_5 = arith.constant 0 : index
    %c0_6 = arith.constant 0 : index
    %9 = vector.load %arg1[%c1_4, %c0_5, %c0_6] : memref<9x8x196xf32, #tpu.memory_space<vmem>>, vector<1x8x196xf32>
    %10 = vector.shape_cast %9 : vector<1x8x196xf32> to vector<8x196xf32>
    %11 = vector.broadcast %8 : f32 to vector<8x196xf32>
    %12 = arith.mulf %11, %10 : vector<8x196xf32>
    %13 = arith.addf %7, %12 : vector<8x196xf32>
    %c2 = arith.constant 2 : index
    %14 = memref.load %arg2[%c2] : memref<90xf32, #tpu.memory_space<smem>>
    %c2_7 = arith.constant 2 : index
    %c0_8 = arith.constant 0 : index
    %c0_9 = arith.constant 0 : index
    %15 = vector.load %arg1[%c2_7, %c0_8, %c0_9] : memref<9x8x196xf32, #tpu.memory_space<vmem>>, vector<1x8x196xf32>
    %16 = vector.shape_cast %15 : vector<1x8x196xf32> to vector<8x196xf32>
    %17 = vector.broadcast %14 : f32 to vector<8x196xf32>
    %18 = arith.mulf %17, %16 : vector<8x196xf32>
    %19 = arith.addf %13, %18 : vector<8x196xf32>
    %c3 = arith.constant 3 : index
    %20 = memref.load %arg2[%c3] : memref<90xf32, #tpu.memory_space<smem>>
    %c3_10 = arith.constant 3 : index
    %c0_11 = arith.constant 0 : index
    %c0_12 = arith.constant 0 : index
    %21 = vector.load %arg1[%c3_10, %c0_11, %c0_12] : memref<9x8x196xf32, #tpu.memory_space<vmem>>, vector<1x8x196xf32>
    %22 = vector.shape_cast %21 : vector<1x8x196xf32> to vector<8x196xf32>
    %23 = vector.broadcast %20 : f32 to vector<8x196xf32>
    %24 = arith.mulf %23, %22 : vector<8x196xf32>
    %25 = arith.addf %19, %24 : vector<8x196xf32>
    %c4 = arith.constant 4 : index
    %26 = memref.load %arg2[%c4] : memref<90xf32, #tpu.memory_space<smem>>
    %c4_13 = arith.constant 4 : index
    %c0_14 = arith.constant 0 : index
    %c0_15 = arith.constant 0 : index
    %27 = vector.load %arg1[%c4_13, %c0_14, %c0_15] : memref<9x8x196xf32, #tpu.memory_space<vmem>>, vector<1x8x196xf32>
    %28 = vector.shape_cast %27 : vector<1x8x196xf32> to vector<8x196xf32>
    %29 = vector.broadcast %26 : f32 to vector<8x196xf32>
    %30 = arith.mulf %29, %28 : vector<8x196xf32>
    %31 = arith.addf %25, %30 : vector<8x196xf32>
    %c5 = arith.constant 5 : index
    %32 = memref.load %arg2[%c5] : memref<90xf32, #tpu.memory_space<smem>>
    %c5_16 = arith.constant 5 : index
    %c0_17 = arith.constant 0 : index
    %c0_18 = arith.constant 0 : index
    %33 = vector.load %arg1[%c5_16, %c0_17, %c0_18] : memref<9x8x196xf32, #tpu.memory_space<vmem>>, vector<1x8x196xf32>
    %34 = vector.shape_cast %33 : vector<1x8x196xf32> to vector<8x196xf32>
    %35 = vector.broadcast %32 : f32 to vector<8x196xf32>
    %36 = arith.mulf %35, %34 : vector<8x196xf32>
    %37 = arith.addf %31, %36 : vector<8x196xf32>
    %c6 = arith.constant 6 : index
    %38 = memref.load %arg2[%c6] : memref<90xf32, #tpu.memory_space<smem>>
    %c6_19 = arith.constant 6 : index
    %c0_20 = arith.constant 0 : index
    %c0_21 = arith.constant 0 : index
    %39 = vector.load %arg1[%c6_19, %c0_20, %c0_21] : memref<9x8x196xf32, #tpu.memory_space<vmem>>, vector<1x8x196xf32>
    %40 = vector.shape_cast %39 : vector<1x8x196xf32> to vector<8x196xf32>
    %41 = vector.broadcast %38 : f32 to vector<8x196xf32>
    %42 = arith.mulf %41, %40 : vector<8x196xf32>
    %43 = arith.addf %37, %42 : vector<8x196xf32>
    %c7 = arith.constant 7 : index
    %44 = memref.load %arg2[%c7] : memref<90xf32, #tpu.memory_space<smem>>
    %c7_22 = arith.constant 7 : index
    %c0_23 = arith.constant 0 : index
    %c0_24 = arith.constant 0 : index
    %45 = vector.load %arg1[%c7_22, %c0_23, %c0_24] : memref<9x8x196xf32, #tpu.memory_space<vmem>>, vector<1x8x196xf32>
    %46 = vector.shape_cast %45 : vector<1x8x196xf32> to vector<8x196xf32>
    %47 = vector.broadcast %44 : f32 to vector<8x196xf32>
    %48 = arith.mulf %47, %46 : vector<8x196xf32>
    %49 = arith.addf %43, %48 : vector<8x196xf32>
    %c8 = arith.constant 8 : index
    %50 = memref.load %arg2[%c8] : memref<90xf32, #tpu.memory_space<smem>>
    %c8_25 = arith.constant 8 : index
    %c0_26 = arith.constant 0 : index
    %c0_27 = arith.constant 0 : index
    %51 = vector.load %arg1[%c8_25, %c0_26, %c0_27] : memref<9x8x196xf32, #tpu.memory_space<vmem>>, vector<1x8x196xf32>
    %52 = vector.shape_cast %51 : vector<1x8x196xf32> to vector<8x196xf32>
    %53 = vector.broadcast %50 : f32 to vector<8x196xf32>
    %54 = arith.mulf %53, %52 : vector<8x196xf32>
    %55 = arith.addf %49, %54 : vector<8x196xf32>
    %c0_28 = arith.constant 0 : index
    %56 = memref.load %arg3[%c0_28] : memref<10xf32, #tpu.memory_space<smem>>
    %57 = vector.broadcast %56 : f32 to vector<8x196xf32>
    %58 = arith.addf %55, %57 : vector<8x196xf32>
    %cst_29 = arith.constant 0.000000e+00 : f32
    %59 = vector.broadcast %cst_29 : f32 to vector<8x196xf32>
    %60 = arith.maximumf %58, %59 : vector<8x196xf32>
    %c0_30 = arith.constant 0 : index
    %c0_31 = arith.constant 0 : index
    %c0_32 = arith.constant 0 : index
    %61 = vector.load %arg4[%c0_30, %c0_31, %c0_32] : memref<10x196x10xf32, #tpu.memory_space<vmem>>, vector<1x196x10xf32>
    %62 = vector.shape_cast %61 : vector<1x196x10xf32> to vector<196x10xf32>
    %cst_33 = arith.constant dense<0.000000e+00> : vector<8x10xf32>
    %63 = tpu.matmul %60, %62, %cst_33 {dimension_numbers = #tpu.dot_dimension_numbers<[1], [0], [0], [1], [0, 0, 1, 1], [], []>} : vector<8x196xf32>, vector<196x10xf32>, vector<8x10xf32> -> vector<8x10xf32>
    %64 = arith.addf %0, %63 : vector<8x10xf32>
    %cst_34 = arith.constant 0.000000e+00 : f32
    %65 = vector.broadcast %cst_34 : f32 to vector<8x196xf32>
    %c9 = arith.constant 9 : index
    %66 = memref.load %arg2[%c9] : memref<90xf32, #tpu.memory_space<smem>>
    %c0_35 = arith.constant 0 : index
    %c0_36 = arith.constant 0 : index
    %c0_37 = arith.constant 0 : index
    %67 = vector.load %arg1[%c0_35, %c0_36, %c0_37] : memref<9x8x196xf32, #tpu.memory_space<vmem>>, vector<1x8x196xf32>
    %68 = vector.shape_cast %67 : vector<1x8x196xf32> to vector<8x196xf32>
    %69 = vector.broadcast %66 : f32 to vector<8x196xf32>
    %70 = arith.mulf %69, %68 : vector<8x196xf32>
    %71 = arith.addf %65, %70 : vector<8x196xf32>
    %c10 = arith.constant 10 : index
    %72 = memref.load %arg2[%c10] : memref<90xf32, #tpu.memory_space<smem>>
    %c1_38 = arith.constant 1 : index
    %c0_39 = arith.constant 0 : index
    %c0_40 = arith.constant 0 : index
    %73 = vector.load %arg1[%c1_38, %c0_39, %c0_40] : memref<9x8x196xf32, #tpu.memory_space<vmem>>, vector<1x8x196xf32>
    %74 = vector.shape_cast %73 : vector<1x8x196xf32> to vector<8x196xf32>
    %75 = vector.broadcast %72 : f32 to vector<8x196xf32>
    %76 = arith.mulf %75, %74 : vector<8x196xf32>
    %77 = arith.addf %71, %76 : vector<8x196xf32>
    %c11 = arith.constant 11 : index
    %78 = memref.load %arg2[%c11] : memref<90xf32, #tpu.memory_space<smem>>
    %c2_41 = arith.constant 2 : index
    %c0_42 = arith.constant 0 : index
    %c0_43 = arith.constant 0 : index
    %79 = vector.load %arg1[%c2_41, %c0_42, %c0_43] : memref<9x8x196xf32, #tpu.memory_space<vmem>>, vector<1x8x196xf32>
    %80 = vector.shape_cast %79 : vector<1x8x196xf32> to vector<8x196xf32>
    %81 = vector.broadcast %78 : f32 to vector<8x196xf32>
    %82 = arith.mulf %81, %80 : vector<8x196xf32>
    %83 = arith.addf %77, %82 : vector<8x196xf32>
    %c12 = arith.constant 12 : index
    %84 = memref.load %arg2[%c12] : memref<90xf32, #tpu.memory_space<smem>>
    %c3_44 = arith.constant 3 : index
    %c0_45 = arith.constant 0 : index
    %c0_46 = arith.constant 0 : index
    %85 = vector.load %arg1[%c3_44, %c0_45, %c0_46] : memref<9x8x196xf32, #tpu.memory_space<vmem>>, vector<1x8x196xf32>
    %86 = vector.shape_cast %85 : vector<1x8x196xf32> to vector<8x196xf32>
    %87 = vector.broadcast %84 : f32 to vector<8x196xf32>
    %88 = arith.mulf %87, %86 : vector<8x196xf32>
    %89 = arith.addf %83, %88 : vector<8x196xf32>
    %c13 = arith.constant 13 : index
    %90 = memref.load %arg2[%c13] : memref<90xf32, #tpu.memory_space<smem>>
    %c4_47 = arith.constant 4 : index
    %c0_48 = arith.constant 0 : index
    %c0_49 = arith.constant 0 : index
    %91 = vector.load %arg1[%c4_47, %c0_48, %c0_49] : memref<9x8x196xf32, #tpu.memory_space<vmem>>, vector<1x8x196xf32>
    %92 = vector.shape_cast %91 : vector<1x8x196xf32> to vector<8x196xf32>
    %93 = vector.broadcast %90 : f32 to vector<8x196xf32>
    %94 = arith.mulf %93, %92 : vector<8x196xf32>
    %95 = arith.addf %89, %94 : vector<8x196xf32>
    %c14 = arith.constant 14 : index
    %96 = memref.load %arg2[%c14] : memref<90xf32, #tpu.memory_space<smem>>
    %c5_50 = arith.constant 5 : index
    %c0_51 = arith.constant 0 : index
    %c0_52 = arith.constant 0 : index
    %97 = vector.load %arg1[%c5_50, %c0_51, %c0_52] : memref<9x8x196xf32, #tpu.memory_space<vmem>>, vector<1x8x196xf32>
    %98 = vector.shape_cast %97 : vector<1x8x196xf32> to vector<8x196xf32>
    %99 = vector.broadcast %96 : f32 to vector<8x196xf32>
    %100 = arith.mulf %99, %98 : vector<8x196xf32>
    %101 = arith.addf %95, %100 : vector<8x196xf32>
    %c15 = arith.constant 15 : index
    %102 = memref.load %arg2[%c15] : memref<90xf32, #tpu.memory_space<smem>>
    %c6_53 = arith.constant 6 : index
    %c0_54 = arith.constant 0 : index
    %c0_55 = arith.constant 0 : index
    %103 = vector.load %arg1[%c6_53, %c0_54, %c0_55] : memref<9x8x196xf32, #tpu.memory_space<vmem>>, vector<1x8x196xf32>
    %104 = vector.shape_cast %103 : vector<1x8x196xf32> to vector<8x196xf32>
    %105 = vector.broadcast %102 : f32 to vector<8x196xf32>
    %106 = arith.mulf %105, %104 : vector<8x196xf32>
    %107 = arith.addf %101, %106 : vector<8x196xf32>
    %c16 = arith.constant 16 : index
    %108 = memref.load %arg2[%c16] : memref<90xf32, #tpu.memory_space<smem>>
    %c7_56 = arith.constant 7 : index
    %c0_57 = arith.constant 0 : index
    %c0_58 = arith.constant 0 : index
    %109 = vector.load %arg1[%c7_56, %c0_57, %c0_58] : memref<9x8x196xf32, #tpu.memory_space<vmem>>, vector<1x8x196xf32>
    %110 = vector.shape_cast %109 : vector<1x8x196xf32> to vector<8x196xf32>
    %111 = vector.broadcast %108 : f32 to vector<8x196xf32>
    %112 = arith.mulf %111, %110 : vector<8x196xf32>
    %113 = arith.addf %107, %112 : vector<8x196xf32>
    %c17 = arith.constant 17 : index
    %114 = memref.load %arg2[%c17] : memref<90xf32, #tpu.memory_space<smem>>
    %c8_59 = arith.constant 8 : index
    %c0_60 = arith.constant 0 : index
    %c0_61 = arith.constant 0 : index
    %115 = vector.load %arg1[%c8_59, %c0_60, %c0_61] : memref<9x8x196xf32, #tpu.memory_space<vmem>>, vector<1x8x196xf32>
    %116 = vector.shape_cast %115 : vector<1x8x196xf32> to vector<8x196xf32>
    %117 = vector.broadcast %114 : f32 to vector<8x196xf32>
    %118 = arith.mulf %117, %116 : vector<8x196xf32>
    %119 = arith.addf %113, %118 : vector<8x196xf32>
    %c1_62 = arith.constant 1 : index
    %120 = memref.load %arg3[%c1_62] : memref<10xf32, #tpu.memory_space<smem>>
    %121 = vector.broadcast %120 : f32 to vector<8x196xf32>
    %122 = arith.addf %119, %121 : vector<8x196xf32>
    %cst_63 = arith.constant 0.000000e+00 : f32
    %123 = vector.broadcast %cst_63 : f32 to vector<8x196xf32>
    %124 = arith.maximumf %122, %123 : vector<8x196xf32>
    %c1_64 = arith.constant 1 : index
    %c0_65 = arith.constant 0 : index
    %c0_66 = arith.constant 0 : index
    %125 = vector.load %arg4[%c1_64, %c0_65, %c0_66] : memref<10x196x10xf32, #tpu.memory_space<vmem>>, vector<1x196x10xf32>
    %126 = vector.shape_cast %125 : vector<1x196x10xf32> to vector<196x10xf32>
    %cst_67 = arith.constant dense<0.000000e+00> : vector<8x10xf32>
    %127 = tpu.matmul %124, %126, %cst_67 {dimension_numbers = #tpu.dot_dimension_numbers<[1], [0], [0], [1], [0, 0, 1, 1], [], []>} : vector<8x196xf32>, vector<196x10xf32>, vector<8x10xf32> -> vector<8x10xf32>
    %128 = arith.addf %64, %127 : vector<8x10xf32>
    %cst_68 = arith.constant 0.000000e+00 : f32
    %129 = vector.broadcast %cst_68 : f32 to vector<8x196xf32>
    %c18 = arith.constant 18 : index
    %130 = memref.load %arg2[%c18] : memref<90xf32, #tpu.memory_space<smem>>
    %c0_69 = arith.constant 0 : index
    %c0_70 = arith.constant 0 : index
    %c0_71 = arith.constant 0 : index
    %131 = vector.load %arg1[%c0_69, %c0_70, %c0_71] : memref<9x8x196xf32, #tpu.memory_space<vmem>>, vector<1x8x196xf32>
    %132 = vector.shape_cast %131 : vector<1x8x196xf32> to vector<8x196xf32>
    %133 = vector.broadcast %130 : f32 to vector<8x196xf32>
    %134 = arith.mulf %133, %132 : vector<8x196xf32>
    %135 = arith.addf %129, %134 : vector<8x196xf32>
    %c19 = arith.constant 19 : index
    %136 = memref.load %arg2[%c19] : memref<90xf32, #tpu.memory_space<smem>>
    %c1_72 = arith.constant 1 : index
    %c0_73 = arith.constant 0 : index
    %c0_74 = arith.constant 0 : index
    %137 = vector.load %arg1[%c1_72, %c0_73, %c0_74] : memref<9x8x196xf32, #tpu.memory_space<vmem>>, vector<1x8x196xf32>
    %138 = vector.shape_cast %137 : vector<1x8x196xf32> to vector<8x196xf32>
    %139 = vector.broadcast %136 : f32 to vector<8x196xf32>
    %140 = arith.mulf %139, %138 : vector<8x196xf32>
    %141 = arith.addf %135, %140 : vector<8x196xf32>
    %c20 = arith.constant 20 : index
    %142 = memref.load %arg2[%c20] : memref<90xf32, #tpu.memory_space<smem>>
    %c2_75 = arith.constant 2 : index
    %c0_76 = arith.constant 0 : index
    %c0_77 = arith.constant 0 : index
    %143 = vector.load %arg1[%c2_75, %c0_76, %c0_77] : memref<9x8x196xf32, #tpu.memory_space<vmem>>, vector<1x8x196xf32>
    %144 = vector.shape_cast %143 : vector<1x8x196xf32> to vector<8x196xf32>
    %145 = vector.broadcast %142 : f32 to vector<8x196xf32>
    %146 = arith.mulf %145, %144 : vector<8x196xf32>
    %147 = arith.addf %141, %146 : vector<8x196xf32>
    %c21 = arith.constant 21 : index
    %148 = memref.load %arg2[%c21] : memref<90xf32, #tpu.memory_space<smem>>
    %c3_78 = arith.constant 3 : index
    %c0_79 = arith.constant 0 : index
    %c0_80 = arith.constant 0 : index
    %149 = vector.load %arg1[%c3_78, %c0_79, %c0_80] : memref<9x8x196xf32, #tpu.memory_space<vmem>>, vector<1x8x196xf32>
    %150 = vector.shape_cast %149 : vector<1x8x196xf32> to vector<8x196xf32>
    %151 = vector.broadcast %148 : f32 to vector<8x196xf32>
    %152 = arith.mulf %151, %150 : vector<8x196xf32>
    %153 = arith.addf %147, %152 : vector<8x196xf32>
    %c22 = arith.constant 22 : index
    %154 = memref.load %arg2[%c22] : memref<90xf32, #tpu.memory_space<smem>>
    %c4_81 = arith.constant 4 : index
    %c0_82 = arith.constant 0 : index
    %c0_83 = arith.constant 0 : index
    %155 = vector.load %arg1[%c4_81, %c0_82, %c0_83] : memref<9x8x196xf32, #tpu.memory_space<vmem>>, vector<1x8x196xf32>
    %156 = vector.shape_cast %155 : vector<1x8x196xf32> to vector<8x196xf32>
    %157 = vector.broadcast %154 : f32 to vector<8x196xf32>
    %158 = arith.mulf %157, %156 : vector<8x196xf32>
    %159 = arith.addf %153, %158 : vector<8x196xf32>
    %c23 = arith.constant 23 : index
    %160 = memref.load %arg2[%c23] : memref<90xf32, #tpu.memory_space<smem>>
    %c5_84 = arith.constant 5 : index
    %c0_85 = arith.constant 0 : index
    %c0_86 = arith.constant 0 : index
    %161 = vector.load %arg1[%c5_84, %c0_85, %c0_86] : memref<9x8x196xf32, #tpu.memory_space<vmem>>, vector<1x8x196xf32>
    %162 = vector.shape_cast %161 : vector<1x8x196xf32> to vector<8x196xf32>
    %163 = vector.broadcast %160 : f32 to vector<8x196xf32>
    %164 = arith.mulf %163, %162 : vector<8x196xf32>
    %165 = arith.addf %159, %164 : vector<8x196xf32>
    %c24 = arith.constant 24 : index
    %166 = memref.load %arg2[%c24] : memref<90xf32, #tpu.memory_space<smem>>
    %c6_87 = arith.constant 6 : index
    %c0_88 = arith.constant 0 : index
    %c0_89 = arith.constant 0 : index
    %167 = vector.load %arg1[%c6_87, %c0_88, %c0_89] : memref<9x8x196xf32, #tpu.memory_space<vmem>>, vector<1x8x196xf32>
    %168 = vector.shape_cast %167 : vector<1x8x196xf32> to vector<8x196xf32>
    %169 = vector.broadcast %166 : f32 to vector<8x196xf32>
    %170 = arith.mulf %169, %168 : vector<8x196xf32>
    %171 = arith.addf %165, %170 : vector<8x196xf32>
    %c25 = arith.constant 25 : index
    %172 = memref.load %arg2[%c25] : memref<90xf32, #tpu.memory_space<smem>>
    %c7_90 = arith.constant 7 : index
    %c0_91 = arith.constant 0 : index
    %c0_92 = arith.constant 0 : index
    %173 = vector.load %arg1[%c7_90, %c0_91, %c0_92] : memref<9x8x196xf32, #tpu.memory_space<vmem>>, vector<1x8x196xf32>
    %174 = vector.shape_cast %173 : vector<1x8x196xf32> to vector<8x196xf32>
    %175 = vector.broadcast %172 : f32 to vector<8x196xf32>
    %176 = arith.mulf %175, %174 : vector<8x196xf32>
    %177 = arith.addf %171, %176 : vector<8x196xf32>
    %c26 = arith.constant 26 : index
    %178 = memref.load %arg2[%c26] : memref<90xf32, #tpu.memory_space<smem>>
    %c8_93 = arith.constant 8 : index
    %c0_94 = arith.constant 0 : index
    %c0_95 = arith.constant 0 : index
    %179 = vector.load %arg1[%c8_93, %c0_94, %c0_95] : memref<9x8x196xf32, #tpu.memory_space<vmem>>, vector<1x8x196xf32>
    %180 = vector.shape_cast %179 : vector<1x8x196xf32> to vector<8x196xf32>
    %181 = vector.broadcast %178 : f32 to vector<8x196xf32>
    %182 = arith.mulf %181, %180 : vector<8x196xf32>
    %183 = arith.addf %177, %182 : vector<8x196xf32>
    %c2_96 = arith.constant 2 : index
    %184 = memref.load %arg3[%c2_96] : memref<10xf32, #tpu.memory_space<smem>>
    %185 = vector.broadcast %184 : f32 to vector<8x196xf32>
    %186 = arith.addf %183, %185 : vector<8x196xf32>
    %cst_97 = arith.constant 0.000000e+00 : f32
    %187 = vector.broadcast %cst_97 : f32 to vector<8x196xf32>
    %188 = arith.maximumf %186, %187 : vector<8x196xf32>
    %c2_98 = arith.constant 2 : index
    %c0_99 = arith.constant 0 : index
    %c0_100 = arith.constant 0 : index
    %189 = vector.load %arg4[%c2_98, %c0_99, %c0_100] : memref<10x196x10xf32, #tpu.memory_space<vmem>>, vector<1x196x10xf32>
    %190 = vector.shape_cast %189 : vector<1x196x10xf32> to vector<196x10xf32>
    %cst_101 = arith.constant dense<0.000000e+00> : vector<8x10xf32>
    %191 = tpu.matmul %188, %190, %cst_101 {dimension_numbers = #tpu.dot_dimension_numbers<[1], [0], [0], [1], [0, 0, 1, 1], [], []>} : vector<8x196xf32>, vector<196x10xf32>, vector<8x10xf32> -> vector<8x10xf32>
    %192 = arith.addf %128, %191 : vector<8x10xf32>
    %cst_102 = arith.constant 0.000000e+00 : f32
    %193 = vector.broadcast %cst_102 : f32 to vector<8x196xf32>
    %c27 = arith.constant 27 : index
    %194 = memref.load %arg2[%c27] : memref<90xf32, #tpu.memory_space<smem>>
    %c0_103 = arith.constant 0 : index
    %c0_104 = arith.constant 0 : index
    %c0_105 = arith.constant 0 : index
    %195 = vector.load %arg1[%c0_103, %c0_104, %c0_105] : memref<9x8x196xf32, #tpu.memory_space<vmem>>, vector<1x8x196xf32>
    %196 = vector.shape_cast %195 : vector<1x8x196xf32> to vector<8x196xf32>
    %197 = vector.broadcast %194 : f32 to vector<8x196xf32>
    %198 = arith.mulf %197, %196 : vector<8x196xf32>
    %199 = arith.addf %193, %198 : vector<8x196xf32>
    %c28 = arith.constant 28 : index
    %200 = memref.load %arg2[%c28] : memref<90xf32, #tpu.memory_space<smem>>
    %c1_106 = arith.constant 1 : index
    %c0_107 = arith.constant 0 : index
    %c0_108 = arith.constant 0 : index
    %201 = vector.load %arg1[%c1_106, %c0_107, %c0_108] : memref<9x8x196xf32, #tpu.memory_space<vmem>>, vector<1x8x196xf32>
    %202 = vector.shape_cast %201 : vector<1x8x196xf32> to vector<8x196xf32>
    %203 = vector.broadcast %200 : f32 to vector<8x196xf32>
    %204 = arith.mulf %203, %202 : vector<8x196xf32>
    %205 = arith.addf %199, %204 : vector<8x196xf32>
    %c29 = arith.constant 29 : index
    %206 = memref.load %arg2[%c29] : memref<90xf32, #tpu.memory_space<smem>>
    %c2_109 = arith.constant 2 : index
    %c0_110 = arith.constant 0 : index
    %c0_111 = arith.constant 0 : index
    %207 = vector.load %arg1[%c2_109, %c0_110, %c0_111] : memref<9x8x196xf32, #tpu.memory_space<vmem>>, vector<1x8x196xf32>
    %208 = vector.shape_cast %207 : vector<1x8x196xf32> to vector<8x196xf32>
    %209 = vector.broadcast %206 : f32 to vector<8x196xf32>
    %210 = arith.mulf %209, %208 : vector<8x196xf32>
    %211 = arith.addf %205, %210 : vector<8x196xf32>
    %c30 = arith.constant 30 : index
    %212 = memref.load %arg2[%c30] : memref<90xf32, #tpu.memory_space<smem>>
    %c3_112 = arith.constant 3 : index
    %c0_113 = arith.constant 0 : index
    %c0_114 = arith.constant 0 : index
    %213 = vector.load %arg1[%c3_112, %c0_113, %c0_114] : memref<9x8x196xf32, #tpu.memory_space<vmem>>, vector<1x8x196xf32>
    %214 = vector.shape_cast %213 : vector<1x8x196xf32> to vector<8x196xf32>
    %215 = vector.broadcast %212 : f32 to vector<8x196xf32>
    %216 = arith.mulf %215, %214 : vector<8x196xf32>
    %217 = arith.addf %211, %216 : vector<8x196xf32>
    %c31 = arith.constant 31 : index
    %218 = memref.load %arg2[%c31] : memref<90xf32, #tpu.memory_space<smem>>
    %c4_115 = arith.constant 4 : index
    %c0_116 = arith.constant 0 : index
    %c0_117 = arith.constant 0 : index
    %219 = vector.load %arg1[%c4_115, %c0_116, %c0_117] : memref<9x8x196xf32, #tpu.memory_space<vmem>>, vector<1x8x196xf32>
    %220 = vector.shape_cast %219 : vector<1x8x196xf32> to vector<8x196xf32>
    %221 = vector.broadcast %218 : f32 to vector<8x196xf32>
    %222 = arith.mulf %221, %220 : vector<8x196xf32>
    %223 = arith.addf %217, %222 : vector<8x196xf32>
    %c32 = arith.constant 32 : index
    %224 = memref.load %arg2[%c32] : memref<90xf32, #tpu.memory_space<smem>>
    %c5_118 = arith.constant 5 : index
    %c0_119 = arith.constant 0 : index
    %c0_120 = arith.constant 0 : index
    %225 = vector.load %arg1[%c5_118, %c0_119, %c0_120] : memref<9x8x196xf32, #tpu.memory_space<vmem>>, vector<1x8x196xf32>
    %226 = vector.shape_cast %225 : vector<1x8x196xf32> to vector<8x196xf32>
    %227 = vector.broadcast %224 : f32 to vector<8x196xf32>
    %228 = arith.mulf %227, %226 : vector<8x196xf32>
    %229 = arith.addf %223, %228 : vector<8x196xf32>
    %c33 = arith.constant 33 : index
    %230 = memref.load %arg2[%c33] : memref<90xf32, #tpu.memory_space<smem>>
    %c6_121 = arith.constant 6 : index
    %c0_122 = arith.constant 0 : index
    %c0_123 = arith.constant 0 : index
    %231 = vector.load %arg1[%c6_121, %c0_122, %c0_123] : memref<9x8x196xf32, #tpu.memory_space<vmem>>, vector<1x8x196xf32>
    %232 = vector.shape_cast %231 : vector<1x8x196xf32> to vector<8x196xf32>
    %233 = vector.broadcast %230 : f32 to vector<8x196xf32>
    %234 = arith.mulf %233, %232 : vector<8x196xf32>
    %235 = arith.addf %229, %234 : vector<8x196xf32>
    %c34 = arith.constant 34 : index
    %236 = memref.load %arg2[%c34] : memref<90xf32, #tpu.memory_space<smem>>
    %c7_124 = arith.constant 7 : index
    %c0_125 = arith.constant 0 : index
    %c0_126 = arith.constant 0 : index
    %237 = vector.load %arg1[%c7_124, %c0_125, %c0_126] : memref<9x8x196xf32, #tpu.memory_space<vmem>>, vector<1x8x196xf32>
    %238 = vector.shape_cast %237 : vector<1x8x196xf32> to vector<8x196xf32>
    %239 = vector.broadcast %236 : f32 to vector<8x196xf32>
    %240 = arith.mulf %239, %238 : vector<8x196xf32>
    %241 = arith.addf %235, %240 : vector<8x196xf32>
    %c35 = arith.constant 35 : index
    %242 = memref.load %arg2[%c35] : memref<90xf32, #tpu.memory_space<smem>>
    %c8_127 = arith.constant 8 : index
    %c0_128 = arith.constant 0 : index
    %c0_129 = arith.constant 0 : index
    %243 = vector.load %arg1[%c8_127, %c0_128, %c0_129] : memref<9x8x196xf32, #tpu.memory_space<vmem>>, vector<1x8x196xf32>
    %244 = vector.shape_cast %243 : vector<1x8x196xf32> to vector<8x196xf32>
    %245 = vector.broadcast %242 : f32 to vector<8x196xf32>
    %246 = arith.mulf %245, %244 : vector<8x196xf32>
    %247 = arith.addf %241, %246 : vector<8x196xf32>
    %c3_130 = arith.constant 3 : index
    %248 = memref.load %arg3[%c3_130] : memref<10xf32, #tpu.memory_space<smem>>
    %249 = vector.broadcast %248 : f32 to vector<8x196xf32>
    %250 = arith.addf %247, %249 : vector<8x196xf32>
    %cst_131 = arith.constant 0.000000e+00 : f32
    %251 = vector.broadcast %cst_131 : f32 to vector<8x196xf32>
    %252 = arith.maximumf %250, %251 : vector<8x196xf32>
    %c3_132 = arith.constant 3 : index
    %c0_133 = arith.constant 0 : index
    %c0_134 = arith.constant 0 : index
    %253 = vector.load %arg4[%c3_132, %c0_133, %c0_134] : memref<10x196x10xf32, #tpu.memory_space<vmem>>, vector<1x196x10xf32>
    %254 = vector.shape_cast %253 : vector<1x196x10xf32> to vector<196x10xf32>
    %cst_135 = arith.constant dense<0.000000e+00> : vector<8x10xf32>
    %255 = tpu.matmul %252, %254, %cst_135 {dimension_numbers = #tpu.dot_dimension_numbers<[1], [0], [0], [1], [0, 0, 1, 1], [], []>} : vector<8x196xf32>, vector<196x10xf32>, vector<8x10xf32> -> vector<8x10xf32>
    %256 = arith.addf %192, %255 : vector<8x10xf32>
    %cst_136 = arith.constant 0.000000e+00 : f32
    %257 = vector.broadcast %cst_136 : f32 to vector<8x196xf32>
    %c36 = arith.constant 36 : index
    %258 = memref.load %arg2[%c36] : memref<90xf32, #tpu.memory_space<smem>>
    %c0_137 = arith.constant 0 : index
    %c0_138 = arith.constant 0 : index
    %c0_139 = arith.constant 0 : index
    %259 = vector.load %arg1[%c0_137, %c0_138, %c0_139] : memref<9x8x196xf32, #tpu.memory_space<vmem>>, vector<1x8x196xf32>
    %260 = vector.shape_cast %259 : vector<1x8x196xf32> to vector<8x196xf32>
    %261 = vector.broadcast %258 : f32 to vector<8x196xf32>
    %262 = arith.mulf %261, %260 : vector<8x196xf32>
    %263 = arith.addf %257, %262 : vector<8x196xf32>
    %c37 = arith.constant 37 : index
    %264 = memref.load %arg2[%c37] : memref<90xf32, #tpu.memory_space<smem>>
    %c1_140 = arith.constant 1 : index
    %c0_141 = arith.constant 0 : index
    %c0_142 = arith.constant 0 : index
    %265 = vector.load %arg1[%c1_140, %c0_141, %c0_142] : memref<9x8x196xf32, #tpu.memory_space<vmem>>, vector<1x8x196xf32>
    %266 = vector.shape_cast %265 : vector<1x8x196xf32> to vector<8x196xf32>
    %267 = vector.broadcast %264 : f32 to vector<8x196xf32>
    %268 = arith.mulf %267, %266 : vector<8x196xf32>
    %269 = arith.addf %263, %268 : vector<8x196xf32>
    %c38 = arith.constant 38 : index
    %270 = memref.load %arg2[%c38] : memref<90xf32, #tpu.memory_space<smem>>
    %c2_143 = arith.constant 2 : index
    %c0_144 = arith.constant 0 : index
    %c0_145 = arith.constant 0 : index
    %271 = vector.load %arg1[%c2_143, %c0_144, %c0_145] : memref<9x8x196xf32, #tpu.memory_space<vmem>>, vector<1x8x196xf32>
    %272 = vector.shape_cast %271 : vector<1x8x196xf32> to vector<8x196xf32>
    %273 = vector.broadcast %270 : f32 to vector<8x196xf32>
    %274 = arith.mulf %273, %272 : vector<8x196xf32>
    %275 = arith.addf %269, %274 : vector<8x196xf32>
    %c39 = arith.constant 39 : index
    %276 = memref.load %arg2[%c39] : memref<90xf32, #tpu.memory_space<smem>>
    %c3_146 = arith.constant 3 : index
    %c0_147 = arith.constant 0 : index
    %c0_148 = arith.constant 0 : index
    %277 = vector.load %arg1[%c3_146, %c0_147, %c0_148] : memref<9x8x196xf32, #tpu.memory_space<vmem>>, vector<1x8x196xf32>
    %278 = vector.shape_cast %277 : vector<1x8x196xf32> to vector<8x196xf32>
    %279 = vector.broadcast %276 : f32 to vector<8x196xf32>
    %280 = arith.mulf %279, %278 : vector<8x196xf32>
    %281 = arith.addf %275, %280 : vector<8x196xf32>
    %c40 = arith.constant 40 : index
    %282 = memref.load %arg2[%c40] : memref<90xf32, #tpu.memory_space<smem>>
    %c4_149 = arith.constant 4 : index
    %c0_150 = arith.constant 0 : index
    %c0_151 = arith.constant 0 : index
    %283 = vector.load %arg1[%c4_149, %c0_150, %c0_151] : memref<9x8x196xf32, #tpu.memory_space<vmem>>, vector<1x8x196xf32>
    %284 = vector.shape_cast %283 : vector<1x8x196xf32> to vector<8x196xf32>
    %285 = vector.broadcast %282 : f32 to vector<8x196xf32>
    %286 = arith.mulf %285, %284 : vector<8x196xf32>
    %287 = arith.addf %281, %286 : vector<8x196xf32>
    %c41 = arith.constant 41 : index
    %288 = memref.load %arg2[%c41] : memref<90xf32, #tpu.memory_space<smem>>
    %c5_152 = arith.constant 5 : index
    %c0_153 = arith.constant 0 : index
    %c0_154 = arith.constant 0 : index
    %289 = vector.load %arg1[%c5_152, %c0_153, %c0_154] : memref<9x8x196xf32, #tpu.memory_space<vmem>>, vector<1x8x196xf32>
    %290 = vector.shape_cast %289 : vector<1x8x196xf32> to vector<8x196xf32>
    %291 = vector.broadcast %288 : f32 to vector<8x196xf32>
    %292 = arith.mulf %291, %290 : vector<8x196xf32>
    %293 = arith.addf %287, %292 : vector<8x196xf32>
    %c42 = arith.constant 42 : index
    %294 = memref.load %arg2[%c42] : memref<90xf32, #tpu.memory_space<smem>>
    %c6_155 = arith.constant 6 : index
    %c0_156 = arith.constant 0 : index
    %c0_157 = arith.constant 0 : index
    %295 = vector.load %arg1[%c6_155, %c0_156, %c0_157] : memref<9x8x196xf32, #tpu.memory_space<vmem>>, vector<1x8x196xf32>
    %296 = vector.shape_cast %295 : vector<1x8x196xf32> to vector<8x196xf32>
    %297 = vector.broadcast %294 : f32 to vector<8x196xf32>
    %298 = arith.mulf %297, %296 : vector<8x196xf32>
    %299 = arith.addf %293, %298 : vector<8x196xf32>
    %c43 = arith.constant 43 : index
    %300 = memref.load %arg2[%c43] : memref<90xf32, #tpu.memory_space<smem>>
    %c7_158 = arith.constant 7 : index
    %c0_159 = arith.constant 0 : index
    %c0_160 = arith.constant 0 : index
    %301 = vector.load %arg1[%c7_158, %c0_159, %c0_160] : memref<9x8x196xf32, #tpu.memory_space<vmem>>, vector<1x8x196xf32>
    %302 = vector.shape_cast %301 : vector<1x8x196xf32> to vector<8x196xf32>
    %303 = vector.broadcast %300 : f32 to vector<8x196xf32>
    %304 = arith.mulf %303, %302 : vector<8x196xf32>
    %305 = arith.addf %299, %304 : vector<8x196xf32>
    %c44 = arith.constant 44 : index
    %306 = memref.load %arg2[%c44] : memref<90xf32, #tpu.memory_space<smem>>
    %c8_161 = arith.constant 8 : index
    %c0_162 = arith.constant 0 : index
    %c0_163 = arith.constant 0 : index
    %307 = vector.load %arg1[%c8_161, %c0_162, %c0_163] : memref<9x8x196xf32, #tpu.memory_space<vmem>>, vector<1x8x196xf32>
    %308 = vector.shape_cast %307 : vector<1x8x196xf32> to vector<8x196xf32>
    %309 = vector.broadcast %306 : f32 to vector<8x196xf32>
    %310 = arith.mulf %309, %308 : vector<8x196xf32>
    %311 = arith.addf %305, %310 : vector<8x196xf32>
    %c4_164 = arith.constant 4 : index
    %312 = memref.load %arg3[%c4_164] : memref<10xf32, #tpu.memory_space<smem>>
    %313 = vector.broadcast %312 : f32 to vector<8x196xf32>
    %314 = arith.addf %311, %313 : vector<8x196xf32>
    %cst_165 = arith.constant 0.000000e+00 : f32
    %315 = vector.broadcast %cst_165 : f32 to vector<8x196xf32>
    %316 = arith.maximumf %314, %315 : vector<8x196xf32>
    %c4_166 = arith.constant 4 : index
    %c0_167 = arith.constant 0 : index
    %c0_168 = arith.constant 0 : index
    %317 = vector.load %arg4[%c4_166, %c0_167, %c0_168] : memref<10x196x10xf32, #tpu.memory_space<vmem>>, vector<1x196x10xf32>
    %318 = vector.shape_cast %317 : vector<1x196x10xf32> to vector<196x10xf32>
    %cst_169 = arith.constant dense<0.000000e+00> : vector<8x10xf32>
    %319 = tpu.matmul %316, %318, %cst_169 {dimension_numbers = #tpu.dot_dimension_numbers<[1], [0], [0], [1], [0, 0, 1, 1], [], []>} : vector<8x196xf32>, vector<196x10xf32>, vector<8x10xf32> -> vector<8x10xf32>
    %320 = arith.addf %256, %319 : vector<8x10xf32>
    %cst_170 = arith.constant 0.000000e+00 : f32
    %321 = vector.broadcast %cst_170 : f32 to vector<8x196xf32>
    %c45 = arith.constant 45 : index
    %322 = memref.load %arg2[%c45] : memref<90xf32, #tpu.memory_space<smem>>
    %c0_171 = arith.constant 0 : index
    %c0_172 = arith.constant 0 : index
    %c0_173 = arith.constant 0 : index
    %323 = vector.load %arg1[%c0_171, %c0_172, %c0_173] : memref<9x8x196xf32, #tpu.memory_space<vmem>>, vector<1x8x196xf32>
    %324 = vector.shape_cast %323 : vector<1x8x196xf32> to vector<8x196xf32>
    %325 = vector.broadcast %322 : f32 to vector<8x196xf32>
    %326 = arith.mulf %325, %324 : vector<8x196xf32>
    %327 = arith.addf %321, %326 : vector<8x196xf32>
    %c46 = arith.constant 46 : index
    %328 = memref.load %arg2[%c46] : memref<90xf32, #tpu.memory_space<smem>>
    %c1_174 = arith.constant 1 : index
    %c0_175 = arith.constant 0 : index
    %c0_176 = arith.constant 0 : index
    %329 = vector.load %arg1[%c1_174, %c0_175, %c0_176] : memref<9x8x196xf32, #tpu.memory_space<vmem>>, vector<1x8x196xf32>
    %330 = vector.shape_cast %329 : vector<1x8x196xf32> to vector<8x196xf32>
    %331 = vector.broadcast %328 : f32 to vector<8x196xf32>
    %332 = arith.mulf %331, %330 : vector<8x196xf32>
    %333 = arith.addf %327, %332 : vector<8x196xf32>
    %c47 = arith.constant 47 : index
    %334 = memref.load %arg2[%c47] : memref<90xf32, #tpu.memory_space<smem>>
    %c2_177 = arith.constant 2 : index
    %c0_178 = arith.constant 0 : index
    %c0_179 = arith.constant 0 : index
    %335 = vector.load %arg1[%c2_177, %c0_178, %c0_179] : memref<9x8x196xf32, #tpu.memory_space<vmem>>, vector<1x8x196xf32>
    %336 = vector.shape_cast %335 : vector<1x8x196xf32> to vector<8x196xf32>
    %337 = vector.broadcast %334 : f32 to vector<8x196xf32>
    %338 = arith.mulf %337, %336 : vector<8x196xf32>
    %339 = arith.addf %333, %338 : vector<8x196xf32>
    %c48 = arith.constant 48 : index
    %340 = memref.load %arg2[%c48] : memref<90xf32, #tpu.memory_space<smem>>
    %c3_180 = arith.constant 3 : index
    %c0_181 = arith.constant 0 : index
    %c0_182 = arith.constant 0 : index
    %341 = vector.load %arg1[%c3_180, %c0_181, %c0_182] : memref<9x8x196xf32, #tpu.memory_space<vmem>>, vector<1x8x196xf32>
    %342 = vector.shape_cast %341 : vector<1x8x196xf32> to vector<8x196xf32>
    %343 = vector.broadcast %340 : f32 to vector<8x196xf32>
    %344 = arith.mulf %343, %342 : vector<8x196xf32>
    %345 = arith.addf %339, %344 : vector<8x196xf32>
    %c49 = arith.constant 49 : index
    %346 = memref.load %arg2[%c49] : memref<90xf32, #tpu.memory_space<smem>>
    %c4_183 = arith.constant 4 : index
    %c0_184 = arith.constant 0 : index
    %c0_185 = arith.constant 0 : index
    %347 = vector.load %arg1[%c4_183, %c0_184, %c0_185] : memref<9x8x196xf32, #tpu.memory_space<vmem>>, vector<1x8x196xf32>
    %348 = vector.shape_cast %347 : vector<1x8x196xf32> to vector<8x196xf32>
    %349 = vector.broadcast %346 : f32 to vector<8x196xf32>
    %350 = arith.mulf %349, %348 : vector<8x196xf32>
    %351 = arith.addf %345, %350 : vector<8x196xf32>
    %c50 = arith.constant 50 : index
    %352 = memref.load %arg2[%c50] : memref<90xf32, #tpu.memory_space<smem>>
    %c5_186 = arith.constant 5 : index
    %c0_187 = arith.constant 0 : index
    %c0_188 = arith.constant 0 : index
    %353 = vector.load %arg1[%c5_186, %c0_187, %c0_188] : memref<9x8x196xf32, #tpu.memory_space<vmem>>, vector<1x8x196xf32>
    %354 = vector.shape_cast %353 : vector<1x8x196xf32> to vector<8x196xf32>
    %355 = vector.broadcast %352 : f32 to vector<8x196xf32>
    %356 = arith.mulf %355, %354 : vector<8x196xf32>
    %357 = arith.addf %351, %356 : vector<8x196xf32>
    %c51 = arith.constant 51 : index
    %358 = memref.load %arg2[%c51] : memref<90xf32, #tpu.memory_space<smem>>
    %c6_189 = arith.constant 6 : index
    %c0_190 = arith.constant 0 : index
    %c0_191 = arith.constant 0 : index
    %359 = vector.load %arg1[%c6_189, %c0_190, %c0_191] : memref<9x8x196xf32, #tpu.memory_space<vmem>>, vector<1x8x196xf32>
    %360 = vector.shape_cast %359 : vector<1x8x196xf32> to vector<8x196xf32>
    %361 = vector.broadcast %358 : f32 to vector<8x196xf32>
    %362 = arith.mulf %361, %360 : vector<8x196xf32>
    %363 = arith.addf %357, %362 : vector<8x196xf32>
    %c52 = arith.constant 52 : index
    %364 = memref.load %arg2[%c52] : memref<90xf32, #tpu.memory_space<smem>>
    %c7_192 = arith.constant 7 : index
    %c0_193 = arith.constant 0 : index
    %c0_194 = arith.constant 0 : index
    %365 = vector.load %arg1[%c7_192, %c0_193, %c0_194] : memref<9x8x196xf32, #tpu.memory_space<vmem>>, vector<1x8x196xf32>
    %366 = vector.shape_cast %365 : vector<1x8x196xf32> to vector<8x196xf32>
    %367 = vector.broadcast %364 : f32 to vector<8x196xf32>
    %368 = arith.mulf %367, %366 : vector<8x196xf32>
    %369 = arith.addf %363, %368 : vector<8x196xf32>
    %c53 = arith.constant 53 : index
    %370 = memref.load %arg2[%c53] : memref<90xf32, #tpu.memory_space<smem>>
    %c8_195 = arith.constant 8 : index
    %c0_196 = arith.constant 0 : index
    %c0_197 = arith.constant 0 : index
    %371 = vector.load %arg1[%c8_195, %c0_196, %c0_197] : memref<9x8x196xf32, #tpu.memory_space<vmem>>, vector<1x8x196xf32>
    %372 = vector.shape_cast %371 : vector<1x8x196xf32> to vector<8x196xf32>
    %373 = vector.broadcast %370 : f32 to vector<8x196xf32>
    %374 = arith.mulf %373, %372 : vector<8x196xf32>
    %375 = arith.addf %369, %374 : vector<8x196xf32>
    %c5_198 = arith.constant 5 : index
    %376 = memref.load %arg3[%c5_198] : memref<10xf32, #tpu.memory_space<smem>>
    %377 = vector.broadcast %376 : f32 to vector<8x196xf32>
    %378 = arith.addf %375, %377 : vector<8x196xf32>
    %cst_199 = arith.constant 0.000000e+00 : f32
    %379 = vector.broadcast %cst_199 : f32 to vector<8x196xf32>
    %380 = arith.maximumf %378, %379 : vector<8x196xf32>
    %c5_200 = arith.constant 5 : index
    %c0_201 = arith.constant 0 : index
    %c0_202 = arith.constant 0 : index
    %381 = vector.load %arg4[%c5_200, %c0_201, %c0_202] : memref<10x196x10xf32, #tpu.memory_space<vmem>>, vector<1x196x10xf32>
    %382 = vector.shape_cast %381 : vector<1x196x10xf32> to vector<196x10xf32>
    %cst_203 = arith.constant dense<0.000000e+00> : vector<8x10xf32>
    %383 = tpu.matmul %380, %382, %cst_203 {dimension_numbers = #tpu.dot_dimension_numbers<[1], [0], [0], [1], [0, 0, 1, 1], [], []>} : vector<8x196xf32>, vector<196x10xf32>, vector<8x10xf32> -> vector<8x10xf32>
    %384 = arith.addf %320, %383 : vector<8x10xf32>
    %cst_204 = arith.constant 0.000000e+00 : f32
    %385 = vector.broadcast %cst_204 : f32 to vector<8x196xf32>
    %c54 = arith.constant 54 : index
    %386 = memref.load %arg2[%c54] : memref<90xf32, #tpu.memory_space<smem>>
    %c0_205 = arith.constant 0 : index
    %c0_206 = arith.constant 0 : index
    %c0_207 = arith.constant 0 : index
    %387 = vector.load %arg1[%c0_205, %c0_206, %c0_207] : memref<9x8x196xf32, #tpu.memory_space<vmem>>, vector<1x8x196xf32>
    %388 = vector.shape_cast %387 : vector<1x8x196xf32> to vector<8x196xf32>
    %389 = vector.broadcast %386 : f32 to vector<8x196xf32>
    %390 = arith.mulf %389, %388 : vector<8x196xf32>
    %391 = arith.addf %385, %390 : vector<8x196xf32>
    %c55 = arith.constant 55 : index
    %392 = memref.load %arg2[%c55] : memref<90xf32, #tpu.memory_space<smem>>
    %c1_208 = arith.constant 1 : index
    %c0_209 = arith.constant 0 : index
    %c0_210 = arith.constant 0 : index
    %393 = vector.load %arg1[%c1_208, %c0_209, %c0_210] : memref<9x8x196xf32, #tpu.memory_space<vmem>>, vector<1x8x196xf32>
    %394 = vector.shape_cast %393 : vector<1x8x196xf32> to vector<8x196xf32>
    %395 = vector.broadcast %392 : f32 to vector<8x196xf32>
    %396 = arith.mulf %395, %394 : vector<8x196xf32>
    %397 = arith.addf %391, %396 : vector<8x196xf32>
    %c56 = arith.constant 56 : index
    %398 = memref.load %arg2[%c56] : memref<90xf32, #tpu.memory_space<smem>>
    %c2_211 = arith.constant 2 : index
    %c0_212 = arith.constant 0 : index
    %c0_213 = arith.constant 0 : index
    %399 = vector.load %arg1[%c2_211, %c0_212, %c0_213] : memref<9x8x196xf32, #tpu.memory_space<vmem>>, vector<1x8x196xf32>
    %400 = vector.shape_cast %399 : vector<1x8x196xf32> to vector<8x196xf32>
    %401 = vector.broadcast %398 : f32 to vector<8x196xf32>
    %402 = arith.mulf %401, %400 : vector<8x196xf32>
    %403 = arith.addf %397, %402 : vector<8x196xf32>
    %c57 = arith.constant 57 : index
    %404 = memref.load %arg2[%c57] : memref<90xf32, #tpu.memory_space<smem>>
    %c3_214 = arith.constant 3 : index
    %c0_215 = arith.constant 0 : index
    %c0_216 = arith.constant 0 : index
    %405 = vector.load %arg1[%c3_214, %c0_215, %c0_216] : memref<9x8x196xf32, #tpu.memory_space<vmem>>, vector<1x8x196xf32>
    %406 = vector.shape_cast %405 : vector<1x8x196xf32> to vector<8x196xf32>
    %407 = vector.broadcast %404 : f32 to vector<8x196xf32>
    %408 = arith.mulf %407, %406 : vector<8x196xf32>
    %409 = arith.addf %403, %408 : vector<8x196xf32>
    %c58 = arith.constant 58 : index
    %410 = memref.load %arg2[%c58] : memref<90xf32, #tpu.memory_space<smem>>
    %c4_217 = arith.constant 4 : index
    %c0_218 = arith.constant 0 : index
    %c0_219 = arith.constant 0 : index
    %411 = vector.load %arg1[%c4_217, %c0_218, %c0_219] : memref<9x8x196xf32, #tpu.memory_space<vmem>>, vector<1x8x196xf32>
    %412 = vector.shape_cast %411 : vector<1x8x196xf32> to vector<8x196xf32>
    %413 = vector.broadcast %410 : f32 to vector<8x196xf32>
    %414 = arith.mulf %413, %412 : vector<8x196xf32>
    %415 = arith.addf %409, %414 : vector<8x196xf32>
    %c59 = arith.constant 59 : index
    %416 = memref.load %arg2[%c59] : memref<90xf32, #tpu.memory_space<smem>>
    %c5_220 = arith.constant 5 : index
    %c0_221 = arith.constant 0 : index
    %c0_222 = arith.constant 0 : index
    %417 = vector.load %arg1[%c5_220, %c0_221, %c0_222] : memref<9x8x196xf32, #tpu.memory_space<vmem>>, vector<1x8x196xf32>
    %418 = vector.shape_cast %417 : vector<1x8x196xf32> to vector<8x196xf32>
    %419 = vector.broadcast %416 : f32 to vector<8x196xf32>
    %420 = arith.mulf %419, %418 : vector<8x196xf32>
    %421 = arith.addf %415, %420 : vector<8x196xf32>
    %c60 = arith.constant 60 : index
    %422 = memref.load %arg2[%c60] : memref<90xf32, #tpu.memory_space<smem>>
    %c6_223 = arith.constant 6 : index
    %c0_224 = arith.constant 0 : index
    %c0_225 = arith.constant 0 : index
    %423 = vector.load %arg1[%c6_223, %c0_224, %c0_225] : memref<9x8x196xf32, #tpu.memory_space<vmem>>, vector<1x8x196xf32>
    %424 = vector.shape_cast %423 : vector<1x8x196xf32> to vector<8x196xf32>
    %425 = vector.broadcast %422 : f32 to vector<8x196xf32>
    %426 = arith.mulf %425, %424 : vector<8x196xf32>
    %427 = arith.addf %421, %426 : vector<8x196xf32>
    %c61 = arith.constant 61 : index
    %428 = memref.load %arg2[%c61] : memref<90xf32, #tpu.memory_space<smem>>
    %c7_226 = arith.constant 7 : index
    %c0_227 = arith.constant 0 : index
    %c0_228 = arith.constant 0 : index
    %429 = vector.load %arg1[%c7_226, %c0_227, %c0_228] : memref<9x8x196xf32, #tpu.memory_space<vmem>>, vector<1x8x196xf32>
    %430 = vector.shape_cast %429 : vector<1x8x196xf32> to vector<8x196xf32>
    %431 = vector.broadcast %428 : f32 to vector<8x196xf32>
    %432 = arith.mulf %431, %430 : vector<8x196xf32>
    %433 = arith.addf %427, %432 : vector<8x196xf32>
    %c62 = arith.constant 62 : index
    %434 = memref.load %arg2[%c62] : memref<90xf32, #tpu.memory_space<smem>>
    %c8_229 = arith.constant 8 : index
    %c0_230 = arith.constant 0 : index
    %c0_231 = arith.constant 0 : index
    %435 = vector.load %arg1[%c8_229, %c0_230, %c0_231] : memref<9x8x196xf32, #tpu.memory_space<vmem>>, vector<1x8x196xf32>
    %436 = vector.shape_cast %435 : vector<1x8x196xf32> to vector<8x196xf32>
    %437 = vector.broadcast %434 : f32 to vector<8x196xf32>
    %438 = arith.mulf %437, %436 : vector<8x196xf32>
    %439 = arith.addf %433, %438 : vector<8x196xf32>
    %c6_232 = arith.constant 6 : index
    %440 = memref.load %arg3[%c6_232] : memref<10xf32, #tpu.memory_space<smem>>
    %441 = vector.broadcast %440 : f32 to vector<8x196xf32>
    %442 = arith.addf %439, %441 : vector<8x196xf32>
    %cst_233 = arith.constant 0.000000e+00 : f32
    %443 = vector.broadcast %cst_233 : f32 to vector<8x196xf32>
    %444 = arith.maximumf %442, %443 : vector<8x196xf32>
    %c6_234 = arith.constant 6 : index
    %c0_235 = arith.constant 0 : index
    %c0_236 = arith.constant 0 : index
    %445 = vector.load %arg4[%c6_234, %c0_235, %c0_236] : memref<10x196x10xf32, #tpu.memory_space<vmem>>, vector<1x196x10xf32>
    %446 = vector.shape_cast %445 : vector<1x196x10xf32> to vector<196x10xf32>
    %cst_237 = arith.constant dense<0.000000e+00> : vector<8x10xf32>
    %447 = tpu.matmul %444, %446, %cst_237 {dimension_numbers = #tpu.dot_dimension_numbers<[1], [0], [0], [1], [0, 0, 1, 1], [], []>} : vector<8x196xf32>, vector<196x10xf32>, vector<8x10xf32> -> vector<8x10xf32>
    %448 = arith.addf %384, %447 : vector<8x10xf32>
    %cst_238 = arith.constant 0.000000e+00 : f32
    %449 = vector.broadcast %cst_238 : f32 to vector<8x196xf32>
    %c63 = arith.constant 63 : index
    %450 = memref.load %arg2[%c63] : memref<90xf32, #tpu.memory_space<smem>>
    %c0_239 = arith.constant 0 : index
    %c0_240 = arith.constant 0 : index
    %c0_241 = arith.constant 0 : index
    %451 = vector.load %arg1[%c0_239, %c0_240, %c0_241] : memref<9x8x196xf32, #tpu.memory_space<vmem>>, vector<1x8x196xf32>
    %452 = vector.shape_cast %451 : vector<1x8x196xf32> to vector<8x196xf32>
    %453 = vector.broadcast %450 : f32 to vector<8x196xf32>
    %454 = arith.mulf %453, %452 : vector<8x196xf32>
    %455 = arith.addf %449, %454 : vector<8x196xf32>
    %c64 = arith.constant 64 : index
    %456 = memref.load %arg2[%c64] : memref<90xf32, #tpu.memory_space<smem>>
    %c1_242 = arith.constant 1 : index
    %c0_243 = arith.constant 0 : index
    %c0_244 = arith.constant 0 : index
    %457 = vector.load %arg1[%c1_242, %c0_243, %c0_244] : memref<9x8x196xf32, #tpu.memory_space<vmem>>, vector<1x8x196xf32>
    %458 = vector.shape_cast %457 : vector<1x8x196xf32> to vector<8x196xf32>
    %459 = vector.broadcast %456 : f32 to vector<8x196xf32>
    %460 = arith.mulf %459, %458 : vector<8x196xf32>
    %461 = arith.addf %455, %460 : vector<8x196xf32>
    %c65 = arith.constant 65 : index
    %462 = memref.load %arg2[%c65] : memref<90xf32, #tpu.memory_space<smem>>
    %c2_245 = arith.constant 2 : index
    %c0_246 = arith.constant 0 : index
    %c0_247 = arith.constant 0 : index
    %463 = vector.load %arg1[%c2_245, %c0_246, %c0_247] : memref<9x8x196xf32, #tpu.memory_space<vmem>>, vector<1x8x196xf32>
    %464 = vector.shape_cast %463 : vector<1x8x196xf32> to vector<8x196xf32>
    %465 = vector.broadcast %462 : f32 to vector<8x196xf32>
    %466 = arith.mulf %465, %464 : vector<8x196xf32>
    %467 = arith.addf %461, %466 : vector<8x196xf32>
    %c66 = arith.constant 66 : index
    %468 = memref.load %arg2[%c66] : memref<90xf32, #tpu.memory_space<smem>>
    %c3_248 = arith.constant 3 : index
    %c0_249 = arith.constant 0 : index
    %c0_250 = arith.constant 0 : index
    %469 = vector.load %arg1[%c3_248, %c0_249, %c0_250] : memref<9x8x196xf32, #tpu.memory_space<vmem>>, vector<1x8x196xf32>
    %470 = vector.shape_cast %469 : vector<1x8x196xf32> to vector<8x196xf32>
    %471 = vector.broadcast %468 : f32 to vector<8x196xf32>
    %472 = arith.mulf %471, %470 : vector<8x196xf32>
    %473 = arith.addf %467, %472 : vector<8x196xf32>
    %c67 = arith.constant 67 : index
    %474 = memref.load %arg2[%c67] : memref<90xf32, #tpu.memory_space<smem>>
    %c4_251 = arith.constant 4 : index
    %c0_252 = arith.constant 0 : index
    %c0_253 = arith.constant 0 : index
    %475 = vector.load %arg1[%c4_251, %c0_252, %c0_253] : memref<9x8x196xf32, #tpu.memory_space<vmem>>, vector<1x8x196xf32>
    %476 = vector.shape_cast %475 : vector<1x8x196xf32> to vector<8x196xf32>
    %477 = vector.broadcast %474 : f32 to vector<8x196xf32>
    %478 = arith.mulf %477, %476 : vector<8x196xf32>
    %479 = arith.addf %473, %478 : vector<8x196xf32>
    %c68 = arith.constant 68 : index
    %480 = memref.load %arg2[%c68] : memref<90xf32, #tpu.memory_space<smem>>
    %c5_254 = arith.constant 5 : index
    %c0_255 = arith.constant 0 : index
    %c0_256 = arith.constant 0 : index
    %481 = vector.load %arg1[%c5_254, %c0_255, %c0_256] : memref<9x8x196xf32, #tpu.memory_space<vmem>>, vector<1x8x196xf32>
    %482 = vector.shape_cast %481 : vector<1x8x196xf32> to vector<8x196xf32>
    %483 = vector.broadcast %480 : f32 to vector<8x196xf32>
    %484 = arith.mulf %483, %482 : vector<8x196xf32>
    %485 = arith.addf %479, %484 : vector<8x196xf32>
    %c69 = arith.constant 69 : index
    %486 = memref.load %arg2[%c69] : memref<90xf32, #tpu.memory_space<smem>>
    %c6_257 = arith.constant 6 : index
    %c0_258 = arith.constant 0 : index
    %c0_259 = arith.constant 0 : index
    %487 = vector.load %arg1[%c6_257, %c0_258, %c0_259] : memref<9x8x196xf32, #tpu.memory_space<vmem>>, vector<1x8x196xf32>
    %488 = vector.shape_cast %487 : vector<1x8x196xf32> to vector<8x196xf32>
    %489 = vector.broadcast %486 : f32 to vector<8x196xf32>
    %490 = arith.mulf %489, %488 : vector<8x196xf32>
    %491 = arith.addf %485, %490 : vector<8x196xf32>
    %c70 = arith.constant 70 : index
    %492 = memref.load %arg2[%c70] : memref<90xf32, #tpu.memory_space<smem>>
    %c7_260 = arith.constant 7 : index
    %c0_261 = arith.constant 0 : index
    %c0_262 = arith.constant 0 : index
    %493 = vector.load %arg1[%c7_260, %c0_261, %c0_262] : memref<9x8x196xf32, #tpu.memory_space<vmem>>, vector<1x8x196xf32>
    %494 = vector.shape_cast %493 : vector<1x8x196xf32> to vector<8x196xf32>
    %495 = vector.broadcast %492 : f32 to vector<8x196xf32>
    %496 = arith.mulf %495, %494 : vector<8x196xf32>
    %497 = arith.addf %491, %496 : vector<8x196xf32>
    %c71 = arith.constant 71 : index
    %498 = memref.load %arg2[%c71] : memref<90xf32, #tpu.memory_space<smem>>
    %c8_263 = arith.constant 8 : index
    %c0_264 = arith.constant 0 : index
    %c0_265 = arith.constant 0 : index
    %499 = vector.load %arg1[%c8_263, %c0_264, %c0_265] : memref<9x8x196xf32, #tpu.memory_space<vmem>>, vector<1x8x196xf32>
    %500 = vector.shape_cast %499 : vector<1x8x196xf32> to vector<8x196xf32>
    %501 = vector.broadcast %498 : f32 to vector<8x196xf32>
    %502 = arith.mulf %501, %500 : vector<8x196xf32>
    %503 = arith.addf %497, %502 : vector<8x196xf32>
    %c7_266 = arith.constant 7 : index
    %504 = memref.load %arg3[%c7_266] : memref<10xf32, #tpu.memory_space<smem>>
    %505 = vector.broadcast %504 : f32 to vector<8x196xf32>
    %506 = arith.addf %503, %505 : vector<8x196xf32>
    %cst_267 = arith.constant 0.000000e+00 : f32
    %507 = vector.broadcast %cst_267 : f32 to vector<8x196xf32>
    %508 = arith.maximumf %506, %507 : vector<8x196xf32>
    %c7_268 = arith.constant 7 : index
    %c0_269 = arith.constant 0 : index
    %c0_270 = arith.constant 0 : index
    %509 = vector.load %arg4[%c7_268, %c0_269, %c0_270] : memref<10x196x10xf32, #tpu.memory_space<vmem>>, vector<1x196x10xf32>
    %510 = vector.shape_cast %509 : vector<1x196x10xf32> to vector<196x10xf32>
    %cst_271 = arith.constant dense<0.000000e+00> : vector<8x10xf32>
    %511 = tpu.matmul %508, %510, %cst_271 {dimension_numbers = #tpu.dot_dimension_numbers<[1], [0], [0], [1], [0, 0, 1, 1], [], []>} : vector<8x196xf32>, vector<196x10xf32>, vector<8x10xf32> -> vector<8x10xf32>
    %512 = arith.addf %448, %511 : vector<8x10xf32>
    %cst_272 = arith.constant 0.000000e+00 : f32
    %513 = vector.broadcast %cst_272 : f32 to vector<8x196xf32>
    %c72 = arith.constant 72 : index
    %514 = memref.load %arg2[%c72] : memref<90xf32, #tpu.memory_space<smem>>
    %c0_273 = arith.constant 0 : index
    %c0_274 = arith.constant 0 : index
    %c0_275 = arith.constant 0 : index
    %515 = vector.load %arg1[%c0_273, %c0_274, %c0_275] : memref<9x8x196xf32, #tpu.memory_space<vmem>>, vector<1x8x196xf32>
    %516 = vector.shape_cast %515 : vector<1x8x196xf32> to vector<8x196xf32>
    %517 = vector.broadcast %514 : f32 to vector<8x196xf32>
    %518 = arith.mulf %517, %516 : vector<8x196xf32>
    %519 = arith.addf %513, %518 : vector<8x196xf32>
    %c73 = arith.constant 73 : index
    %520 = memref.load %arg2[%c73] : memref<90xf32, #tpu.memory_space<smem>>
    %c1_276 = arith.constant 1 : index
    %c0_277 = arith.constant 0 : index
    %c0_278 = arith.constant 0 : index
    %521 = vector.load %arg1[%c1_276, %c0_277, %c0_278] : memref<9x8x196xf32, #tpu.memory_space<vmem>>, vector<1x8x196xf32>
    %522 = vector.shape_cast %521 : vector<1x8x196xf32> to vector<8x196xf32>
    %523 = vector.broadcast %520 : f32 to vector<8x196xf32>
    %524 = arith.mulf %523, %522 : vector<8x196xf32>
    %525 = arith.addf %519, %524 : vector<8x196xf32>
    %c74 = arith.constant 74 : index
    %526 = memref.load %arg2[%c74] : memref<90xf32, #tpu.memory_space<smem>>
    %c2_279 = arith.constant 2 : index
    %c0_280 = arith.constant 0 : index
    %c0_281 = arith.constant 0 : index
    %527 = vector.load %arg1[%c2_279, %c0_280, %c0_281] : memref<9x8x196xf32, #tpu.memory_space<vmem>>, vector<1x8x196xf32>
    %528 = vector.shape_cast %527 : vector<1x8x196xf32> to vector<8x196xf32>
    %529 = vector.broadcast %526 : f32 to vector<8x196xf32>
    %530 = arith.mulf %529, %528 : vector<8x196xf32>
    %531 = arith.addf %525, %530 : vector<8x196xf32>
    %c75 = arith.constant 75 : index
    %532 = memref.load %arg2[%c75] : memref<90xf32, #tpu.memory_space<smem>>
    %c3_282 = arith.constant 3 : index
    %c0_283 = arith.constant 0 : index
    %c0_284 = arith.constant 0 : index
    %533 = vector.load %arg1[%c3_282, %c0_283, %c0_284] : memref<9x8x196xf32, #tpu.memory_space<vmem>>, vector<1x8x196xf32>
    %534 = vector.shape_cast %533 : vector<1x8x196xf32> to vector<8x196xf32>
    %535 = vector.broadcast %532 : f32 to vector<8x196xf32>
    %536 = arith.mulf %535, %534 : vector<8x196xf32>
    %537 = arith.addf %531, %536 : vector<8x196xf32>
    %c76 = arith.constant 76 : index
    %538 = memref.load %arg2[%c76] : memref<90xf32, #tpu.memory_space<smem>>
    %c4_285 = arith.constant 4 : index
    %c0_286 = arith.constant 0 : index
    %c0_287 = arith.constant 0 : index
    %539 = vector.load %arg1[%c4_285, %c0_286, %c0_287] : memref<9x8x196xf32, #tpu.memory_space<vmem>>, vector<1x8x196xf32>
    %540 = vector.shape_cast %539 : vector<1x8x196xf32> to vector<8x196xf32>
    %541 = vector.broadcast %538 : f32 to vector<8x196xf32>
    %542 = arith.mulf %541, %540 : vector<8x196xf32>
    %543 = arith.addf %537, %542 : vector<8x196xf32>
    %c77 = arith.constant 77 : index
    %544 = memref.load %arg2[%c77] : memref<90xf32, #tpu.memory_space<smem>>
    %c5_288 = arith.constant 5 : index
    %c0_289 = arith.constant 0 : index
    %c0_290 = arith.constant 0 : index
    %545 = vector.load %arg1[%c5_288, %c0_289, %c0_290] : memref<9x8x196xf32, #tpu.memory_space<vmem>>, vector<1x8x196xf32>
    %546 = vector.shape_cast %545 : vector<1x8x196xf32> to vector<8x196xf32>
    %547 = vector.broadcast %544 : f32 to vector<8x196xf32>
    %548 = arith.mulf %547, %546 : vector<8x196xf32>
    %549 = arith.addf %543, %548 : vector<8x196xf32>
    %c78 = arith.constant 78 : index
    %550 = memref.load %arg2[%c78] : memref<90xf32, #tpu.memory_space<smem>>
    %c6_291 = arith.constant 6 : index
    %c0_292 = arith.constant 0 : index
    %c0_293 = arith.constant 0 : index
    %551 = vector.load %arg1[%c6_291, %c0_292, %c0_293] : memref<9x8x196xf32, #tpu.memory_space<vmem>>, vector<1x8x196xf32>
    %552 = vector.shape_cast %551 : vector<1x8x196xf32> to vector<8x196xf32>
    %553 = vector.broadcast %550 : f32 to vector<8x196xf32>
    %554 = arith.mulf %553, %552 : vector<8x196xf32>
    %555 = arith.addf %549, %554 : vector<8x196xf32>
    %c79 = arith.constant 79 : index
    %556 = memref.load %arg2[%c79] : memref<90xf32, #tpu.memory_space<smem>>
    %c7_294 = arith.constant 7 : index
    %c0_295 = arith.constant 0 : index
    %c0_296 = arith.constant 0 : index
    %557 = vector.load %arg1[%c7_294, %c0_295, %c0_296] : memref<9x8x196xf32, #tpu.memory_space<vmem>>, vector<1x8x196xf32>
    %558 = vector.shape_cast %557 : vector<1x8x196xf32> to vector<8x196xf32>
    %559 = vector.broadcast %556 : f32 to vector<8x196xf32>
    %560 = arith.mulf %559, %558 : vector<8x196xf32>
    %561 = arith.addf %555, %560 : vector<8x196xf32>
    %c80 = arith.constant 80 : index
    %562 = memref.load %arg2[%c80] : memref<90xf32, #tpu.memory_space<smem>>
    %c8_297 = arith.constant 8 : index
    %c0_298 = arith.constant 0 : index
    %c0_299 = arith.constant 0 : index
    %563 = vector.load %arg1[%c8_297, %c0_298, %c0_299] : memref<9x8x196xf32, #tpu.memory_space<vmem>>, vector<1x8x196xf32>
    %564 = vector.shape_cast %563 : vector<1x8x196xf32> to vector<8x196xf32>
    %565 = vector.broadcast %562 : f32 to vector<8x196xf32>
    %566 = arith.mulf %565, %564 : vector<8x196xf32>
    %567 = arith.addf %561, %566 : vector<8x196xf32>
    %c8_300 = arith.constant 8 : index
    %568 = memref.load %arg3[%c8_300] : memref<10xf32, #tpu.memory_space<smem>>
    %569 = vector.broadcast %568 : f32 to vector<8x196xf32>
    %570 = arith.addf %567, %569 : vector<8x196xf32>
    %cst_301 = arith.constant 0.000000e+00 : f32
    %571 = vector.broadcast %cst_301 : f32 to vector<8x196xf32>
    %572 = arith.maximumf %570, %571 : vector<8x196xf32>
    %c8_302 = arith.constant 8 : index
    %c0_303 = arith.constant 0 : index
    %c0_304 = arith.constant 0 : index
    %573 = vector.load %arg4[%c8_302, %c0_303, %c0_304] : memref<10x196x10xf32, #tpu.memory_space<vmem>>, vector<1x196x10xf32>
    %574 = vector.shape_cast %573 : vector<1x196x10xf32> to vector<196x10xf32>
    %cst_305 = arith.constant dense<0.000000e+00> : vector<8x10xf32>
    %575 = tpu.matmul %572, %574, %cst_305 {dimension_numbers = #tpu.dot_dimension_numbers<[1], [0], [0], [1], [0, 0, 1, 1], [], []>} : vector<8x196xf32>, vector<196x10xf32>, vector<8x10xf32> -> vector<8x10xf32>
    %576 = arith.addf %512, %575 : vector<8x10xf32>
    %cst_306 = arith.constant 0.000000e+00 : f32
    %577 = vector.broadcast %cst_306 : f32 to vector<8x196xf32>
    %c81 = arith.constant 81 : index
    %578 = memref.load %arg2[%c81] : memref<90xf32, #tpu.memory_space<smem>>
    %c0_307 = arith.constant 0 : index
    %c0_308 = arith.constant 0 : index
    %c0_309 = arith.constant 0 : index
    %579 = vector.load %arg1[%c0_307, %c0_308, %c0_309] : memref<9x8x196xf32, #tpu.memory_space<vmem>>, vector<1x8x196xf32>
    %580 = vector.shape_cast %579 : vector<1x8x196xf32> to vector<8x196xf32>
    %581 = vector.broadcast %578 : f32 to vector<8x196xf32>
    %582 = arith.mulf %581, %580 : vector<8x196xf32>
    %583 = arith.addf %577, %582 : vector<8x196xf32>
    %c82 = arith.constant 82 : index
    %584 = memref.load %arg2[%c82] : memref<90xf32, #tpu.memory_space<smem>>
    %c1_310 = arith.constant 1 : index
    %c0_311 = arith.constant 0 : index
    %c0_312 = arith.constant 0 : index
    %585 = vector.load %arg1[%c1_310, %c0_311, %c0_312] : memref<9x8x196xf32, #tpu.memory_space<vmem>>, vector<1x8x196xf32>
    %586 = vector.shape_cast %585 : vector<1x8x196xf32> to vector<8x196xf32>
    %587 = vector.broadcast %584 : f32 to vector<8x196xf32>
    %588 = arith.mulf %587, %586 : vector<8x196xf32>
    %589 = arith.addf %583, %588 : vector<8x196xf32>
    %c83 = arith.constant 83 : index
    %590 = memref.load %arg2[%c83] : memref<90xf32, #tpu.memory_space<smem>>
    %c2_313 = arith.constant 2 : index
    %c0_314 = arith.constant 0 : index
    %c0_315 = arith.constant 0 : index
    %591 = vector.load %arg1[%c2_313, %c0_314, %c0_315] : memref<9x8x196xf32, #tpu.memory_space<vmem>>, vector<1x8x196xf32>
    %592 = vector.shape_cast %591 : vector<1x8x196xf32> to vector<8x196xf32>
    %593 = vector.broadcast %590 : f32 to vector<8x196xf32>
    %594 = arith.mulf %593, %592 : vector<8x196xf32>
    %595 = arith.addf %589, %594 : vector<8x196xf32>
    %c84 = arith.constant 84 : index
    %596 = memref.load %arg2[%c84] : memref<90xf32, #tpu.memory_space<smem>>
    %c3_316 = arith.constant 3 : index
    %c0_317 = arith.constant 0 : index
    %c0_318 = arith.constant 0 : index
    %597 = vector.load %arg1[%c3_316, %c0_317, %c0_318] : memref<9x8x196xf32, #tpu.memory_space<vmem>>, vector<1x8x196xf32>
    %598 = vector.shape_cast %597 : vector<1x8x196xf32> to vector<8x196xf32>
    %599 = vector.broadcast %596 : f32 to vector<8x196xf32>
    %600 = arith.mulf %599, %598 : vector<8x196xf32>
    %601 = arith.addf %595, %600 : vector<8x196xf32>
    %c85 = arith.constant 85 : index
    %602 = memref.load %arg2[%c85] : memref<90xf32, #tpu.memory_space<smem>>
    %c4_319 = arith.constant 4 : index
    %c0_320 = arith.constant 0 : index
    %c0_321 = arith.constant 0 : index
    %603 = vector.load %arg1[%c4_319, %c0_320, %c0_321] : memref<9x8x196xf32, #tpu.memory_space<vmem>>, vector<1x8x196xf32>
    %604 = vector.shape_cast %603 : vector<1x8x196xf32> to vector<8x196xf32>
    %605 = vector.broadcast %602 : f32 to vector<8x196xf32>
    %606 = arith.mulf %605, %604 : vector<8x196xf32>
    %607 = arith.addf %601, %606 : vector<8x196xf32>
    %c86 = arith.constant 86 : index
    %608 = memref.load %arg2[%c86] : memref<90xf32, #tpu.memory_space<smem>>
    %c5_322 = arith.constant 5 : index
    %c0_323 = arith.constant 0 : index
    %c0_324 = arith.constant 0 : index
    %609 = vector.load %arg1[%c5_322, %c0_323, %c0_324] : memref<9x8x196xf32, #tpu.memory_space<vmem>>, vector<1x8x196xf32>
    %610 = vector.shape_cast %609 : vector<1x8x196xf32> to vector<8x196xf32>
    %611 = vector.broadcast %608 : f32 to vector<8x196xf32>
    %612 = arith.mulf %611, %610 : vector<8x196xf32>
    %613 = arith.addf %607, %612 : vector<8x196xf32>
    %c87 = arith.constant 87 : index
    %614 = memref.load %arg2[%c87] : memref<90xf32, #tpu.memory_space<smem>>
    %c6_325 = arith.constant 6 : index
    %c0_326 = arith.constant 0 : index
    %c0_327 = arith.constant 0 : index
    %615 = vector.load %arg1[%c6_325, %c0_326, %c0_327] : memref<9x8x196xf32, #tpu.memory_space<vmem>>, vector<1x8x196xf32>
    %616 = vector.shape_cast %615 : vector<1x8x196xf32> to vector<8x196xf32>
    %617 = vector.broadcast %614 : f32 to vector<8x196xf32>
    %618 = arith.mulf %617, %616 : vector<8x196xf32>
    %619 = arith.addf %613, %618 : vector<8x196xf32>
    %c88 = arith.constant 88 : index
    %620 = memref.load %arg2[%c88] : memref<90xf32, #tpu.memory_space<smem>>
    %c7_328 = arith.constant 7 : index
    %c0_329 = arith.constant 0 : index
    %c0_330 = arith.constant 0 : index
    %621 = vector.load %arg1[%c7_328, %c0_329, %c0_330] : memref<9x8x196xf32, #tpu.memory_space<vmem>>, vector<1x8x196xf32>
    %622 = vector.shape_cast %621 : vector<1x8x196xf32> to vector<8x196xf32>
    %623 = vector.broadcast %620 : f32 to vector<8x196xf32>
    %624 = arith.mulf %623, %622 : vector<8x196xf32>
    %625 = arith.addf %619, %624 : vector<8x196xf32>
    %c89 = arith.constant 89 : index
    %626 = memref.load %arg2[%c89] : memref<90xf32, #tpu.memory_space<smem>>
    %c8_331 = arith.constant 8 : index
    %c0_332 = arith.constant 0 : index
    %c0_333 = arith.constant 0 : index
    %627 = vector.load %arg1[%c8_331, %c0_332, %c0_333] : memref<9x8x196xf32, #tpu.memory_space<vmem>>, vector<1x8x196xf32>
    %628 = vector.shape_cast %627 : vector<1x8x196xf32> to vector<8x196xf32>
    %629 = vector.broadcast %626 : f32 to vector<8x196xf32>
    %630 = arith.mulf %629, %628 : vector<8x196xf32>
    %631 = arith.addf %625, %630 : vector<8x196xf32>
    %c9_334 = arith.constant 9 : index
    %632 = memref.load %arg3[%c9_334] : memref<10xf32, #tpu.memory_space<smem>>
    %633 = vector.broadcast %632 : f32 to vector<8x196xf32>
    %634 = arith.addf %631, %633 : vector<8x196xf32>
    %cst_335 = arith.constant 0.000000e+00 : f32
    %635 = vector.broadcast %cst_335 : f32 to vector<8x196xf32>
    %636 = arith.maximumf %634, %635 : vector<8x196xf32>
    %c9_336 = arith.constant 9 : index
    %c0_337 = arith.constant 0 : index
    %c0_338 = arith.constant 0 : index
    %637 = vector.load %arg4[%c9_336, %c0_337, %c0_338] : memref<10x196x10xf32, #tpu.memory_space<vmem>>, vector<1x196x10xf32>
    %638 = vector.shape_cast %637 : vector<1x196x10xf32> to vector<196x10xf32>
    %cst_339 = arith.constant dense<0.000000e+00> : vector<8x10xf32>
    %639 = tpu.matmul %636, %638, %cst_339 {dimension_numbers = #tpu.dot_dimension_numbers<[1], [0], [0], [1], [0, 0, 1, 1], [], []>} : vector<8x196xf32>, vector<196x10xf32>, vector<8x10xf32> -> vector<8x10xf32>
    %640 = arith.addf %576, %639 : vector<8x10xf32>
    %c0_340 = arith.constant 0 : index
    %c0_341 = arith.constant 0 : index
    %641 = vector.load %arg5[%c0_340, %c0_341] : memref<1x10xf32, #tpu.memory_space<vmem>>, vector<1x10xf32>
    %642 = vector.broadcast %641 : vector<1x10xf32> to vector<8x10xf32>
    %643 = arith.addf %640, %642 : vector<8x10xf32>
    %cst_342 = arith.constant dense<0xFF800000> : vector<8xf32>
    %644 = vector.multi_reduction <maximumf>, %643, %cst_342 [1] : vector<8x10xf32> to vector<8xf32>
    %645 = vector.shape_cast %644 : vector<8xf32> to vector<8x1xf32>
    %646 = vector.broadcast %645 : vector<8x1xf32> to vector<8x10xf32>
    %647 = arith.subf %643, %646 : vector<8x10xf32>
    %648 = math.exp %647 : vector<8x10xf32>
    %cst_343 = arith.constant dense<0.000000e+00> : vector<8xf32>
    %649 = vector.multi_reduction <add>, %648, %cst_343 [1] : vector<8x10xf32> to vector<8xf32>
    %650 = vector.shape_cast %649 : vector<8xf32> to vector<8x1xf32>
    %651 = math.log %650 : vector<8x1xf32>
    %652 = vector.broadcast %651 : vector<8x1xf32> to vector<8x10xf32>
    %653 = arith.subf %647, %652 : vector<8x10xf32>
    %c0_344 = arith.constant 0 : index
    %c0_345 = arith.constant 0 : index
    %654 = vector.load %arg6[%c0_344, %c0_345] : memref<8x10xf32, #tpu.memory_space<vmem>>, vector<8x10xf32>
    tpu.vector_store %arg6[%c0_344, %c0_345], %653 {strides = array<i32>} : memref<8x10xf32, #tpu.memory_space<vmem>>, vector<8x10xf32>,
    return
  }
  func.func @transform_0(%arg0: i32) -> (i32, i32, i32) {
    %c0_i32 = arith.constant 0 : i32
    %c0_i32_0 = arith.constant 0 : i32
    %c0_i32_1 = arith.constant 0 : i32
    return %c0_i32, %arg0, %c0_i32_0 : i32, i32, i32
  }
  func.func @transform_1(%arg0: i32) -> i32 {
    %c0_i32 = arith.constant 0 : i32
    %c0_i32_0 = arith.constant 0 : i32
    return %c0_i32 : i32
  }
  func.func @transform_2(%arg0: i32) -> i32 {
    %c0_i32 = arith.constant 0 : i32
    %c0_i32_0 = arith.constant 0 : i32
    return %c0_i32 : i32
  }
  func.func @transform_3(%arg0: i32) -> (i32, i32, i32) {
    %c0_i32 = arith.constant 0 : i32
    %c0_i32_0 = arith.constant 0 : i32
    %c0_i32_1 = arith.constant 0 : i32
    %c0_i32_2 = arith.constant 0 : i32
    return %c0_i32, %c0_i32_0, %c0_i32_1 : i32, i32, i32
  }
  func.func @transform_4(%arg0: i32) -> (i32, i32) {
    %c0_i32 = arith.constant 0 : i32
    %c0_i32_0 = arith.constant 0 : i32
    %c0_i32_1 = arith.constant 0 : i32
    return %c0_i32, %c0_i32_0 : i32, i32
  }
  func.func @transform_5(%arg0: i32) -> (i32, i32) {
    %c0_i32 = arith.constant 0 : i32
    %c0_i32_0 = arith.constant 0 : i32
    return %arg0, %c0_i32 : i32, i32
  }
}

</mosaic_0001>

<bundles_post_ra>
// kernel: simple_cnn_forward.1
= control target key start
LH: loop header
LB: loop body
LE: loop exit
PB: predicated region body
PF: predicated region fallthrough
CT: control target
= control target key end

     0   :  { %s4526_s0 = inlined_call_operand.vmem [shape: f32[9,8,196], index: 0, kind: input, shape index: {}]   ;;  %s4527_s1 = inlined_call_operand.vmem [shape: f32[90], index: 1, kind: input, shape index: {}]   ;;  %s4528_s2 = inlined_call_operand.vmem [shape: f32[10], index: 2, kind: input, shape index: {}]   ;;  %s4529_s3 = inlined_call_operand.vmem [shape: f32[10,196,10], index: 3, kind: input, shape index: {}]   ;;  %s4530_s4 = inlined_call_operand.vmem [shape: f32[1,10], index: 4, kind: input, shape index: {}]   ;;  %s4531_s5 = inlined_call_operand.vmem [shape: f32[8,10], index: 5, kind: output, shape index: {}]  }
   0x1   :  { %4543 = sst [smem:[#allocation15_spill]] %s4530_s4 }
   0x2   :  { %4544 = sst [smem:[#allocation16_spill]] %s4531_s5 }
   0x3   :  { %10 = vsyncpa [#allocation3], 0  ;;  %s20_s20 = sshll.u32 %s4527_s1, 4  ;;  %s21_s20 = int_to_ptr.vmem [resolvable:$true] %s20_s20 }
   0x4   :  { %11 = vsyncpa [#allocation5], 0  ;;  %s30_s23 = sshll.u32 %s4528_s2, 4  ;;  %s2474_s24 = scalar_lea.vmem %s21_s20, 16  ;;  %s31_s23 = int_to_ptr.vmem [resolvable:$true] %s30_s23 }
   0x5   :  { %p2475_p0 = scmp.ne.s32.totalorder %s21_s20, %s2474_s24  ;;  %p2479_p1 = scmp.lt.s32.totalorder %s21_s20, %s21_s20 }
   0x6   :  { %p2480_p2 = scmp.lt.s32.totalorder %s2474_s24, %s2474_s24 }
   0x8   :  { %p2481_p3 = por %p2480_p2, %p2479_p1 }
   0xa   :  { %p2482_p4 = pnand %p2481_p3, %p2475_p0 }
   0xc   :  { %2485 = shalt.err (!%p2482_p4)
}
   0xd   :  { %s2502_s25 = smov [#allocation2]   ;;  %s2486_s26 = scalar_lea.vmem %s31_s23, 16 }
   0xe   :  { %23 = dma.vmem_to_smem %s21_s20, 16, %s2502_s25, [#allocation3]  }
   0xf   :  { %p2487_p5 = scmp.ne.s32.totalorder %s31_s23, %s2486_s26  ;;  %p2491_p6 = scmp.lt.s32.totalorder %s31_s23, %s31_s23 }
  0x10   :  { %p2492_p7 = scmp.lt.s32.totalorder %s2486_s26, %s2486_s26 }
  0x12   :  { %p2493_p8 = por %p2492_p7, %p2491_p6 }
  0x14   :  { %p2494_p9 = pnand %p2493_p8, %p2487_p5 }
  0x16   :  { %2497 = shalt.err (!%p2494_p9)
}
  0x17   :  { %s2503_s1 = smov [#allocation4]  }
  0x18   :  { %33 = dma.vmem_to_smem %s31_s23, 16, %s2503_s1, [#allocation5]  }
  0x19   :  { %2498 = dma.done.wait [#allocation3], 16  }
  0x1a   :  { %2499 = vsyncadd [#allocation3], 4294967280 }
  0x1b   :  { %2500 = dma.done.wait [#allocation5], 16  }
  0x1c   :  { %2501 = vsyncadd [#allocation5], 4294967280 }
  0x1d   :  { %44 = sfence }
  0x1e   :  { %v1762_v0 = vld [vmem:[%s4529_s3 + $0xc8] sm:$0xff]  ;;  %v1763_v1 = vld [vmem:[%s4529_s3 + $0xd0] sm:$0xff]  ;;  %v131_v2 = vld [vmem:[%s4529_s3] sm:$0xff]  ;;  %v2504_v3 = vmov 0.0|0.0   ;;  %s2582_s25 = sld [smem:[#allocation2 + $0x9]]  ;;  %s2590_s28 = sld [smem:[#allocation2 + $0xa]] }
  0x1f   :  { %2088 = vmatprep.subr.bf16.mxu0 %v2504_v3  ;;  %v2089_v4 = vpack.c.bf16 %v1763_v1, %v1762_v0  ;;  %2124 = vmatprep.subr.bf16.mxu1 %v2504_v3  ;;  %v132_v5 = vld [vmem:[%s4529_s3 + $0x8] sm:$0xff]  ;;  %v1764_v6 = vld [vmem:[%s4529_s3 + $0xd8] sm:$0xff]  ;;  %v1765_v7 = vld [vmem:[%s4529_s3 + $0xe0] sm:$0xff]  ;;  %s2592_s29 = sld [smem:[#allocation2 + $0xb]]  ;;  %s2600_s9 = sld [smem:[#allocation2 + $0xc]]  ;;  %vm242_vm0 = vcmask 556032  }
  0x20   :  { %v2125_v8 = vpack.c.bf16 %v132_v5, %v131_v2  ;;  %v133_v9 = vld [vmem:[%s4529_s3 + $0x10] sm:$0xff]  ;;  %v134_v10 = vld [vmem:[%s4529_s3 + $0x18] sm:$0xff]  ;;  %v2092_v11 = vpack.c.bf16 %v1765_v7, %v1764_v6  ;;  %v1766_v13 = vld [vmem:[%s4529_s3 + $0xe8] sm:$0xff]  ;;  %s2602_s10 = sld [smem:[#allocation2 + $0xd]]  ;;  %s2625_s19 = sld [smem:[#allocation2 + $0xe]]  ;;  %vm246_vm1 = vcmask 1043456  }
  0x21   :  { %2090 = vmatpush1.bf16.msra.mxu0 %v2089_v4  ;;  %v2128_v12 = vpack.c.bf16 %v134_v10, %v133_v9  ;;  %v1767_v14 = vld [vmem:[%s4529_s3 + $0xf0] sm:$0xff]  ;;  %v135_v15 = vld [vmem:[%s4529_s3 + $0x20] sm:$0xff]  ;;  %v136_v16 = vld [vmem:[%s4529_s3 + $0x28] sm:$0xff]  ;;  %s2627_s20 = sld [smem:[#allocation2 + $0xf]]  ;;  %s2660_s11 = sld [smem:[#allocation2 + $0x10]]  ;;  %vm1708_vm2 = vcmask 80896  }
  0x22   :  { %2126 = vmatpush1.bf16.msra.mxu1 %v2125_v8  ;;  %2091 = vmatprep.subr.bf16.mxu0 %v2504_v3  ;;  %v1768_v17 = vld [vmem:[%s4529_s3 + $0xf8] sm:$0xff]  ;;  %v1769_v18 = vld [vmem:[%s4529_s3 + $0x100] sm:$0xff]  ;;  %v2095_v19 = vpack.c.bf16 %v1767_v14, %v1766_v13  ;;  %v137_v20 = vld [vmem:[%s4529_s3 + $0x30] sm:$0xff]  ;;  %v2131_v22 = vpack.c.bf16 %v136_v16, %v135_v15  ;;  %s2672_s16 = sld [smem:[#allocation2 + $0x11]]  ;;  %s2674_s17 = sld [smem:[#allocation2]] }
  0x23   :  { %2127 = vmatprep.subr.bf16.mxu1 %v2504_v3  ;;  %v138_v21 = vld [vmem:[%s4529_s3 + $0x38] sm:$0xff]  ;;  %v2608_v23 = vld [vmem:[%s4529_s3 + $0x108] sm:$0xff]  ;;  %v2613_v24 = vld [vmem:[%s4529_s3 + $0x110] sm:$0xff]  ;;  %v2098_v33 = vpack.c.bf16 %v1769_v18, %v1768_v17  ;;  %s2692_s1 = sld [smem:[#allocation2 + $0x1]]  ;;  %s2779_s24 = sld [smem:[#allocation2 + $0x3]] }
  0x24   :  { %v2618_v25 = vld [vmem:[%s4529_s3 + $0x40] sm:$0xff]  ;;  %v2623_v26 = vld [vmem:[%s4529_s3 + $0x48] sm:$0xff]  ;;  %v2633_v27 = vld [vmem:[%s4529_s3 + $0x118] sm:$0xff]  ;;  %v2134_v36 = vpack.c.bf16 %v138_v21, %v137_v20  ;;  %v2101_v40 = vpack.c.bf16 %v2613_v24, %v2608_v23  ;;  %v157_v46 = vstv %s2582_s25  ;;  %s2841_s23 = sld [smem:[#allocation2 + $0x6]]  ;;  %s2878_s27 = sld [smem:[#allocation4 + $0x1]] }
  0x25   :  { %2093 = vmatpush1.bf16.msra.mxu0 %v2092_v11  ;;  %v2638_v28 = vld [vmem:[%s4529_s3 + $0x120] sm:$0xff]  ;;  %v2643_v29 = vld [vmem:[%s4529_s3 + $0x50] sm:$0xff]  ;;  %v2648_v30 = vld [vmem:[%s4529_s3 + $0x58] sm:$0xff]  ;;  %v2137_v41 = vpack.c.bf16 %v2623_v26, %v2618_v25  ;;  %v163_v51 = vstv %s2590_s28  ;;  %s2883_s30 = sld [smem:[#allocation2 + $0x8]]  ;;  %s2946_s18 = sld [smem:[#allocation2 + $0x13]] }
  0x26   :  { %2129 = vmatpush1.bf16.msra.mxu1 %v2128_v12  ;;  %2094 = vmatprep.subr.bf16.mxu0 %v2504_v3  ;;  %v2653_v31 = vld [vmem:[%s4529_s3 + $0x128] sm:$0xff]  ;;  %v2658_v32 = vld [vmem:[%s4529_s3 + $0x130] sm:$0xff]  ;;  %v2665_v34 = vld [vmem:[%s4529_s3 + $0x60] sm:$0xff]  ;;  %v2104_v42 = vpack.c.bf16 %v2638_v28, %v2633_v27  ;;  %v2140_v47 = vpack.c.bf16 %v2648_v30, %v2643_v29  ;;  %v169_v52 = vstv %s2592_s29  ;;  %s2921_s12 = sld [smem:[#allocation4]]  ;;  %s2944_s29 = sld [smem:[#allocation2 + $0x12]] }
  0x27   :  { %2130 = vmatprep.subr.bf16.mxu1 %v2504_v3  ;;  %v2670_v35 = vld [vmem:[%s4529_s3 + $0x68] sm:$0xff]  ;;  %v2680_v37 = vld [vmem:[%s4529_s3 + $0x138] sm:$0xff]  ;;  %v2685_v38 = vld [vmem:[%s4529_s3 + $0x140] sm:$0xff]  ;;  %v2107_v48 = vpack.c.bf16 %v2658_v32, %v2653_v31  ;;  %v175_v55 = vstv %s2600_s9  ;;  %s2756_s9 = sld [smem:[#allocation2 + $0x2]]  ;;  %s2988_s7 = sld [smem:[#allocation2 + $0x17]] }
  0x28   :  { %v2690_v39 = vld [vmem:[%s4529_s3 + $0x70] sm:$0xff]  ;;  %v2704_v43 = vld [vmem:[%s4529_s3 + $0x78] sm:$0xff]  ;;  %v2709_v44 = vld [vmem:[%s4529_s3 + $0x148] sm:$0xff]  ;;  %v2143_v53 = vpack.c.bf16 %v2670_v35, %v2665_v34  ;;  %v2110_v54 = vpack.c.bf16 %v2685_v38, %v2680_v37  ;;  %v181_v56 = vstv %s2602_s10  ;;  %s2955_s10 = sld [smem:[#allocation2 + $0x14]]  ;;  %s2998_s14 = sld [smem:[#allocation2 + $0x18]] }
  0x29   :  { %2096 = vmatpush1.bf16.msra.mxu0 %v2095_v19  ;;  %v2714_v45 = vld [vmem:[%s4529_s3 + $0x150] sm:$0xff]  ;;  %v2724_v49 = vld [vmem:[%s4529_s3 + $0x80] sm:$0xff]  ;;  %v2729_v50 = vld [vmem:[%s4529_s3 + $0x88] sm:$0xff]  ;;  %v2146_v57 = vpack.c.bf16 %v2704_v43, %v2690_v39  ;;  %v187_v61 = vstv %s2625_s19  ;;  %s3004_s15 = sld [smem:[#allocation2 + $0x19]]  ;;  %s3006_s25 = sld [smem:[#allocation2 + $0x1b]] }
  0x2a   :  { %2132 = vmatpush1.bf16.msra.mxu1 %v2131_v22  ;;  %2097 = vmatprep.subr.bf16.mxu0 %v2504_v3  ;;  %v2113_v58 = vpack.c.bf16 %v2714_v45, %v2709_v44  ;;  %v2747_v59 = vld [vmem:[%s4526_s0] sm:$0xff]  ;;  %v2752_v60 = vld [vmem:[%s4526_s0 + $0x8] sm:$0xff]  ;;  %v193_v62 = vstv %s2627_s20  ;;  %v2764_v0 = vld [vmem:[%s4526_s0 + $0x10] sm:$0xff]  ;;  %s3017_s28 = sld [smem:[#allocation2 + $0x1d]]  ;;  %s3025_s21 = sld [smem:[#allocation2 + $0x1a]] }
  0x2b   :  { %2133 = vmatprep.subr.bf16.mxu1 %v2504_v3  ;;  %v2769_v1 = vld [vmem:[%s4526_s0 + $0x18] sm:$0xff]  ;;  %v2774_v2 = vld [vmem:[%s4526_s0 + $0x20] sm:$0xff]  ;;  %v158_v4 = vmul.f32 %v157_v46, %v2747_v59  ;;  %v159_v5 = vmul.f32 %v157_v46, %v2752_v60  ;;  %v48_v6 = vstv %s2674_s17  ;;  %v2784_v7 = vld [vmem:[%s4526_s0 + $0x28] sm:$0xff]  ;;  %v164_v10 = vmul.f32 %v2764_v0, %v163_v51  ;;  %s2800_s17 = sld [smem:[#allocation2 + $0x4]]  ;;  %s3027_s22 = sld [smem:[#allocation2 + $0x1e]] }
  0x2c   :  { %v2789_v8 = vld [vmem:[%s4526_s0 + $0x30] sm:$0xff]  ;;  %v2794_v9 = vld [vmem:[%s4526_s0 + $0x38] sm:$0xff]  ;;  %v165_v11 = vmul.f32 %v2769_v1, %v163_v51  ;;  %v170_v12 = vmul.f32 %v2774_v2, %v169_v52  ;;  %v199_v13 = vstv %s2660_s11  ;;  %v2805_v14 = vld [vmem:[%s4526_s0 + $0x40] sm:$0xff]  ;;  %v171_v17 = vmul.f32 %v2784_v7, %v169_v52  ;;  %s2821_s11 = sld [smem:[#allocation2 + $0x5]]  ;;  %s3065_s20 = sld [smem:[#allocation2 + $0x20]] }
  0x2d   :  { %2099 = vmatpush1.bf16.msra.mxu0 %v2098_v33  ;;  %v2810_v15 = vld [vmem:[%s4526_s0 + $0x48] sm:$0xff]  ;;  %v2815_v16 = vld [vmem:[%s4526_s0 + $0x50] sm:$0xff]  ;;  %v176_v18 = vmul.f32 %v2789_v8, %v175_v55  ;;  %v205_v19 = vstv %s2672_s16  ;;  %v49_v20 = vmul.f32 %v48_v6, %v2747_v59  ;;  %v2827_v21 = vld [vmem:[%s4526_s0 + $0x58] sm:$0xff]  ;;  %v166_v24 = vadd.f32 %v164_v10, %v158_v4  ;;  %s3071_s26 = sld [smem:[#allocation2 + $0x21]]  ;;  %s3091_s8 = sld [smem:[#allocation2 + $0x22]] }
  0x2e   :  { %2135 = vmatpush1.bf16.msra.mxu1 %v2134_v36  ;;  %2100 = vmatprep.subr.bf16.mxu0 %v2504_v3  ;;  %v2832_v22 = vld [vmem:[%s4526_s0 + $0x60] sm:$0xff]  ;;  %v2837_v23 = vld [vmem:[%s4526_s0 + $0x68] sm:$0xff]  ;;  %v167_v25 = vadd.f32 %v165_v11, %v159_v5  ;;  %v177_v26 = vmul.f32 %v2794_v9, %v175_v55  ;;  %v57_v33 = vstv %s2692_s1  ;;  %v2847_v36 = vld [vmem:[%s4526_s0 + $0x70] sm:$0xff]  ;;  %v183_v46 = vmul.f32 %v2810_v15, %v181_v56  ;;  %s2869_s1 = sld [smem:[#allocation2 + $0x7]]  ;;  %s3156_s19 = sld [smem:[#allocation4 + $0x3]] }
  0x2f   :  { %2136 = vmatprep.subr.bf16.mxu1 %v2504_v3  ;;  %v188_v51 = vmul.f32 %v2815_v16, %v187_v61  ;;  %v50_v52 = vmul.f32 %v48_v6, %v2752_v60  ;;  %v172_v55 = vadd.f32 %v170_v12, %v166_v24  ;;  %v189_v5 = vmul.f32 %v2827_v21, %v187_v61  ;;  %v149_v37 = vld [vmem:[%s4529_s3 + $0x90] sm:$0xff]  ;;  %v150_v38 = vld [vmem:[%s4529_s3 + $0x98] sm:$0xff]  ;;  %v1782_v44 = vld [vmem:[%s4529_s3 + $0x168] sm:$0xff]  ;;  %s3218_s13 = sld [smem:[#allocation2 + $0x28]]  ;;  %s3503_s16 = sld [smem:[#allocation2 + $0x37]] }
  0x30   :  { %v173_v4 = vadd.f32 %v171_v17, %v167_v25  ;;  %v194_v10 = vmul.f32 %v2832_v22, %v193_v62  ;;  %v195_v11 = vmul.f32 %v2837_v23, %v193_v62  ;;  %v58_v6 = vmul.f32 %v2764_v0, %v57_v33  ;;  %v1783_v45 = vld [vmem:[%s4529_s3 + $0x170] sm:$0xff]  ;;  %s3303_s6 = sld [smem:[#allocation2 + $0x30]]  ;;  %s3865_s4 = sld [smem:[#allocation4 + $0x6]] }
  0x31   :  { %2102 = vmatpush1.bf16.msra.mxu0 %v2101_v40  ;;  %v2852_v40 = vld [vmem:[%s4526_s0 + $0x78] sm:$0xff]  ;;  %v178_v27 = vadd.f32 %v176_v18, %v172_v55  ;;  %v66_v61 = vstv %s2756_s9  ;;  %v75_v29 = vstv %s2779_s24  ;;  %v211_v43 = vstv %s2878_s27  ;;  %s2978_s27 = sld [smem:[#allocation2 + $0x16]]  ;;  %s3176_s24 = sld [smem:[#allocation2 + $0x24]] }
  0x32   :  { %2138 = vmatpush1.bf16.msra.mxu1 %v2137_v41  ;;  %2103 = vmatprep.subr.bf16.mxu0 %v2504_v3  ;;  %v182_v41 = vmul.f32 %v2805_v14, %v181_v56  ;;  %v2865_v56 = vmul.f32 %v2847_v36, %v199_v13  ;;  %v201_v63 = vmul.f32 %v2852_v40, %v199_v13  ;;  %s3301_s9 = sld [smem:[#allocation2 + $0x2b]]  ;;  %s3509_s2 = sld [smem:[#allocation2 + $0x40]] }
  0x33   :  { %2139 = vmatprep.subr.bf16.mxu1 %v2504_v3  ;;  %v179_v28 = vadd.f32 %v177_v26, %v173_v4  ;;  %v60_v62 = vadd.f32 %v58_v6, %v49_v20  ;;  %v67_v12 = vmul.f32 %v2774_v2, %v66_v61  ;;  %v68_v13 = vmul.f32 %v2784_v7, %v66_v61  ;;  %v2892_v20 = vld [vmem:[%s4526_s0 + $0x88] sm:$0xff]  ;;  %s3526_s5 = sld [smem:[#allocation2 + $0x38]] }
  0x34   :  { %v184_v30 = vadd.f32 %v182_v41, %v178_v27  ;;  %v76_v18 = vmul.f32 %v2789_v8, %v75_v29  ;;  %v77_v25 = vmul.f32 %v2794_v9, %v75_v29  ;;  %v84_v26 = vstv %s2800_s17  ;;  %s3084_s17 = sld [smem:[#allocation4 + $0x2]] }
  0x35   :  { %2105 = vmatpush1.bf16.msra.mxu0 %v2104_v42  ;;  %v59_v42 = vmul.f32 %v2769_v1, %v57_v33  ;;  %v69_v24 = vadd.f32 %v67_v12, %v60_v62  ;;  %v93_v33 = vstv %s2821_s11  ;;  %v86_v55 = vmul.f32 %v2810_v15, %v84_v26  ;;  %s3015_s11 = sld [smem:[#allocation2 + $0x1c]] }
  0x36   :  { %2141 = vmatpush1.bf16.msra.mxu1 %v2140_v47  ;;  %2106 = vmatprep.subr.bf16.mxu0 %v2504_v3  ;;  %v185_v47 = vadd.f32 %v183_v46, %v179_v28  ;;  %v190_v41 = vadd.f32 %v188_v51, %v184_v30  ;;  %v94_v4 = vmul.f32 %v2815_v16, %v93_v33  ;;  %v1780_v51 = vld [vmem:[%s4529_s3 + $0x158] sm:$0xff]  ;;  %v120_v12 = vstv %s2883_s30  ;;  %s3041_s30 = sld [smem:[#allocation2 + $0x1f]] }
  0x37   :  { %2142 = vmatprep.subr.bf16.mxu1 %v2504_v3  ;;  %v61_v17 = vadd.f32 %v59_v42, %v50_v52  ;;  %v78_v46 = vadd.f32 %v76_v18, %v69_v24  ;;  %v85_v52 = vmul.f32 %v2805_v14, %v84_v26  ;;  %v207_v34 = vmul.f32 %v2892_v20, %v205_v19 }
  0x38   :  { %v191_v31 = vadd.f32 %v189_v5, %v185_v47  ;;  %v1781_v5 = vld [vmem:[%s4529_s3 + $0x160] sm:$0xff]  ;;  %v111_v42 = vstv %s2869_s1  ;;  %s2976_s1 = sld [smem:[#allocation2 + $0x15]]  ;;  %4546 = sst [smem:[#allocation8_spill]] %s3301_s9 }
  0x39   :  { %2108 = vmatpush1.bf16.msra.mxu0 %v2107_v48  ;;  %v70_v32 = vadd.f32 %v68_v13, %v61_v17  ;;  %v102_v48 = vstv %s2841_s23  ;;  %v87_v27 = vadd.f32 %v85_v52, %v78_v46  ;;  %v112_v62 = vmul.f32 %v2847_v36, %v111_v42  ;;  %v1784_v52 = vld [vmem:[%s4529_s3 + $0x178] sm:$0xff]  ;;  %s3201_s23 = sld [smem:[#allocation2 + $0x27]] }
  0x3a   :  { %2144 = vmatpush1.bf16.msra.mxu1 %v2143_v53  ;;  %2109 = vmatprep.subr.bf16.mxu0 %v2504_v3  ;;  %v197_v6 = vadd.f32 %v195_v11, %v191_v31  ;;  %v95_v53 = vmul.f32 %v2827_v21, %v93_v33  ;;  %v196_v11 = vadd.f32 %v194_v10, %v190_v41 }
  0x3b   :  { %2145 = vmatprep.subr.bf16.mxu1 %v2504_v3  ;;  %v79_v35 = vadd.f32 %v77_v25, %v70_v32  ;;  %v103_v28 = vmul.f32 %v2832_v22, %v102_v48  ;;  %v104_v39 = vmul.f32 %v2837_v23, %v102_v48  ;;  %v2116_v13 = vpack.c.bf16 %v1781_v5, %v1780_v51 }
  0x3c   :  { %v203_v10 = vadd.f32 %v201_v63, %v197_v6  ;;  %v113_v47 = vmul.f32 %v2852_v40, %v111_v42  ;;  %v2152_v63 = vpack.c.bf16 %v150_v38, %v149_v37  ;;  %v202_v17 = vadd.f32 %v2865_v56, %v196_v11 }
  0x3d   :  { %2111 = vmatpush1.bf16.msra.mxu0 %v2110_v54  ;;  %v2936_v54 = vld [vmem:[%s4526_s0 + $0x80] sm:$0xff]  ;;  %v88_v61 = vadd.f32 %v86_v55, %v79_v35  ;;  %v4545_v25 = vpack.c.bf16 %v2729_v50, %v2724_v49  ;;  %v122_v56 = vmul.f32 %v2892_v20, %v120_v12  ;;  %v152_v50 = vld [vmem:[%s4529_s3 + $0xa8] sm:$0xff]  ;;  %v2119_v32 = vpack.c.bf16 %v1783_v45, %v1782_v44  ;;  %v154_v35 = vld [vmem:[%s4529_s3 + $0xb8] sm:$0xff] }
  0x3e   :  { %2147 = vmatpush1.bf16.msra.mxu1 %v2146_v57  ;;  %2112 = vmatprep.subr.bf16.mxu0 %v2504_v3  ;;  %v96_v57 = vadd.f32 %v94_v4, %v87_v27  ;;  %v209_v29 = vadd.f32 %v207_v34, %v203_v10  ;;  %v206_v18 = vmul.f32 %v2936_v54, %v205_v19  ;;  %v151_v49 = vld [vmem:[%s4529_s3 + $0xa0] sm:$0xff]  ;;  %v126_v48 = vstv %s2921_s12  ;;  %v153_v34 = vld [vmem:[%s4529_s3 + $0xb0] sm:$0xff]  ;;  %s3242_s12 = sld [smem:[#allocation2 + $0x2a]] }
  0x3f   :  { %2148 = vmatprep.subr.bf16.mxu1 %v2504_v3  ;;  %v97_v30 = vadd.f32 %v95_v53, %v88_v61  ;;  %v121_v33 = vmul.f32 %v2936_v54, %v120_v12  ;;  %v2155_v46 = vpack.c.bf16 %v152_v50, %v151_v49  ;;  %v1785_v55 = vld [vmem:[%s4529_s3 + $0x180] sm:$0xff]  ;;  %v397_v5 = vstv %s2944_s29  ;;  %v1786_v12 = vld [vmem:[%s4529_s3 + $0x188] sm:$0xf]  ;;  %s3288_s29 = sld [smem:[#allocation2 + $0x2f]] }
  0x40   :  { %v105_v24 = vadd.f32 %v103_v28, %v96_v57  ;;  %v208_v4 = vadd.f32 %v206_v18, %v202_v17  ;;  %v403_v11 = vstv %s2946_s18  ;;  %v2122_v27 = vpack.c.bf16 %v1785_v55, %v1784_v52  ;;  %v155_v18 = vld [vmem:[%s4529_s3 + $0xc0] sm:$0xf]  ;;  %s3190_s18 = sld [smem:[#allocation2 + $0x26]] }
  0x41   :  { %2114 = vmatpush1.bf16.msra.mxu0 %v2113_v58  ;;  %v213_v58 = vadd.f32 %v211_v43, %v209_v29  ;;  %v106_v19 = vadd.f32 %v104_v39, %v97_v30  ;;  %v409_v28 = vstv %s2955_s10  ;;  %v2158_v42 = vpack.c.bf16 %v154_v35, %v153_v34  ;;  %v1802_v29 = vld [vmem:[%s4529_s3 + $0x198] sm:$0xff]  ;;  %s3324_s10 = sld [smem:[#allocation2 + $0x31]] }
  0x42   :  { %2150 = vmatpush1.bf16.msra.mxu1 %v4545_v25  ;;  %2115 = vmatprep.subr.bf16.mxu0 %v2504_v3  ;;  %v114_v26 = vadd.f32 %v112_v62, %v105_v24  ;;  %v212_v37 = vadd.f32 %v211_v43, %v208_v4  ;;  %v399_v61 = vmul.f32 %v397_v5, %v2752_v60  ;;  %v415_v57 = vstv %s2976_s1  ;;  %v1838_v24 = vld [vmem:[%s4529_s3 + $0x258] sm:$0xff]  ;;  %v1839_v25 = vld [vmem:[%s4529_s3 + $0x260] sm:$0xff]  ;;  %s3386_s1 = sld [smem:[#allocation2 + $0x35]] }
  0x43   :  { %2151 = vmatprep.subr.bf16.mxu1 %v2504_v3  ;;  %v215_v41 = vmax.f32 %v213_v58, 0.0  ;;  %v115_v31 = vadd.f32 %v113_v47, %v106_v19  ;;  %v405_v39 = vmul.f32 %v2769_v1, %v403_v11  ;;  %v411_v43 = vmul.f32 %v2784_v7, %v409_v28  ;;  %v1803_v58 = vld [vmem:[%s4529_s3 + $0x1a0] sm:$0xff]  ;;  %v1804_v19 = vld [vmem:[%s4529_s3 + $0x1a8] sm:$0xff] }
  0x44   :  { %v123_v53 = vadd.f32 %v121_v33, %v114_v26  ;;  %v421_v62 = vstv %s2978_s27  ;;  %v417_v47 = vmul.f32 %v2794_v9, %v415_v57  ;;  %v214_v17 = vmax.f32 %v212_v37, 0.0  ;;  %s3350_s27 = sld [smem:[#allocation2 + $0x33]] }
  0x45   :  { %2117 = vmatpush1.bf16.msra.mxu0 %v2116_v13  ;;  %v124_v6 = vadd.f32 %v122_v56, %v115_v31  ;;  %1788 = vmatprep.mubr.msk.f32.mxu0 %vm242_vm0, %v215_v41  ;;  %v1801_v13 = vld [vmem:[%s4529_s3 + $0x190] sm:$0xff]  ;;  %v407_v30 = vadd.f32 %v405_v39, %v399_v61  ;;  %v427_v44 = vstv %s2988_s7  ;;  %v423_v49 = vmul.f32 %v2810_v15, %v421_v62  ;;  %s3286_s7 = sld [smem:[#allocation2 + $0x2e]] }
  0x46   :  { %2153 = vmatpush1.bf16.msra.mxu1 %v2152_v63  ;;  %2118 = vmatprep.subr.bf16.mxu0 %v2504_v3  ;;  %v127_v10 = vadd.f32 %v126_v48, %v123_v53  ;;  %v2505_v63 = vmov 0.0   ;;  %v433_v50 = vstv %s2998_s14  ;;  %v2161_v26 = vpack.c.bf16 %v1802_v29, %v1801_v13  ;;  %v1842_v13 = vld [vmem:[%s4529_s3 + $0x278] sm:$0xff]  ;;  %v1843_v29 = vld [vmem:[%s4529_s3 + $0x280] sm:$0xff]  ;;  %s3342_s14 = sld [smem:[#allocation2 + $0x2c]] }
  0x47   :  { %2154 = vmatprep.subr.bf16.mxu1 %v2504_v3  ;;  %v128_v51 = vadd.f32 %v126_v48, %v124_v6  ;;  %v413_v56 = vadd.f32 %v411_v43, %v407_v30  ;;  %v2197_v33 = vpack.c.bf16 %v1839_v25, %v1838_v24  ;;  %v429_v31 = vmul.f32 %v2827_v21, %v427_v44  ;;  %v1840_v48 = vld [vmem:[%s4529_s3 + $0x268] sm:$0xff] }
  0x48   :  { %v129_v45 = vmax.f32 %v127_v10, 0.0  ;;  %v435_v52 = vmul.f32 %v2837_v23, %v433_v50  ;;  %v439_v55 = vstv %s3004_s15  ;;  %v560_v4 = vstv %s3006_s25  ;;  %v1808_v24 = vld [vmem:[%s4529_s3 + $0x1c8] sm:$0xff]  ;;  %s3188_s25 = sld [smem:[#allocation2 + $0x25]]  ;;  %s3371_s15 = sld [smem:[#allocation2 + $0x34]] }
  0x49   :  { %2120 = vmatpush1.bf16.msra.mxu0 %v2119_v32  ;;  %v130_v38 = vmax.f32 %v128_v51, 0.0  ;;  %v419_v41 = vadd.f32 %v417_v47, %v413_v56  ;;  %v2164_v32 = vpack.c.bf16 %v1804_v19, %v1803_v58  ;;  %v562_v34 = vmul.f32 %v560_v4, %v2752_v60  ;;  %v1805_v51 = vld [vmem:[%s4529_s3 + $0x1b0] sm:$0xff]  ;;  %4550 = sst [smem:[#allocation12_spill]] %s3386_s1 }
  0x4a   :  { %2156 = vmatpush1.bf16.msra.mxu1 %v2155_v46  ;;  %2121 = vmatprep.subr.bf16.mxu0 %v2504_v3  ;;  %v1841_v46 = vld [vmem:[%s4529_s3 + $0x270] sm:$0xff]  ;;  %v566_v35 = vstv %s3015_s11  ;;  %v572_v53 = vstv %s3017_s28  ;;  %v578_v10 = vstv %s3027_s22  ;;  %v441_v43 = vmul.f32 %v2852_v40, %v439_v55  ;;  %s3111_s11 = sld [smem:[#allocation2 + $0x23]]  ;;  %s3239_s22 = sld [smem:[#allocation2 + $0x29]] }
  0x4b   :  { %2157 = vmatprep.subr.bf16.mxu1 %v2504_v3  ;;  %1790 = vmatprep.mubr.msk.f32.mxu1 %vm242_vm0, %v130_v38  ;;  %v425_v6 = vadd.f32 %v423_v49, %v419_v41  ;;  %v568_v37 = vmul.f32 %v2769_v1, %v566_v35  ;;  %v574_v38 = vmul.f32 %v2784_v7, %v572_v53  ;;  %v590_v58 = vstv %s3065_s20  ;;  %s3335_s20 = sld [smem:[#allocation2 + $0x32]]  ;;  %s3501_s28 = sld [smem:[#allocation2 + $0x36]] }
  0x4c   :  { %v2200_v61 = vpack.c.bf16 %v1841_v46, %v1840_v48  ;;  %v580_v47 = vmul.f32 %v2794_v9, %v578_v10  ;;  %v398_v19 = vmul.f32 %v397_v5, %v2747_v59  ;;  %v404_v56 = vmul.f32 %v2764_v0, %v403_v11  ;;  %v1844_v5 = vld [vmem:[%s4529_s3 + $0x288] sm:$0xff]  ;;  %v1845_v11 = vld [vmem:[%s4529_s3 + $0x290] sm:$0xff]  ;;  %4547 = sst [smem:[#allocation9_spill]] %s3342_s14 }
  0x4d   :  { %2123 = vmatpush1.bf16.msra.mxu0 %v2122_v27  ;;  %v1806_v27 = vld [vmem:[%s4529_s3 + $0x1b8] sm:$0xff]  ;;  %v431_v39 = vadd.f32 %v429_v31, %v425_v6  ;;  %v570_v30 = vadd.f32 %v568_v37, %v562_v34  ;;  %v596_v31 = vstv %s3071_s26  ;;  %v451_v48 = vstv %s3084_s17  ;;  %v1809_v37 = vld [vmem:[%s4529_s3 + $0x1d0] sm:$0xff]  ;;  %4548 = sst [smem:[#allocation10_spill]] %s3350_s27  ;;  %s3953_s26 = sld [smem:[#allocation2 + $0x51]] }
  0x4e   :  { %2159 = vmatpush1.bf16.msra.mxu1 %v2158_v42  ;;  %298 = vmatprep.subr.mxu0 %v2505_v63  ;;  %v445_v42 = vstv %s3025_s21  ;;  %v602_v34 = vstv %s3091_s8  ;;  %4549 = sst [smem:[#allocation11_spill]] %s3371_s15  ;;  %s3413_s8 = sld [smem:[#allocation4 + $0x4]] }
  0x4f   :  { %374 = vmatprep.subr.mxu1 %v2505_v63  ;;  %v437_v25 = vadd.f32 %v435_v52, %v431_v39  ;;  %v576_v49 = vadd.f32 %v574_v38, %v570_v30  ;;  %v592_v52 = vmul.f32 %v2827_v21, %v590_v58  ;;  %v1810_v38 = vld [vmem:[%s4529_s3 + $0x1d8] sm:$0xff]  ;;  %v410_v39 = vmul.f32 %v2774_v2, %v409_v28  ;;  %s3436_s21 = sld [smem:[#allocation4 + $0x5]]  ;;  %4560 = sst [smem:[#allocation11_spill]] %s3865_s4 }
  0x50   :  { %v1846_v28 = vld [vmem:[%s4529_s3 + $0x298] sm:$0xff]  ;;  %v604_v30 = vmul.f32 %v2852_v40, %v602_v34  ;;  %s3999_s17 = sld [smem:[#allocation2 + $0x4b]] }
  0x51   :  { %1787 = vmatpush1.msk.msra.mxu0 %vm246_vm1, %v1786_v12  ;;  %v584_v12 = vstv %s3041_s30  ;;  %v443_v41 = vadd.f32 %v441_v43, %v437_v25  ;;  %v582_v46 = vadd.f32 %v580_v47, %v576_v49  ;;  %v2173_v47 = vpack.c.bf16 %v1810_v38, %v1809_v37  ;;  %s3266_s30 = sld [smem:[#allocation2 + $0x2d]] }
  0x52   :  { %315 = vmatmul.mubr.f32.vlgmr.msra.gmra.mrb[0].mxu0 %v214_v17  ;;  %1789 = vmatpush1.msk.msra.mxu1 %vm246_vm1, %v155_v18  ;;  %v2167_v17 = vpack.c.bf16 %v1806_v27, %v1805_v51  ;;  %v1807_v18 = vld [vmem:[%s4529_s3 + $0x1c0] sm:$0xff]  ;;  %v561_v51 = vmul.f32 %v560_v4, %v2747_v59  ;;  %v567_v27 = vmul.f32 %v2764_v0, %v566_v35  ;;  %v608_v35 = vstv %s3111_s11  ;;  %s3529_s11 = sld [smem:[#allocation2 + $0x41]] }
  0x53   :  { %2160 = vmatprep.subr.bf16.mxu0 %v2504_v3  ;;  %391 = vmatmul.mubr.f32.vlgmr.msra.gmra.mrb[0].mxu1 %v129_v45  ;;  %v447_v45 = vmul.f32 %v2892_v20, %v445_v42  ;;  %v598_v59 = vmul.f32 %v2837_v23, %v596_v31  ;;  %v2206_v0 = vpack.c.bf16 %v1845_v11, %v1844_v5 }
  0x54   :  { %2162 = vmatpush1.bf16.msra.mxu0 %v2161_v26  ;;  %2196 = vmatprep.subr.bf16.mxu1 %v2504_v3  ;;  %v586_v26 = vmul.f32 %v2810_v15, %v584_v12  ;;  %v579_v11 = vmul.f32 %v2789_v8, %v578_v10  ;;  %4551 = sst [smem:[#allocation13_spill]] %s3413_s8 }
  0x55   :  { %2198 = vmatpush1.bf16.msra.mxu1 %v2197_v33  ;;  %2163 = vmatprep.subr.bf16.mxu0 %v2504_v3  ;;  %v2203_v33 = vpack.c.bf16 %v1843_v29, %v1842_v13  ;;  %v449_v6 = vadd.f32 %v447_v45, %v443_v41  ;;  %v1847_v13 = vld [vmem:[%s4529_s3 + $0x2a0] sm:$0xff]  ;;  %v416_v45 = vmul.f32 %v2789_v8, %v415_v57  ;;  %v1812_v57 = vld [vmem:[%s4529_s3 + $0x1e8] sm:$0xff]  ;;  %v1813_v41 = vld [vmem:[%s4529_s3 + $0x1f0] sm:$0xff]  ;;  %4552 = sst [smem:[#allocation14_spill]] %s3436_s21 }
  0x56   :  { %2199 = vmatprep.subr.bf16.mxu1 %v2504_v3  ;;  %v588_v43 = vadd.f32 %v586_v26, %v582_v46  ;;  %v2209_v49 = vpack.c.bf16 %v1847_v13, %v1846_v28  ;;  %v1849_v26 = vld [vmem:[%s4529_s3 + $0x2b0] sm:$0xff]  ;;  %v422_v8 = vmul.f32 %v2805_v14, %v421_v62  ;;  %v1815_v28 = vld [vmem:[%s4529_s3 + $0x200] sm:$0xff]  ;;  %v1816_v13 = vld [vmem:[%s4529_s3 + $0x208] sm:$0xff] }
  0x57   :  { %v453_v4 = vadd.f32 %v451_v48, %v449_v6  ;;  %v1850_v6 = vld [vmem:[%s4529_s3 + $0x2b8] sm:$0xff] }
  0x58   :  { %2165 = vmatpush1.bf16.msra.mxu0 %v2164_v32  ;;  %v2170_v32 = vpack.c.bf16 %v1808_v24, %v1807_v18  ;;  %v594_v29 = vadd.f32 %v592_v52, %v588_v43  ;;  %v569_v18 = vadd.f32 %v567_v27, %v561_v51  ;;  %v573_v24 = vmul.f32 %v2774_v2, %v572_v53  ;;  %v1811_v2 = vld [vmem:[%s4529_s3 + $0x1e0] sm:$0xff]  ;;  %v1848_v53 = vld [vmem:[%s4529_s3 + $0x2a8] sm:$0xff]  ;;  %v1814_v52 = vld [vmem:[%s4529_s3 + $0x1f8] sm:$0xff] }
  0x59   :  { %2201 = vmatpush1.bf16.msra.mxu1 %v2200_v61  ;;  %2166 = vmatprep.subr.bf16.mxu0 %v2504_v3  ;;  %v406_v61 = vadd.f32 %v404_v56, %v398_v19  ;;  %v610_v56 = vmul.f32 %v2892_v20, %v608_v35  ;;  %v2176_v46 = vpack.c.bf16 %v1812_v57, %v1811_v2  ;;  %v1851_v51 = vld [vmem:[%s4529_s3 + $0x2c0] sm:$0xff]  ;;  %v735_v43 = vstv %s3190_s18  ;;  %v3316_v57 = vld [vmem:[%s4529_s3 + $0x228] sm:$0xff]  ;;  %s3955_s18 = sld [smem:[#allocation2 + $0x52]] }
  0x5a   :  { %2202 = vmatprep.subr.bf16.mxu1 %v2504_v3  ;;  %v600_v19 = vadd.f32 %v598_v59, %v594_v29  ;;  %v575_v5 = vadd.f32 %v573_v24, %v569_v18  ;;  %v2212_v37 = vpack.c.bf16 %v1849_v26, %v1848_v53  ;;  %v2179_v59 = vpack.c.bf16 %v1814_v52, %v1813_v41  ;;  %v1852_v29 = vld [vmem:[%s4529_s3 + $0x2c8] sm:$0xff]  ;;  %v3275_v18 = vld [vmem:[%s4529_s3 + $0x210] sm:$0xff]  ;;  %v3311_v2 = vld [vmem:[%s4529_s3 + $0x220] sm:$0xff] }
  0x5b   :  { %v412_v25 = vadd.f32 %v410_v39, %v406_v61  ;;  %v723_v61 = vstv %s3176_s24  ;;  %v729_v39 = vstv %s3188_s25  ;;  %v2215_v62 = vpack.c.bf16 %v1851_v51, %v1850_v6  ;;  %s3572_s24 = sld [smem:[#allocation2 + $0x42]]  ;;  %s3659_s25 = sld [smem:[#allocation2 + $0x3b]] }
  0x5c   :  { %2168 = vmatpush1.bf16.msra.mxu0 %v2167_v17  ;;  %v455_v17 = vmax.f32 %v453_v4, 0.0  ;;  %v585_v4 = vmul.f32 %v2805_v14, %v584_v12  ;;  %v741_v14 = vstv %s3201_s23  ;;  %v1853_v12 = vld [vmem:[%s4529_s3 + $0x2d0] sm:$0xff]  ;;  %v731_v24 = vmul.f32 %v2769_v1, %v729_v39  ;;  %s3743_s23 = sld [smem:[#allocation2 + $0x3d]] }
  0x5d   :  { %2204 = vmatpush1.bf16.msra.mxu1 %v2203_v33  ;;  %2169 = vmatprep.subr.bf16.mxu0 %v2504_v3  ;;  %v606_v33 = vadd.f32 %v604_v30, %v600_v19  ;;  %v418_v27 = vadd.f32 %v416_v45, %v412_v25  ;;  %v737_v25 = vmul.f32 %v2784_v7, %v735_v43  ;;  %v1818_v45 = vld [vmem:[%s4529_s3 + $0x218] sm:$0xff]  ;;  %v753_v52 = vstv %s3239_s22  ;;  %s3874_s22 = sld [smem:[#allocation4 + $0x7]] }
  0x5e   :  { %2205 = vmatprep.subr.bf16.mxu1 %v2504_v3  ;;  %1827 = vmatprep.mubr.msk.f32.mxu0 %vm242_vm0, %v455_v17  ;;  %v3297_v19 = vld [vmem:[%s4529_s3 + $0x2d8] sm:$0xff]  ;;  %v591_v26 = vmul.f32 %v2815_v16, %v590_v58  ;;  %v743_v41 = vmul.f32 %v2794_v9, %v741_v14  ;;  %v2218_v6 = vpack.c.bf16 %v1853_v12, %v1852_v29  ;;  %v759_v51 = vstv %s3242_s12 }
  0x5f   :  { %v612_v10 = vadd.f32 %v610_v56, %v606_v33  ;;  %v424_v30 = vadd.f32 %v422_v8, %v418_v27  ;;  %v747_v56 = vstv %s3218_s13  ;;  %v2188_v8 = vpack.c.bf16 %v3316_v57, %v3311_v2  ;;  %s4047_s13 = sld [smem:[#allocation2 + $0x55]] }
  0x60   :  { %2171 = vmatpush1.bf16.msra.mxu0 %v2170_v32  ;;  %v614_v32 = vstv %s3156_s19  ;;  %v749_v58 = vmul.f32 %v2810_v15, %v747_v56  ;;  %v892_v29 = vstv %s3286_s7  ;;  %s3507_s19 = sld [smem:[#allocation2 + $0x3f]]  ;;  %s3710_s7 = sld [smem:[#allocation2 + $0x45]] }
  0x61   :  { %2207 = vmatpush1.bf16.msra.mxu1 %v2206_v0  ;;  %2172 = vmatprep.subr.bf16.mxu0 %v2504_v3  ;;  %v616_v38 = vadd.f32 %v614_v32, %v612_v10  ;;  %v581_v0 = vadd.f32 %v579_v11, %v575_v5  ;;  %v2182_v5 = vpack.c.bf16 %v1816_v13, %v1815_v28  ;;  %v1857_v28 = vld [vmem:[%s4529_s3 + $0x2f0] sm:$0xff] }
  0x62   :  { %2208 = vmatprep.subr.bf16.mxu1 %v2504_v3 }
  0x63   :  { %v618_v17 = vmax.f32 %v616_v38, 0.0  ;;  %v587_v53 = vadd.f32 %v585_v4, %v581_v0  ;;  %v440_v0 = vmul.f32 %v2847_v36, %v439_v55  ;;  %v761_v4 = vmul.f32 %v2837_v23, %v759_v51  ;;  %4561 = sst [smem:[#allocation9_spill]] %s3874_s22 }
  0x64   :  { %2174 = vmatpush1.bf16.msra.mxu0 %v2173_v47  ;;  %v428_v47 = vmul.f32 %v2815_v16, %v427_v44  ;;  %v725_v44 = vmul.f32 %v723_v61, %v2752_v60 }
  0x65   :  { %2210 = vmatpush1.bf16.msra.mxu1 %v2209_v49  ;;  %2175 = vmatprep.subr.bf16.mxu0 %v2504_v3  ;;  %v1855_v49 = vld [vmem:[%s4529_s3 + $0x2e0] sm:$0xff]  ;;  %v593_v10 = vadd.f32 %v591_v26, %v587_v53  ;;  %v916_v53 = vstv %s3335_s20  ;;  %v771_v26 = vstv %s3342_s14  ;;  %s3563_s14 = sld [smem:[#allocation2 + $0x39]]  ;;  %s3972_s20 = sld [smem:[#allocation2 + $0x4a]] }
  0x66   :  { %2211 = vmatprep.subr.bf16.mxu1 %v2504_v3  ;;  %1864 = vmatprep.mubr.msk.f32.mxu1 %vm242_vm0, %v618_v17  ;;  %v733_v33 = vadd.f32 %v731_v24, %v725_v44  ;;  %v430_v11 = vadd.f32 %v428_v47, %v424_v30  ;;  %v2221_v27 = vpack.c.bf16 %v1855_v49, %v3297_v19  ;;  %v898_v30 = vstv %s3288_s29  ;;  %v1858_v49 = vld [vmem:[%s4529_s3 + $0x2f8] sm:$0xff]  ;;  %s3785_s29 = sld [smem:[#allocation2 + $0x3e]] }
  0x67   :  { %v765_v47 = vstv %s3301_s9  ;;  %v894_v17 = vmul.f32 %v2769_v1, %v892_v29  ;;  %v900_v12 = vmul.f32 %v2784_v7, %v898_v30  ;;  %v1821_v1 = vld [vmem:[%s4529_s3 + $0x230] sm:$0xff]  ;;  %v446_v7 = vmul.f32 %v2936_v54, %v445_v42  ;;  %v1859_v42 = vld [vmem:[%s4529_s3 + $0x300] sm:$0xff]  ;;  %s3614_s9 = sld [smem:[#allocation2 + $0x3a]] }
  0x68   :  { %2177 = vmatpush1.bf16.msra.mxu0 %v2176_v46  ;;  %v434_v46 = vmul.f32 %v2832_v22, %v433_v50  ;;  %v739_v16 = vadd.f32 %v737_v25, %v733_v33  ;;  %v2185_v50 = vpack.c.bf16 %v1818_v45, %v3275_v18  ;;  %v904_v18 = vstv %s3303_s6  ;;  %s3794_s6 = sld [smem:[#allocation2 + $0x47]] }
  0x69   :  { %2213 = vmatpush1.bf16.msra.mxu1 %v2212_v37  ;;  %2178 = vmatprep.subr.bf16.mxu0 %v2504_v3  ;;  %v597_v37 = vmul.f32 %v2832_v22, %v596_v31  ;;  %v886_v22 = vstv %s3266_s30  ;;  %v1856_v31 = vld [vmem:[%s4529_s3 + $0x2e8] sm:$0xff]  ;;  %v910_v25 = vstv %s3324_s10  ;;  %v767_v57 = vmul.f32 %v2852_v40, %v765_v47  ;;  %s3668_s30 = sld [smem:[#allocation2 + $0x44]]  ;;  %s4235_s10 = sld [smem:[#allocation4 + $0x9]] }
  0x6a   :  { %2214 = vmatprep.subr.bf16.mxu1 %v2504_v3  ;;  %v745_v38 = vadd.f32 %v743_v41, %v739_v16  ;;  %v888_v55 = vmul.f32 %v886_v22, %v2752_v60  ;;  %v603_v60 = vmul.f32 %v2847_v36, %v602_v34  ;;  %v2224_v45 = vpack.c.bf16 %v1857_v28, %v1856_v31  ;;  %v1822_v34 = vld [vmem:[%s4529_s3 + $0x238] sm:$0xff] }
  0x6b   :  { %v599_v44 = vadd.f32 %v597_v37, %v593_v10  ;;  %v906_v36 = vmul.f32 %v2794_v9, %v904_v18  ;;  %v912_v41 = vmul.f32 %v2810_v15, %v910_v25  ;;  %v2227_v16 = vpack.c.bf16 %v1859_v42, %v1858_v49  ;;  %v1823_v15 = vld [vmem:[%s4529_s3 + $0x240] sm:$0xff]  ;;  %v1861_v37 = vld [vmem:[%s4529_s3 + $0x310] sm:$0xff] }
  0x6c   :  { %2180 = vmatpush1.bf16.msra.mxu0 %v2179_v59  ;;  %v755_v59 = vmul.f32 %v2827_v21, %v753_v52  ;;  %v751_v13 = vadd.f32 %v749_v58, %v745_v38  ;;  %v896_v19 = vadd.f32 %v894_v17, %v888_v55  ;;  %v928_v10 = vstv %s3371_s15  ;;  %s3752_s15 = sld [smem:[#allocation2 + $0x46]]  ;;  %4555 = sst [smem:[#allocation10_spill]] %s3785_s29 }
  0x6d   :  { %2216 = vmatpush1.bf16.msra.mxu1 %v2215_v62  ;;  %2181 = vmatprep.subr.bf16.mxu0 %v2504_v3  ;;  %v436_v62 = vadd.f32 %v434_v46, %v430_v11  ;;  %v609_v11 = vmul.f32 %v2936_v54, %v608_v35  ;;  %v922_v46 = vstv %s3350_s27  ;;  %v1824_v54 = vld [vmem:[%s4529_s3 + $0x248] sm:$0xff]  ;;  %v930_v28 = vmul.f32 %v2852_v40, %v928_v10  ;;  %v1875_v40 = vld [vmem:[%s4529_s3 + $0x320] sm:$0xff]  ;;  %s3626_s27 = sld [smem:[#allocation2 + $0x43]] }
  0x6e   :  { %2217 = vmatprep.subr.bf16.mxu1 %v2504_v3  ;;  %v757_v24 = vadd.f32 %v755_v59, %v751_v13  ;;  %v902_v33 = vadd.f32 %v900_v12, %v896_v19  ;;  %v924_v59 = vmul.f32 %v2837_v23, %v922_v46  ;;  %v777_v23 = vstv %s3413_s8  ;;  %4556 = sst [smem:[#allocation8_spill]] %s3794_s6  ;;  %s3949_s8 = sld [smem:[#allocation2 + $0x49]] }
  0x6f   :  { %v442_v2 = vadd.f32 %v440_v0, %v436_v62  ;;  %v934_v0 = vstv %s3386_s1  ;;  %v940_v19 = vstv %s3436_s21  ;;  %s3701_s21 = sld [smem:[#allocation2 + $0x3c]]  ;;  %s3975_s1 = sld [smem:[#allocation2 + $0x53]] }
  0x70   :  { %2183 = vmatpush1.bf16.msra.mxu0 %v2182_v5  ;;  %v763_v9 = vadd.f32 %v761_v4, %v757_v24  ;;  %v605_v5 = vadd.f32 %v603_v60, %v599_v44  ;;  %v908_v58 = vadd.f32 %v906_v36, %v902_v33  ;;  %v2194_v4 = vpack.c.bf16 %v1824_v54, %v1823_v15  ;;  %v1862_v36 = vld [vmem:[%s4529_s3 + $0x318] sm:$0xf]  ;;  %v1880_v15 = vld [vmem:[%s4529_s3 + $0x348] sm:$0xff] }
  0x71   :  { %2219 = vmatpush1.bf16.msra.mxu1 %v2218_v6  ;;  %2184 = vmatprep.subr.bf16.mxu0 %v2504_v3  ;;  %v2191_v6 = vpack.c.bf16 %v1822_v34, %v1821_v1  ;;  %v448_v35 = vadd.f32 %v446_v7, %v442_v2  ;;  %v936_v44 = vmul.f32 %v2892_v20, %v934_v0  ;;  %v1913_v1 = vld [vmem:[%s4529_s3 + $0x3f0] sm:$0xff]  ;;  %v1914_v33 = vld [vmem:[%s4529_s3 + $0x3f8] sm:$0xff]  ;;  %v1916_v54 = vld [vmem:[%s4529_s3 + $0x408] sm:$0xff] }
  0x72   :  { %2220 = vmatprep.subr.bf16.mxu1 %v2504_v3  ;;  %v914_v38 = vadd.f32 %v912_v41, %v908_v58  ;;  %v611_v62 = vadd.f32 %v609_v11, %v605_v5  ;;  %v1915_v5 = vld [vmem:[%s4529_s3 + $0x400] sm:$0xff] }
  0x73   :  { %v452_v55 = vadd.f32 %v451_v48, %v448_v35  ;;  %v1876_v48 = vld [vmem:[%s4529_s3 + $0x328] sm:$0xff]  ;;  %v2272_v58 = vpack.c.bf16 %v1915_v5, %v1914_v33  ;;  %v1917_v35 = vld [vmem:[%s4529_s3 + $0x410] sm:$0xff] }
  0x74   :  { %2186 = vmatpush1.bf16.msra.mxu0 %v2185_v50  ;;  %v918_v50 = vmul.f32 %v2827_v21, %v916_v53  ;;  %v1860_v21 = vld [vmem:[%s4529_s3 + $0x308] sm:$0xff]  ;;  %v615_v60 = vadd.f32 %v614_v32, %v611_v62  ;;  %v2233_v49 = vpack.c.bf16 %v1876_v48, %v1875_v40  ;;  %v3547_v62 = vld [vmem:[%s4526_s0] sm:$0xff]  ;;  %v1218_v40 = vstv %s3509_s2  ;;  %v3634_v5 = vld [vmem:[%s4526_s0 + $0x30] sm:$0xff] }
  0x75   :  { %2222 = vmatpush1.bf16.msra.mxu1 %v2221_v27  ;;  %2187 = vmatprep.subr.bf16.mxu0 %v2504_v3  ;;  %v769_v27 = vadd.f32 %v767_v57, %v763_v9  ;;  %v2230_v13 = vpack.c.bf16 %v1861_v37, %v1860_v21  ;;  %v1912_v32 = vld [vmem:[%s4529_s3 + $0x3e8] sm:$0xff]  ;;  %v1877_v9 = vld [vmem:[%s4529_s3 + $0x330] sm:$0xff]  ;;  %v1878_v57 = vld [vmem:[%s4529_s3 + $0x338] sm:$0xff]  ;;  %v2275_v21 = vpack.c.bf16 %v1917_v35, %v1916_v54  ;;  %v1067_v54 = vstv %s3563_s14  ;;  %s4070_s14 = sld [smem:[#allocation2 + $0x4d]] }
  0x76   :  { %2223 = vmatprep.subr.bf16.mxu1 %v2504_v3  ;;  %v920_v31 = vadd.f32 %v918_v50, %v914_v38  ;;  %v617_v42 = vmax.f32 %v615_v60, 0.0  ;;  %v2269_v2 = vpack.c.bf16 %v1913_v1, %v1912_v32  ;;  %v1879_v50 = vld [vmem:[%s4529_s3 + $0x340] sm:$0xff]  ;;  %v1882_v37 = vld [vmem:[%s4529_s3 + $0x358] sm:$0xff]  ;;  %v1884_v48 = vld [vmem:[%s4529_s3 + $0x368] sm:$0xff] }
  0x77   :  { %v1918_v38 = vld [vmem:[%s4529_s3 + $0x418] sm:$0xff]  ;;  %v1883_v60 = vld [vmem:[%s4529_s3 + $0x360] sm:$0xff] }
  0x78   :  { %2189 = vmatpush1.bf16.msra.mxu0 %v2188_v8  ;;  %v773_v8 = vmul.f32 %v2892_v20, %v771_v26  ;;  %v926_v12 = vadd.f32 %v924_v59, %v920_v31  ;;  %v454_v20 = vmax.f32 %v452_v55, 0.0  ;;  %v1919_v59 = vld [vmem:[%s4529_s3 + $0x420] sm:$0xff]  ;;  %v3555_v31 = vld [vmem:[%s4526_s0 + $0x10] sm:$0xff]  ;;  %v1055_v55 = vstv %s3503_s16  ;;  %v3607_v1 = vld [vmem:[%s4526_s0 + $0x18] sm:$0xff] }
  0x79   :  { %2225 = vmatpush1.bf16.msra.mxu1 %v2224_v45  ;;  %2190 = vmatprep.subr.bf16.mxu0 %v2504_v3  ;;  %v1825_v45 = vld [vmem:[%s4529_s3 + $0x250] sm:$0xf] }
  0x7a   :  { %2226 = vmatprep.subr.bf16.mxu1 %v2504_v3  ;;  %v775_v17 = vadd.f32 %v773_v8, %v769_v27  ;;  %v932_v24 = vadd.f32 %v930_v28, %v926_v12  ;;  %v2239_v27 = vpack.c.bf16 %v1880_v15, %v1879_v50  ;;  %v1881_v8 = vld [vmem:[%s4529_s3 + $0x350] sm:$0xff]  ;;  %v730_v28 = vmul.f32 %v3555_v31, %v729_v39 }
  0x7b   :  { %v1212_v12 = vstv %s3507_s19  ;;  %v2278_v39 = vpack.c.bf16 %v1919_v59, %v1918_v38  ;;  %s4143_s19 = sld [smem:[#allocation2 + $0x58]] }
  0x7c   :  { %2192 = vmatpush1.bf16.msra.mxu0 %v2191_v6  ;;  %v779_v7 = vadd.f32 %v777_v23, %v775_v17  ;;  %v938_v34 = vadd.f32 %v936_v44, %v932_v24  ;;  %v887_v17 = vmul.f32 %v3547_v62, %v886_v22  ;;  %v2242_v44 = vpack.c.bf16 %v1882_v37, %v1881_v8  ;;  %v3580_v22 = vld [vmem:[%s4526_s0 + $0x20] sm:$0xff]  ;;  %v1920_v24 = vld [vmem:[%s4529_s3 + $0x428] sm:$0xff] }
  0x7d   :  { %2228 = vmatpush1.bf16.msra.mxu1 %v2227_v16  ;;  %2193 = vmatprep.subr.bf16.mxu0 %v2504_v3  ;;  %v2236_v16 = vpack.c.bf16 %v1878_v57, %v1877_v9  ;;  %v1224_v9 = vstv %s3529_s11  ;;  %v2245_v57 = vpack.c.bf16 %v1884_v48, %v1883_v60  ;;  %v1230_v37 = vstv %s3572_s24  ;;  %s4175_s11 = sld [smem:[#allocation2 + $0x59]] }
  0x7e   :  { %2229 = vmatprep.subr.bf16.mxu1 %v2504_v3  ;;  %v942_v41 = vadd.f32 %v940_v19, %v938_v34  ;;  %v781_v11 = vmax.f32 %v779_v7, 0.0  ;;  %v1057_v7 = vmul.f32 %v3607_v1, %v1055_v55  ;;  %v1073_v48 = vstv %s3614_s9  ;;  %s4102_s9 = sld [smem:[#allocation2 + $0x4e]] }
  0x80   :  { %2195 = vmatpush1.bf16.msra.mxu0 %v2194_v4  ;;  %v944_v6 = vmax.f32 %v942_v41, 0.0  ;;  %v724_v4 = vmul.f32 %v3547_v62, %v723_v61  ;;  %v893_v61 = vmul.f32 %v3555_v31, %v892_v29  ;;  %v736_v29 = vmul.f32 %v3580_v22, %v735_v43  ;;  %v1885_v41 = vld [vmem:[%s4529_s3 + $0x370] sm:$0xff] }
  0x81   :  { %2231 = vmatpush1.bf16.msra.mxu1 %v2230_v13  ;;  %536 = vmatprep.subr.mxu0 %v2505_v63  ;;  %v1049_v13 = vstv %s3501_s28  ;;  %s4009_s28 = sld [smem:[#allocation2 + $0x54]] }
  0x82   :  { %699 = vmatprep.subr.mxu1 %v2505_v63  ;;  %v732_v43 = vadd.f32 %v730_v28, %v724_v4  ;;  %v1887_v4 = vld [vmem:[%s4529_s3 + $0x380] sm:$0xff] }
  0x83   :  { %v3676_v28 = vld [vmem:[%s4526_s0 + $0x40] sm:$0xff] }
  0x84   :  { %1826 = vmatpush1.msk.msra.mxu0 %vm246_vm1, %v1825_v45  ;;  %v1921_v45 = vld [vmem:[%s4529_s3 + $0x430] sm:$0xff] }
  0x85   :  { %553 = vmatmul.mubr.f32.vlgmr.msra.gmra.mrb[2].mxu0 %v454_v20  ;;  %1863 = vmatpush1.msk.msra.mxu1 %vm246_vm1, %v1862_v36  ;;  %v3599_v20 = vld [vmem:[%s4526_s0 + $0x8] sm:$0xff]  ;;  %v1061_v36 = vstv %s3526_s5  ;;  %v2281_v33 = vpack.c.bf16 %v1921_v45, %v1920_v24  ;;  %s4035_s5 = sld [smem:[#allocation2 + $0x4c]] }
  0x86   :  { %2232 = vmatprep.subr.bf16.mxu0 %v2504_v3  ;;  %2268 = vmatprep.subr.bf16.mxu1 %v2504_v3  ;;  %v1051_v32 = vmul.f32 %v3599_v20, %v1049_v13  ;;  %v1214_v34 = vmul.f32 %v3599_v20, %v1212_v12 }
  0x87   :  { %2234 = vmatpush1.bf16.msra.mxu0 %v2233_v49  ;;  %716 = vmatmul.mubr.f32.vlgmr.msra.gmra.mrb[2].mxu1 %v617_v42  ;;  %v1220_v49 = vmul.f32 %v3607_v1, %v1218_v40  ;;  %v895_v42 = vadd.f32 %v893_v61, %v887_v17  ;;  %v1888_v17 = vld [vmem:[%s4529_s3 + $0x388] sm:$0xff] }
  0x88   :  { %2270 = vmatpush1.bf16.msra.mxu1 %v2269_v2  ;;  %2235 = vmatprep.subr.bf16.mxu0 %v2504_v3  ;;  %v899_v2 = vmul.f32 %v3580_v22, %v898_v30  ;;  %v742_v30 = vmul.f32 %v3634_v5, %v741_v14  ;;  %v1059_v50 = vadd.f32 %v1057_v7, %v1051_v32  ;;  %v3652_v14 = vld [vmem:[%s4526_s0 + $0x28] sm:$0xff]  ;;  %v1236_v7 = vstv %s3626_s27  ;;  %s4226_s27 = sld [smem:[#allocation4 + $0x8]] }
  0x89   :  { %2271 = vmatprep.subr.bf16.mxu1 %v2504_v3  ;;  %1901 = vmatprep.mubr.msk.f32.mxu0 %vm242_vm0, %v781_v11  ;;  %v1886_v11 = vld [vmem:[%s4529_s3 + $0x378] sm:$0xff]  ;;  %v1063_v15 = vmul.f32 %v3652_v14, %v1061_v36  ;;  %v1222_v35 = vadd.f32 %v1220_v49, %v1214_v34  ;;  %v1924_v61 = vld [vmem:[%s4529_s3 + $0x448] sm:$0xff]  ;;  %v911_v32 = vmul.f32 %v3676_v28, %v910_v25 }
  0x8a   :  { %1938 = vmatprep.mubr.msk.f32.mxu1 %vm242_vm0, %v944_v6  ;;  %v1922_v6 = vld [vmem:[%s4529_s3 + $0x438] sm:$0xff]  ;;  %v901_v8 = vadd.f32 %v899_v2, %v895_v42  ;;  %v2248_v38 = vpack.c.bf16 %v1886_v11, %v1885_v41  ;;  %v2251_v34 = vpack.c.bf16 %v1888_v17, %v1887_v4  ;;  %v1889_v42 = vld [vmem:[%s4529_s3 + $0x390] sm:$0xff]  ;;  %v1927_v41 = vld [vmem:[%s4529_s3 + $0x460] sm:$0xff] }
  0x8b   :  { %2237 = vmatpush1.bf16.msra.mxu0 %v2236_v16  ;;  %v1923_v16 = vld [vmem:[%s4529_s3 + $0x440] sm:$0xff]  ;;  %v1065_v60 = vadd.f32 %v1063_v15, %v1059_v50  ;;  %v3718_v2 = vld [vmem:[%s4526_s0 + $0x50] sm:$0xff]  ;;  %v1892_v4 = vld [vmem:[%s4529_s3 + $0x3a8] sm:$0xff] }
  0x8c   :  { %2273 = vmatpush1.bf16.msra.mxu1 %v2272_v58  ;;  %2238 = vmatprep.subr.bf16.mxu0 %v2504_v3  ;;  %v738_v58 = vadd.f32 %v736_v29, %v732_v43  ;;  %v2284_v59 = vpack.c.bf16 %v1923_v16, %v1922_v6  ;;  %v754_v25 = vmul.f32 %v3718_v2, %v753_v52  ;;  %v3736_v52 = vld [vmem:[%s4526_s0 + $0x48] sm:$0xff]  ;;  %v1079_v16 = vstv %s3659_s25  ;;  %v1929_v17 = vld [vmem:[%s4529_s3 + $0x470] sm:$0xff]  ;;  %s4134_s25 = sld [smem:[#allocation2 + $0x4f]] }
  0x8d   :  { %2274 = vmatprep.subr.bf16.mxu1 %v2504_v3  ;;  %v1075_v6 = vmul.f32 %v3736_v52, %v1073_v48  ;;  %v1238_v50 = vmul.f32 %v3736_v52, %v1236_v7 }
  0x8f   :  { %2240 = vmatpush1.bf16.msra.mxu0 %v2239_v27  ;;  %v1226_v27 = vmul.f32 %v3652_v14, %v1224_v9 }
  0x90   :  { %2276 = vmatpush1.bf16.msra.mxu1 %v2275_v21  ;;  %2241 = vmatprep.subr.bf16.mxu0 %v2504_v3  ;;  %v905_v21 = vmul.f32 %v3634_v5, %v904_v18  ;;  %v748_v18 = vmul.f32 %v3676_v28, %v747_v56  ;;  %v3694_v56 = vld [vmem:[%s4526_s0 + $0x38] sm:$0xff] }
  0x91   :  { %2277 = vmatprep.subr.bf16.mxu1 %v2504_v3  ;;  %v1069_v29 = vmul.f32 %v3694_v56, %v1067_v54  ;;  %v1228_v24 = vadd.f32 %v1226_v27, %v1222_v35  ;;  %v1232_v45 = vmul.f32 %v3694_v56, %v1230_v37  ;;  %v917_v35 = vmul.f32 %v3718_v2, %v916_v53 }
  0x92   :  { %v907_v43 = vadd.f32 %v905_v21, %v901_v8  ;;  %v1242_v27 = vstv %s3668_s30 }
  0x93   :  { %2243 = vmatpush1.bf16.msra.mxu0 %v2242_v44  ;;  %v1925_v44 = vld [vmem:[%s4529_s3 + $0x450] sm:$0xff]  ;;  %v1071_v11 = vadd.f32 %v1069_v29, %v1065_v60  ;;  %v1085_v60 = vstv %s3701_s21  ;;  %s4166_s21 = sld [smem:[#allocation2 + $0x50]] }
  0x94   :  { %2279 = vmatpush1.bf16.msra.mxu1 %v2278_v39  ;;  %2244 = vmatprep.subr.bf16.mxu0 %v2504_v3  ;;  %v744_v39 = vadd.f32 %v742_v30, %v738_v58  ;;  %v2287_v49 = vpack.c.bf16 %v1925_v44, %v1924_v61  ;;  %v1234_v58 = vadd.f32 %v1232_v45, %v1228_v24 }
  0x95   :  { %2280 = vmatprep.subr.bf16.mxu1 %v2504_v3  ;;  %v913_v15 = vadd.f32 %v911_v32, %v907_v43  ;;  %v1077_v44 = vadd.f32 %v1075_v6, %v1071_v11  ;;  %v1248_v32 = vstv %s3710_s7  ;;  %s4569_s7 = sld [smem:[#allocation16_spill]] }
  0x96   :  { %v750_v30 = vadd.f32 %v748_v18, %v744_v39  ;;  %v1928_v18 = vld [vmem:[%s4529_s3 + $0x468] sm:$0xff]  ;;  %v1240_v29 = vadd.f32 %v1238_v50, %v1234_v58  ;;  %v1091_v58 = vstv %s3743_s23 }
  0x97   :  { %2246 = vmatpush1.bf16.msra.mxu0 %v2245_v57  ;;  %v1890_v57 = vld [vmem:[%s4529_s3 + $0x398] sm:$0xff]  ;;  %v919_v45 = vadd.f32 %v917_v35, %v913_v15 }
  0x98   :  { %2282 = vmatpush1.bf16.msra.mxu1 %v2281_v33  ;;  %2247 = vmatprep.subr.bf16.mxu0 %v2504_v3  ;;  %v1926_v33 = vld [vmem:[%s4529_s3 + $0x458] sm:$0xff]  ;;  %v2254_v8 = vpack.c.bf16 %v1890_v57, %v1889_v42  ;;  %v756_v61 = vadd.f32 %v754_v25, %v750_v30  ;;  %v1893_v42 = vld [vmem:[%s4529_s3 + $0x3b0] sm:$0xff] }
  0x99   :  { %2283 = vmatprep.subr.bf16.mxu1 %v2504_v3  ;;  %v2290_v21 = vpack.c.bf16 %v1927_v41, %v1926_v33  ;;  %v3802_v25 = vld [vmem:[%s4526_s0 + $0x70] sm:$0xff]  ;;  %v1894_v57 = vld [vmem:[%s4529_s3 + $0x3b8] sm:$0xff]  ;;  %v1931_v41 = vld [vmem:[%s4529_s3 + $0x480] sm:$0xff] }
  0x9a   :  { %v1930_v33 = vld [vmem:[%s4529_s3 + $0x478] sm:$0xff] }
  0x9b   :  { %2249 = vmatpush1.bf16.msra.mxu0 %v2248_v38  ;;  %v1891_v38 = vld [vmem:[%s4529_s3 + $0x3a0] sm:$0xff] }
  0x9c   :  { %2285 = vmatpush1.bf16.msra.mxu1 %v2284_v59  ;;  %2250 = vmatprep.subr.bf16.mxu0 %v2504_v3  ;;  %v3760_v59 = vld [vmem:[%s4526_s0 + $0x60] sm:$0xff] }
  0x9d   :  { %2286 = vmatprep.subr.bf16.mxu1 %v2504_v3  ;;  %v760_v53 = vmul.f32 %v3760_v59, %v759_v51  ;;  %v3778_v51 = vld [vmem:[%s4526_s0 + $0x58] sm:$0xff]  ;;  %v923_v43 = vmul.f32 %v3760_v59, %v922_v46  ;;  %v766_v46 = vmul.f32 %v3802_v25, %v765_v47  ;;  %v3820_v47 = vld [vmem:[%s4526_s0 + $0x68] sm:$0xff] }
  0x9e   :  { %v1081_v39 = vmul.f32 %v3778_v51, %v1079_v16  ;;  %v1244_v24 = vmul.f32 %v3778_v51, %v1242_v27  ;;  %v1087_v6 = vmul.f32 %v3820_v47, %v1085_v60  ;;  %v1250_v15 = vmul.f32 %v3820_v47, %v1248_v32 }
  0x9f   :  { %2252 = vmatpush1.bf16.msra.mxu0 %v2251_v34  ;;  %v2257_v34 = vpack.c.bf16 %v1892_v4, %v1891_v38  ;;  %v762_v30 = vadd.f32 %v760_v53, %v756_v61  ;;  %v925_v35 = vadd.f32 %v923_v43, %v919_v45  ;;  %v2260_v38 = vpack.c.bf16 %v1894_v57, %v1893_v42  ;;  %v1895_v4 = vld [vmem:[%s4529_s3 + $0x3c0] sm:$0xff]  ;;  %v1932_v61 = vld [vmem:[%s4529_s3 + $0x488] sm:$0xff] }
  0xa0   :  { %2288 = vmatpush1.bf16.msra.mxu1 %v2287_v49  ;;  %2253 = vmatprep.subr.bf16.mxu0 %v2504_v3  ;;  %v2293_v49 = vpack.c.bf16 %v1929_v17, %v1928_v18  ;;  %v1083_v11 = vadd.f32 %v1081_v39, %v1077_v44  ;;  %v1246_v50 = vadd.f32 %v1244_v24, %v1240_v29  ;;  %v3840_v18 = vld [vmem:[%s4526_s0 + $0x80] sm:$0xff]  ;;  %v1933_v44 = vld [vmem:[%s4529_s3 + $0x490] sm:$0xff]  ;;  %v1097_v45 = vstv %s3785_s29 }
  0xa1   :  { %2289 = vmatprep.subr.bf16.mxu1 %v2504_v3  ;;  %v2296_v53 = vpack.c.bf16 %v1931_v41, %v1930_v33  ;;  %v772_v17 = vmul.f32 %v3840_v18, %v771_v26  ;;  %v768_v39 = vadd.f32 %v766_v46, %v762_v30  ;;  %v3858_v26 = vld [vmem:[%s4526_s0 + $0x78] sm:$0xff]  ;;  %v935_v42 = vmul.f32 %v3840_v18, %v934_v0  ;;  %v1897_v41 = vld [vmem:[%s4529_s3 + $0x3d0] sm:$0xff] }
  0xa2   :  { %v1089_v29 = vadd.f32 %v1087_v6, %v1083_v11  ;;  %v1093_v24 = vmul.f32 %v3858_v26, %v1091_v58  ;;  %v1252_v43 = vadd.f32 %v1250_v15, %v1246_v50  ;;  %v1260_v46 = vstv %s3794_s6  ;;  %v1898_v30 = vld [vmem:[%s4529_s3 + $0x3d8] sm:$0xff]  ;;  %v3886_v6 = vld [vmem:[%s4526_s0 + $0x88] sm:$0xff]  ;;  %s3947_s0 = sld [smem:[#allocation2 + $0x48]]  ;;  %s4111_s6 = sld [smem:[#allocation2 + $0x57]] }
  0xa3   :  { %2255 = vmatpush1.bf16.msra.mxu0 %v2254_v8  ;;  %v929_v8 = vmul.f32 %v3802_v25, %v928_v10  ;;  %v1896_v10 = vld [vmem:[%s4529_s3 + $0x3c8] sm:$0xff]  ;;  %v2299_v33 = vpack.c.bf16 %v1933_v44, %v1932_v61  ;;  %v774_v0 = vadd.f32 %v772_v17, %v768_v39  ;;  %v1099_v50 = vmul.f32 %v3886_v6, %v1097_v45  ;;  %v1934_v15 = vld [vmem:[%s4529_s3 + $0x498] sm:$0xff] }
  0xa4   :  { %2291 = vmatpush1.bf16.msra.mxu1 %v2290_v21  ;;  %2256 = vmatprep.subr.bf16.mxu0 %v2504_v3  ;;  %v1254_v21 = vstv %s3752_s15  ;;  %v2263_v57 = vpack.c.bf16 %v1896_v10, %v1895_v4  ;;  %v1095_v11 = vadd.f32 %v1093_v24, %v1089_v29  ;;  %v2266_v4 = vpack.c.bf16 %v1898_v30, %v1897_v41 }
  0xa5   :  { %2292 = vmatprep.subr.bf16.mxu1 %v2504_v3  ;;  %v778_v10 = vadd.f32 %v777_v23, %v774_v0  ;;  %v1103_v44 = vstv %s3865_s4  ;;  %v1266_v24 = vstv %s3874_s22  ;;  %v1899_v23 = vld [vmem:[%s4529_s3 + $0x3e0] sm:$0xf]  ;;  %s4079_s4 = sld [smem:[#allocation2 + $0x56]] }
  0xa6   :  { %v1101_v61 = vadd.f32 %v1099_v50, %v1095_v11  ;;  %v1951_v50 = vld [vmem:[%s4529_s3 + $0x4c0] sm:$0xff] }
  0xa7   :  { %2258 = vmatpush1.bf16.msra.mxu0 %v2257_v34  ;;  %v1256_v34 = vmul.f32 %v3858_v26, %v1254_v21 }
  0xa8   :  { %2294 = vmatpush1.bf16.msra.mxu1 %v2293_v49  ;;  %2259 = vmatprep.subr.bf16.mxu0 %v2504_v3  ;;  %v931_v49 = vadd.f32 %v929_v8, %v925_v35  ;;  %v1935_v35 = vld [vmem:[%s4529_s3 + $0x4a0] sm:$0xff] }
  0xa9   :  { %2295 = vmatprep.subr.bf16.mxu1 %v2504_v3  ;;  %v1258_v8 = vadd.f32 %v1256_v34, %v1252_v43  ;;  %v2302_v17 = vpack.c.bf16 %v1935_v35, %v1934_v15  ;;  %v1949_v43 = vld [vmem:[%s4529_s3 + $0x4b0] sm:$0xff]  ;;  %v1950_v34 = vld [vmem:[%s4529_s3 + $0x4b8] sm:$0xff]  ;;  %v1952_v15 = vld [vmem:[%s4529_s3 + $0x4c8] sm:$0xff] }
  0xaa   :  { %v2305_v30 = vpack.c.bf16 %v1950_v34, %v1949_v43  ;;  %v1988_v35 = vld [vmem:[%s4529_s3 + $0x588] sm:$0xff]  ;;  %v1955_v34 = vld [vmem:[%s4529_s3 + $0x4e0] sm:$0xff] }
  0xab   :  { %2261 = vmatpush1.bf16.msra.mxu0 %v2260_v38  ;;  %v1262_v38 = vmul.f32 %v3886_v6, %v1260_v46 }
  0xac   :  { %2297 = vmatpush1.bf16.msra.mxu1 %v2296_v53  ;;  %2262 = vmatprep.subr.bf16.mxu0 %v2504_v3  ;;  %v937_v53 = vadd.f32 %v935_v42, %v931_v49  ;;  %v780_v49 = vmax.f32 %v778_v10, 0.0  ;;  %v1987_v42 = vld [vmem:[%s4529_s3 + $0x580] sm:$0xff]  ;;  %v1953_v10 = vld [vmem:[%s4529_s3 + $0x4d0] sm:$0xff] }
  0xad   :  { %2298 = vmatprep.subr.bf16.mxu1 %v2504_v3  ;;  %v1264_v39 = vadd.f32 %v1262_v38, %v1258_v8  ;;  %v1989_v8 = vld [vmem:[%s4529_s3 + $0x590] sm:$0xff] }
  0xae   :  { %v941_v29 = vadd.f32 %v940_v19, %v937_v53  ;;  %v1986_v19 = vld [vmem:[%s4529_s3 + $0x578] sm:$0xff] }
  0xaf   :  { %2264 = vmatpush1.bf16.msra.mxu0 %v2263_v57  ;;  %v1105_v57 = vadd.f32 %v1103_v44, %v1101_v61  ;;  %v1268_v41 = vadd.f32 %v1266_v24, %v1264_v39  ;;  %v2341_v11 = vpack.c.bf16 %v1987_v42, %v1986_v19  ;;  %v1954_v61 = vld [vmem:[%s4529_s3 + $0x4d8] sm:$0xff]  ;;  %v1992_v19 = vld [vmem:[%s4529_s3 + $0x5a8] sm:$0xff]  ;;  %v1993_v42 = vld [vmem:[%s4529_s3 + $0x5b0] sm:$0xff] }
  0xb0   :  { %2300 = vmatpush1.bf16.msra.mxu1 %v2299_v33  ;;  %2265 = vmatprep.subr.bf16.mxu0 %v2504_v3  ;;  %v1936_v33 = vld [vmem:[%s4529_s3 + $0x4a8] sm:$0xf]  ;;  %v943_v0 = vmax.f32 %v941_v29, 0.0  ;;  %v1990_v39 = vld [vmem:[%s4529_s3 + $0x598] sm:$0xff]  ;;  %v1991_v29 = vld [vmem:[%s4529_s3 + $0x5a0] sm:$0xff]  ;;  %v2311_v43 = vpack.c.bf16 %v1954_v61, %v1953_v10 }
  0xb1   :  { %2301 = vmatprep.subr.bf16.mxu1 %v2504_v3  ;;  %v1107_v38 = vmax.f32 %v1105_v57, 0.0  ;;  %v1270_v53 = vmax.f32 %v1268_v41, 0.0  ;;  %v1050_v57 = vmul.f32 %v3547_v62, %v1049_v13  ;;  %v1375_v41 = vstv %s3947_s0 }
  0xb3   :  { %2267 = vmatpush1.bf16.msra.mxu0 %v2266_v4  ;;  %v2308_v4 = vpack.c.bf16 %v1952_v15, %v1951_v50  ;;  %v1538_v50 = vstv %s3953_s26  ;;  %v1544_v15 = vstv %s3955_s18 }
  0xb4   :  { %2303 = vmatpush1.bf16.msra.mxu1 %v2302_v17  ;;  %862 = vmatprep.subr.mxu0 %v2505_v63  ;;  %v2344_v17 = vpack.c.bf16 %v1989_v8, %v1988_v35  ;;  %v1957_v35 = vld [vmem:[%s4529_s3 + $0x4f0] sm:$0xff]  ;;  %v1994_v8 = vld [vmem:[%s4529_s3 + $0x5b8] sm:$0xff]  ;;  %v1540_v10 = vmul.f32 %v3599_v20, %v1538_v50  ;;  %v1546_v61 = vmul.f32 %v3607_v1, %v1544_v15 }
  0xb5   :  { %1025 = vmatprep.subr.mxu1 %v2505_v63 }
  0xb7   :  { %1900 = vmatpush1.msk.msra.mxu0 %vm246_vm1, %v1899_v23  ;;  %v2347_v23 = vpack.c.bf16 %v1991_v29, %v1990_v39  ;;  %v1225_v29 = vmul.f32 %v3580_v22, %v1224_v9  ;;  %v1960_v9 = vld [vmem:[%s4529_s3 + $0x508] sm:$0xff] }
  0xb8   :  { %879 = vmatmul.mubr.f32.vlgmr.msra.gmra.mrb[4].mxu0 %v780_v49  ;;  %1937 = vmatpush1.msk.msra.mxu1 %vm246_vm1, %v1936_v33  ;;  %v1956_v49 = vld [vmem:[%s4529_s3 + $0x4e8] sm:$0xff]  ;;  %v1056_v33 = vmul.f32 %v3555_v31, %v1055_v55  ;;  %v2350_v55 = vpack.c.bf16 %v1993_v42, %v1992_v19  ;;  %v1997_v19 = vld [vmem:[%s4529_s3 + $0x5d0] sm:$0xff] }
  0xb9   :  { %2304 = vmatprep.subr.bf16.mxu0 %v2504_v3  ;;  %2340 = vmatprep.subr.bf16.mxu1 %v2504_v3  ;;  %v2314_v13 = vpack.c.bf16 %v1956_v49, %v1955_v34  ;;  %v1996_v49 = vld [vmem:[%s4529_s3 + $0x5c8] sm:$0xff] }
  0xba   :  { %2306 = vmatpush1.bf16.msra.mxu0 %v2305_v30  ;;  %1042 = vmatmul.mubr.f32.vlgmr.msra.gmra.mrb[4].mxu1 %v943_v0  ;;  %v1381_v30 = vstv %s3949_s8  ;;  %v1213_v0 = vmul.f32 %v3547_v62, %v1212_v12  ;;  %v1062_v12 = vmul.f32 %v3580_v22, %v1061_v36  ;;  %v1377_v36 = vmul.f32 %v3599_v20, %v1375_v41  ;;  %v1959_v20 = vld [vmem:[%s4529_s3 + $0x500] sm:$0xff] }
  0xbb   :  { %2342 = vmatpush1.bf16.msra.mxu1 %v2341_v11  ;;  %2307 = vmatprep.subr.bf16.mxu0 %v2504_v3  ;;  %v1219_v11 = vmul.f32 %v3555_v31, %v1218_v40  ;;  %v1958_v40 = vld [vmem:[%s4529_s3 + $0x4f8] sm:$0xff] }
  0xbc   :  { %2343 = vmatprep.subr.bf16.mxu1 %v2504_v3  ;;  %1975 = vmatprep.mubr.msk.f32.mxu0 %vm242_vm0, %v1107_v38  ;;  %v1995_v38 = vld [vmem:[%s4529_s3 + $0x5c0] sm:$0xff]  ;;  %v2317_v34 = vpack.c.bf16 %v1958_v40, %v1957_v35  ;;  %v1556_v35 = vstv %s4009_s28  ;;  %v2356_v40 = vpack.c.bf16 %v1997_v19, %v1996_v49  ;;  %v2000_v49 = vld [vmem:[%s4529_s3 + $0x5e8] sm:$0xff]  ;;  %v2001_v19 = vld [vmem:[%s4529_s3 + $0x5f0] sm:$0xff] }
  0xbd   :  { %2012 = vmatprep.mubr.msk.f32.mxu1 %vm242_vm0, %v1270_v53  ;;  %v1058_v53 = vadd.f32 %v1056_v33, %v1050_v57  ;;  %v1221_v39 = vadd.f32 %v1219_v11, %v1213_v0  ;;  %v1393_v33 = vstv %s3999_s17  ;;  %v1548_v0 = vadd.f32 %v1546_v61, %v1540_v10 }
  0xbe   :  { %2309 = vmatpush1.bf16.msra.mxu0 %v2308_v4  ;;  %v1383_v4 = vmul.f32 %v3607_v1, %v1381_v30  ;;  %v1068_v1 = vmul.f32 %v3634_v5, %v1067_v54  ;;  %v1399_v10 = vstv %s4035_s5 }
  0xbf   :  { %2345 = vmatpush1.bf16.msra.mxu1 %v2344_v17  ;;  %2310 = vmatprep.subr.bf16.mxu0 %v2504_v3  ;;  %v1387_v17 = vstv %s3972_s20  ;;  %v1064_v42 = vadd.f32 %v1062_v12, %v1058_v53  ;;  %v2320_v12 = vpack.c.bf16 %v1960_v9, %v1959_v20  ;;  %v1999_v53 = vld [vmem:[%s4529_s3 + $0x5e0] sm:$0xff] }
  0xc0   :  { %2346 = vmatprep.subr.bf16.mxu1 %v2504_v3  ;;  %v1385_v57 = vadd.f32 %v1383_v4, %v1377_v36  ;;  %v1389_v54 = vmul.f32 %v3652_v14, %v1387_v17  ;;  %v1963_v9 = vld [vmem:[%s4529_s3 + $0x520] sm:$0xff] }
  0xc1   :  { %v1070_v36 = vadd.f32 %v1068_v1, %v1064_v42 }
  0xc2   :  { %2312 = vmatpush1.bf16.msra.mxu0 %v2311_v43  ;;  %v1550_v43 = vstv %s3975_s1  ;;  %v1391_v4 = vadd.f32 %v1389_v54, %v1385_v57  ;;  %v1405_v54 = vstv %s4070_s14 }
  0xc3   :  { %2348 = vmatpush1.bf16.msra.mxu1 %v2347_v23  ;;  %2313 = vmatprep.subr.bf16.mxu0 %v2504_v3  ;;  %v2353_v23 = vpack.c.bf16 %v1995_v38, %v1994_v8  ;;  %v1552_v11 = vmul.f32 %v3652_v14, %v1550_v43  ;;  %v1961_v8 = vld [vmem:[%s4529_s3 + $0x510] sm:$0xff]  ;;  %v1074_v14 = vmul.f32 %v3676_v28, %v1073_v48  ;;  %v1998_v38 = vld [vmem:[%s4529_s3 + $0x5d8] sm:$0xff] }
  0xc4   :  { %2349 = vmatprep.subr.bf16.mxu1 %v2504_v3  ;;  %v1395_v48 = vmul.f32 %v3694_v56, %v1393_v33  ;;  %v2359_v1 = vpack.c.bf16 %v1999_v53, %v1998_v38  ;;  %v2003_v38 = vld [vmem:[%s4529_s3 + $0x600] sm:$0xff] }
  0xc5   :  { %v1554_v61 = vadd.f32 %v1552_v11, %v1548_v0  ;;  %v1076_v42 = vadd.f32 %v1074_v14, %v1070_v36  ;;  %v1965_v14 = vld [vmem:[%s4529_s3 + $0x530] sm:$0xff] }
  0xc6   :  { %2315 = vmatpush1.bf16.msra.mxu0 %v2314_v13  ;;  %v1227_v13 = vadd.f32 %v1225_v29, %v1221_v39  ;;  %v1558_v39 = vmul.f32 %v3694_v56, %v1556_v35  ;;  %v1080_v56 = vmul.f32 %v3718_v2, %v1079_v16  ;;  %v1397_v57 = vadd.f32 %v1395_v48, %v1391_v4 }
  0xc7   :  { %2351 = vmatpush1.bf16.msra.mxu1 %v2350_v55  ;;  %2316 = vmatprep.subr.bf16.mxu0 %v2504_v3  ;;  %v1231_v55 = vmul.f32 %v3634_v5, %v1230_v37  ;;  %v1962_v37 = vld [vmem:[%s4529_s3 + $0x518] sm:$0xff]  ;;  %v1401_v16 = vmul.f32 %v3736_v52, %v1399_v10  ;;  %v1411_v4 = vstv %s4102_s9 }
  0xc8   :  { %2352 = vmatprep.subr.bf16.mxu1 %v2504_v3  ;;  %v2323_v20 = vpack.c.bf16 %v1962_v37, %v1961_v8  ;;  %v1560_v0 = vadd.f32 %v1558_v39, %v1554_v61  ;;  %v2362_v8 = vpack.c.bf16 %v2001_v19, %v2000_v49  ;;  %v2002_v37 = vld [vmem:[%s4529_s3 + $0x5f8] sm:$0xff]  ;;  %v1082_v53 = vadd.f32 %v1080_v56, %v1076_v42  ;;  %v2004_v56 = vld [vmem:[%s4529_s3 + $0x608] sm:$0xff] }
  0xc9   :  { %v1233_v29 = vadd.f32 %v1231_v55, %v1227_v13  ;;  %v1243_v55 = vmul.f32 %v3718_v2, %v1242_v27  ;;  %v1966_v27 = vld [vmem:[%s4529_s3 + $0x538] sm:$0xff]  ;;  %v1403_v36 = vadd.f32 %v1401_v16, %v1397_v57  ;;  %v1417_v42 = vstv %s4134_s25 }
  0xca   :  { %2318 = vmatpush1.bf16.msra.mxu0 %v2317_v34  ;;  %v1237_v34 = vmul.f32 %v3676_v28, %v1236_v7  ;;  %v1964_v7 = vld [vmem:[%s4529_s3 + $0x528] sm:$0xff] }
  0xcb   :  { %2354 = vmatpush1.bf16.msra.mxu1 %v2353_v23  ;;  %2319 = vmatprep.subr.bf16.mxu0 %v2504_v3  ;;  %v1562_v23 = vstv %s4047_s13 }
  0xcc   :  { %2355 = vmatprep.subr.bf16.mxu1 %v2504_v3  ;;  %v1564_v11 = vmul.f32 %v3736_v52, %v1562_v23  ;;  %v1239_v13 = vadd.f32 %v1237_v34, %v1233_v29  ;;  %v1086_v52 = vmul.f32 %v3760_v59, %v1085_v60  ;;  %v1407_v60 = vmul.f32 %v3778_v51, %v1405_v54 }
  0xcd   :  { %v1249_v29 = vmul.f32 %v3760_v59, %v1248_v32  ;;  %v1574_v34 = vstv %s4111_s6  ;;  %v1968_v32 = vld [vmem:[%s4529_s3 + $0x548] sm:$0xff] }
  0xce   :  { %2321 = vmatpush1.bf16.msra.mxu0 %v2320_v12  ;;  %v1568_v12 = vstv %s4079_s4  ;;  %v1566_v48 = vadd.f32 %v1564_v11, %v1560_v0  ;;  %v1245_v39 = vadd.f32 %v1243_v55, %v1239_v13  ;;  %v1088_v49 = vadd.f32 %v1086_v52, %v1082_v53  ;;  %v2007_v52 = vld [vmem:[%s4529_s3 + $0x620] sm:$0xff] }
  0xcf   :  { %2357 = vmatpush1.bf16.msra.mxu1 %v2356_v40  ;;  %2322 = vmatprep.subr.bf16.mxu0 %v2504_v3  ;;  %v2326_v40 = vpack.c.bf16 %v1964_v7, %v1963_v9  ;;  %v1570_v61 = vmul.f32 %v3778_v51, %v1568_v12  ;;  %v1967_v9 = vld [vmem:[%s4529_s3 + $0x540] sm:$0xff]  ;;  %v1092_v51 = vmul.f32 %v3802_v25, %v1091_v58  ;;  %v2005_v7 = vld [vmem:[%s4529_s3 + $0x610] sm:$0xff]  ;;  %v1580_v13 = vstv %s4143_s19 }
  0xd0   :  { %2358 = vmatprep.subr.bf16.mxu1 %v2504_v3  ;;  %v1409_v19 = vadd.f32 %v1407_v60, %v1403_v36  ;;  %v1413_v58 = vmul.f32 %v3820_v47, %v1411_v4  ;;  %v1576_v16 = vmul.f32 %v3820_v47, %v1574_v34  ;;  %v1251_v0 = vadd.f32 %v1249_v29, %v1245_v39  ;;  %v1970_v47 = vld [vmem:[%s4529_s3 + $0x558] sm:$0xff] }
  0xd1   :  { %v1572_v57 = vadd.f32 %v1570_v61, %v1566_v48  ;;  %v1255_v11 = vmul.f32 %v3802_v25, %v1254_v21  ;;  %v2332_v55 = vpack.c.bf16 %v1968_v32, %v1967_v9  ;;  %v2006_v21 = vld [vmem:[%s4529_s3 + $0x618] sm:$0xff]  ;;  %v1582_v36 = vmul.f32 %v3858_v26, %v1580_v13  ;;  %v2009_v32 = vld [vmem:[%s4529_s3 + $0x630] sm:$0xff] }
  0xd2   :  { %2324 = vmatpush1.bf16.msra.mxu0 %v2323_v20  ;;  %v2329_v20 = vpack.c.bf16 %v1966_v27, %v1965_v14  ;;  %v1098_v14 = vmul.f32 %v3840_v18, %v1097_v45  ;;  %v1094_v27 = vadd.f32 %v1092_v51, %v1088_v49  ;;  %v1419_v45 = vmul.f32 %v3858_v26, %v1417_v42  ;;  %v1972_v26 = vld [vmem:[%s4529_s3 + $0x568] sm:$0xff] }
  0xd3   :  { %2360 = vmatpush1.bf16.msra.mxu1 %v2359_v1  ;;  %2325 = vmatprep.subr.bf16.mxu0 %v2504_v3  ;;  %v2365_v1 = vpack.c.bf16 %v2003_v38, %v2002_v37  ;;  %v1415_v37 = vadd.f32 %v1413_v58, %v1409_v19  ;;  %v1423_v38 = vstv %s4166_s21  ;;  %v1578_v53 = vadd.f32 %v1576_v16, %v1572_v57  ;;  %v2008_v51 = vld [vmem:[%s4529_s3 + $0x628] sm:$0xff] }
  0xd4   :  { %2361 = vmatprep.subr.bf16.mxu1 %v2504_v3  ;;  %v1257_v60 = vadd.f32 %v1255_v11, %v1251_v0  ;;  %v1261_v48 = vmul.f32 %v3840_v18, %v1260_v46  ;;  %v1586_v61 = vstv %s4175_s11  ;;  %v2371_v29 = vpack.c.bf16 %v2007_v52, %v2006_v21  ;;  %v2010_v52 = vld [vmem:[%s4529_s3 + $0x638] sm:$0xf] }
  0xd5   :  { %v1100_v46 = vadd.f32 %v1098_v14, %v1094_v27  ;;  %v1425_v9 = vmul.f32 %v3886_v6, %v1423_v38  ;;  %v2374_v58 = vpack.c.bf16 %v2009_v32, %v2008_v51  ;;  %v1429_v0 = vstv %s4226_s27  ;;  %v2064_v51 = vld [vmem:[%s4529_s3 + $0x728] sm:$0xff]  ;;  %v2065_v32 = vld [vmem:[%s4529_s3 + $0x730] sm:$0xff] }
  0xd6   :  { %2327 = vmatpush1.bf16.msra.mxu0 %v2326_v40  ;;  %v2368_v40 = vpack.c.bf16 %v2005_v7, %v2004_v56  ;;  %v1584_v56 = vadd.f32 %v1582_v36, %v1578_v53  ;;  %v1588_v7 = vmul.f32 %v3886_v6, %v1586_v61  ;;  %v1263_v49 = vadd.f32 %v1261_v48, %v1257_v60  ;;  %v2023_v6 = vld [vmem:[%s4529_s3 + $0x640] sm:$0xff]  ;;  %v2025_v36 = vld [vmem:[%s4529_s3 + $0x650] sm:$0xff]  ;;  %v2026_v60 = vld [vmem:[%s4529_s3 + $0x658] sm:$0xff] }
  0xd7   :  { %2363 = vmatpush1.bf16.msra.mxu1 %v2362_v8  ;;  %2328 = vmatprep.subr.bf16.mxu0 %v2504_v3  ;;  %v1969_v8 = vld [vmem:[%s4529_s3 + $0x550] sm:$0xff]  ;;  %v1104_v57 = vadd.f32 %v1103_v44, %v1100_v46  ;;  %v2062_v48 = vld [vmem:[%s4529_s3 + $0x718] sm:$0xff] }
  0xd8   :  { %2364 = vmatprep.subr.bf16.mxu1 %v2504_v3  ;;  %v2335_v39 = vpack.c.bf16 %v1970_v47, %v1969_v8  ;;  %v1590_v11 = vadd.f32 %v1588_v7, %v1584_v56  ;;  %v2024_v8 = vld [vmem:[%s4529_s3 + $0x648] sm:$0xff]  ;;  %v1973_v44 = vld [vmem:[%s4529_s3 + $0x570] sm:$0xf]  ;;  %v2419_v7 = vpack.c.bf16 %v2065_v32, %v2064_v51  ;;  %v1406_v32 = vmul.f32 %v3718_v2, %v1405_v54 }
  0xd9   :  { %v1106_v14 = vmax.f32 %v1104_v57, 0.0  ;;  %v2061_v47 = vld [vmem:[%s4529_s3 + $0x710] sm:$0xff]  ;;  %v1382_v57 = vmul.f32 %v3555_v31, %v1381_v30 }
  0xda   :  { %2330 = vmatpush1.bf16.msra.mxu0 %v2329_v20  ;;  %v1971_v20 = vld [vmem:[%s4529_s3 + $0x560] sm:$0xff] }
  0xdb   :  { %2366 = vmatpush1.bf16.msra.mxu1 %v2365_v1  ;;  %2331 = vmatprep.subr.bf16.mxu0 %v2504_v3  ;;  %v1421_v1 = vadd.f32 %v1419_v45, %v1415_v37  ;;  %v2338_v19 = vpack.c.bf16 %v1972_v26, %v1971_v20  ;;  %v2377_v37 = vpack.c.bf16 %v2024_v8, %v2023_v6  ;;  %v2031_v8 = vld [vmem:[%s4529_s3 + $0x680] sm:$0xff] }
  0xdc   :  { %2367 = vmatprep.subr.bf16.mxu1 %v2504_v3  ;;  %v2380_v26 = vpack.c.bf16 %v2026_v60, %v2025_v36  ;;  %v2035_v60 = vld [vmem:[%s4529_s3 + $0x6a0] sm:$0xff] }
  0xdd   :  { %v1427_v16 = vadd.f32 %v1425_v9, %v1421_v1  ;;  %v2027_v1 = vld [vmem:[%s4529_s3 + $0x660] sm:$0xff]  ;;  %v2028_v9 = vld [vmem:[%s4529_s3 + $0x668] sm:$0xff] }
  0xde   :  { %2333 = vmatpush1.bf16.msra.mxu0 %v2332_v55  ;;  %v1267_v55 = vadd.f32 %v1266_v24, %v1263_v49  ;;  %v2060_v24 = vld [vmem:[%s4529_s3 + $0x708] sm:$0xff]  ;;  %v2383_v56 = vpack.c.bf16 %v2028_v9, %v2027_v1  ;;  %v2029_v49 = vld [vmem:[%s4529_s3 + $0x670] sm:$0xff]  ;;  %v2038_v9 = vld [vmem:[%s4529_s3 + $0x6b8] sm:$0xff] }
  0xdf   :  { %2369 = vmatpush1.bf16.msra.mxu1 %v2368_v40  ;;  %2334 = vmatprep.subr.bf16.mxu0 %v2504_v3  ;;  %v1592_v40 = vstv %s4235_s10  ;;  %v1431_v21 = vadd.f32 %v1429_v0, %v1427_v16  ;;  %v2413_v53 = vpack.c.bf16 %v2061_v47, %v2060_v24  ;;  %v2066_v16 = vld [vmem:[%s4529_s3 + $0x738] sm:$0xff]  ;;  %v1551_v24 = vmul.f32 %v3580_v22, %v1550_v43  ;;  %v2071_v43 = vld [vmem:[%s4529_s3 + $0x760] sm:$0xff]  ;;  %v2037_v1 = vld [vmem:[%s4529_s3 + $0x6b0] sm:$0xff]  ;;  %s4568_s10 = sld [smem:[#allocation15_spill]] }
  0xe0   :  { %2370 = vmatprep.subr.bf16.mxu1 %v2504_v3  ;;  %v1594_v27 = vadd.f32 %v1592_v40, %v1590_v11  ;;  %v1269_v45 = vmax.f32 %v1267_v55, 0.0  ;;  %v2067_v11 = vld [vmem:[%s4529_s3 + $0x740] sm:$0xff]  ;;  %v1539_v55 = vmul.f32 %v3547_v62, %v1538_v50  ;;  %v2069_v50 = vld [vmem:[%s4529_s3 + $0x750] sm:$0xff] }
  0xe1   :  { %v2422_v30 = vpack.c.bf16 %v2067_v11, %v2066_v16  ;;  %v1412_v16 = vmul.f32 %v3760_v59, %v1411_v4 }
  0xe2   :  { %2336 = vmatpush1.bf16.msra.mxu0 %v2335_v39  ;;  %v2063_v39 = vld [vmem:[%s4529_s3 + $0x720] sm:$0xff]  ;;  %v1596_v20 = vmax.f32 %v1594_v27, 0.0 }
  0xe3   :  { %2372 = vmatpush1.bf16.msra.mxu1 %v2371_v29  ;;  %2337 = vmatprep.subr.bf16.mxu0 %v2504_v3  ;;  %v1433_v29 = vmax.f32 %v1431_v21, 0.0  ;;  %v2416_v46 = vpack.c.bf16 %v2063_v39, %v2062_v48  ;;  %v2033_v21 = vld [vmem:[%s4529_s3 + $0x690] sm:$0xff]  ;;  %v2036_v48 = vld [vmem:[%s4529_s3 + $0x6a8] sm:$0xff] }
  0xe4   :  { %2373 = vmatprep.subr.bf16.mxu1 %v2504_v3 }
  0xe6   :  { %2339 = vmatpush1.bf16.msra.mxu0 %v2338_v19  ;;  %v2030_v19 = vld [vmem:[%s4529_s3 + $0x678] sm:$0xff] }
  0xe7   :  { %2375 = vmatpush1.bf16.msra.mxu1 %v2374_v58  ;;  %1188 = vmatprep.subr.mxu0 %v2505_v63  ;;  %v1376_v58 = vmul.f32 %v3547_v62, %v1375_v41  ;;  %v1545_v41 = vmul.f32 %v3555_v31, %v1544_v15  ;;  %v2386_v6 = vpack.c.bf16 %v2030_v19, %v2029_v49  ;;  %v2068_v31 = vld [vmem:[%s4529_s3 + $0x748] sm:$0xff]  ;;  %v2039_v19 = vld [vmem:[%s4529_s3 + $0x6c0] sm:$0xff] }
  0xe8   :  { %1351 = vmatprep.subr.mxu1 %v2505_v63  ;;  %v1388_v62 = vmul.f32 %v3580_v22, %v1387_v17  ;;  %v2425_v17 = vpack.c.bf16 %v2069_v50, %v2068_v31  ;;  %v2070_v22 = vld [vmem:[%s4529_s3 + $0x758] sm:$0xff]  ;;  %v2398_v49 = vpack.c.bf16 %v2038_v9, %v2037_v1  ;;  %v2043_v50 = vld [vmem:[%s4529_s3 + $0x6e0] sm:$0xff] }
  0xe9   :  { %v1547_v15 = vadd.f32 %v1545_v41, %v1539_v55  ;;  %v1575_v55 = vmul.f32 %v3760_v59, %v1574_v34  ;;  %v2078_v59 = vld [vmem:[%s4529_s3 + $0x798] sm:$0xff]  ;;  %v2079_v34 = vld [vmem:[%s4529_s3 + $0x7a0] sm:$0xff] }
  0xea   :  { %1974 = vmatpush1.msk.msra.mxu0 %vm246_vm1, %v1973_v44  ;;  %v2032_v44 = vld [vmem:[%s4529_s3 + $0x688] sm:$0xff] }
  0xeb   :  { %1205 = vmatmul.mubr.f32.vlgmr.msra.gmra.mrb[6].mxu0 %v1106_v14  ;;  %2011 = vmatpush1.msk.msra.mxu1 %vm246_vm1, %v2010_v52  ;;  %v1384_v14 = vadd.f32 %v1382_v57, %v1376_v58  ;;  %v2389_v47 = vpack.c.bf16 %v2032_v44, %v2031_v8  ;;  %v2034_v52 = vld [vmem:[%s4529_s3 + $0x698] sm:$0xff]  ;;  %v2040_v58 = vld [vmem:[%s4529_s3 + $0x6c8] sm:$0xff]  ;;  %v1418_v44 = vmul.f32 %v3802_v25, %v1417_v42 }
  0xec   :  { %2376 = vmatprep.subr.bf16.mxu0 %v2504_v3  ;;  %2412 = vmatprep.subr.bf16.mxu1 %v2504_v3  ;;  %v2392_v36 = vpack.c.bf16 %v2034_v52, %v2033_v21  ;;  %v2401_v41 = vpack.c.bf16 %v2040_v58, %v2039_v19  ;;  %v2440_v42 = vpack.c.bf16 %v2079_v34, %v2078_v59 }
  0xed   :  { %2378 = vmatpush1.bf16.msra.mxu0 %v2377_v37  ;;  %1368 = vmatmul.mubr.f32.vlgmr.msra.gmra.mrb[6].mxu1 %v1269_v45  ;;  %v1390_v27 = vadd.f32 %v1388_v62, %v1384_v14  ;;  %v1394_v37 = vmul.f32 %v3634_v5, %v1393_v33  ;;  %v1553_v45 = vadd.f32 %v1551_v24, %v1547_v15  ;;  %v2044_v15 = vld [vmem:[%s4529_s3 + $0x6e8] sm:$0xff] }
  0xee   :  { %2414 = vmatpush1.bf16.msra.mxu1 %v2413_v53  ;;  %2379 = vmatprep.subr.bf16.mxu0 %v2504_v3  ;;  %v1557_v53 = vmul.f32 %v3634_v5, %v1556_v35  ;;  %v2428_v33 = vpack.c.bf16 %v2071_v43, %v2070_v22  ;;  %v2072_v5 = vld [vmem:[%s4529_s3 + $0x768] sm:$0xff]  ;;  %v2073_v35 = vld [vmem:[%s4529_s3 + $0x770] sm:$0xff]  ;;  %v1581_v62 = vmul.f32 %v3802_v25, %v1580_v13 }
  0xef   :  { %2415 = vmatprep.subr.bf16.mxu1 %v2504_v3  ;;  %2049 = vmatprep.mubr.msk.f32.mxu0 %vm242_vm0, %v1433_v29  ;;  %v1396_v39 = vadd.f32 %v1394_v37, %v1390_v27  ;;  %v1400_v29 = vmul.f32 %v3676_v28, %v1399_v10  ;;  %v2431_v10 = vpack.c.bf16 %v2073_v35, %v2072_v5  ;;  %v2080_v25 = vld [vmem:[%s4529_s3 + $0x7a8] sm:$0xff]  ;;  %v2081_v13 = vld [vmem:[%s4529_s3 + $0x7b0] sm:$0xff]  ;;  %v2046_v37 = vld [vmem:[%s4529_s3 + $0x6f8] sm:$0xff] }
  0xf0   :  { %2086 = vmatprep.mubr.msk.f32.mxu1 %vm242_vm0, %v1596_v20  ;;  %v1559_v20 = vadd.f32 %v1557_v53, %v1553_v45  ;;  %v1587_v21 = vmul.f32 %v3840_v18, %v1586_v61  ;;  %v2407_v52 = vpack.c.bf16 %v2044_v15, %v2043_v50  ;;  %v2045_v27 = vld [vmem:[%s4529_s3 + $0x6f0] sm:$0xff]  ;;  %v2083_v61 = vld [vmem:[%s4529_s3 + $0x7c0] sm:$0xff] }
  0xf1   :  { %2381 = vmatpush1.bf16.msra.mxu0 %v2380_v26  ;;  %v1563_v26 = vmul.f32 %v3676_v28, %v1562_v23  ;;  %v1402_v51 = vadd.f32 %v1400_v29, %v1396_v39  ;;  %v2074_v28 = vld [vmem:[%s4529_s3 + $0x778] sm:$0xff]  ;;  %v2075_v23 = vld [vmem:[%s4529_s3 + $0x780] sm:$0xff]  ;;  %v2410_v45 = vpack.c.bf16 %v2046_v37, %v2045_v27  ;;  %v2084_v39 = vld [vmem:[%s4529_s3 + $0x7c8] sm:$0xf] }
  0xf2   :  { %2417 = vmatpush1.bf16.msra.mxu1 %v2416_v46  ;;  %2382 = vmatprep.subr.bf16.mxu0 %v2504_v3  ;;  %v2395_v46 = vpack.c.bf16 %v2036_v48, %v2035_v60  ;;  %v2434_v54 = vpack.c.bf16 %v2075_v23, %v2074_v28  ;;  %v2047_v60 = vld [vmem:[%s4529_s3 + $0x700] sm:$0xf] }
  0xf3   :  { %2418 = vmatprep.subr.bf16.mxu1 %v2504_v3  ;;  %v1408_v57 = vadd.f32 %v1406_v32, %v1402_v51 }
  0xf5   :  { %2384 = vmatpush1.bf16.msra.mxu0 %v2383_v56  ;;  %v1565_v56 = vadd.f32 %v1563_v26, %v1559_v20  ;;  %v1414_v8 = vadd.f32 %v1412_v16, %v1408_v57 }
  0xf6   :  { %2420 = vmatpush1.bf16.msra.mxu1 %v2419_v7  ;;  %2385 = vmatprep.subr.bf16.mxu0 %v2504_v3  ;;  %v1569_v7 = vmul.f32 %v3718_v2, %v1568_v12  ;;  %v2076_v2 = vld [vmem:[%s4529_s3 + $0x788] sm:$0xff]  ;;  %v2077_v12 = vld [vmem:[%s4529_s3 + $0x790] sm:$0xff] }
  0xf7   :  { %2421 = vmatprep.subr.bf16.mxu1 %v2504_v3  ;;  %v2437_v4 = vpack.c.bf16 %v2077_v12, %v2076_v2  ;;  %v1420_v24 = vadd.f32 %v1418_v44, %v1414_v8 }
  0xf8   :  { %v1571_v11 = vadd.f32 %v1569_v7, %v1565_v56 }
  0xf9   :  { %2387 = vmatpush1.bf16.msra.mxu0 %v2386_v6  ;;  %v2041_v6 = vld [vmem:[%s4529_s3 + $0x6d0] sm:$0xff] }
  0xfa   :  { %2423 = vmatpush1.bf16.msra.mxu1 %v2422_v30  ;;  %2388 = vmatprep.subr.bf16.mxu0 %v2504_v3  ;;  %v2042_v30 = vld [vmem:[%s4529_s3 + $0x6d8] sm:$0xff]  ;;  %v1577_v14 = vadd.f32 %v1575_v55, %v1571_v11 }
  0xfb   :  { %2424 = vmatprep.subr.bf16.mxu1 %v2504_v3  ;;  %v2404_v31 = vpack.c.bf16 %v2042_v30, %v2041_v6 }
  0xfd   :  { %2390 = vmatpush1.bf16.msra.mxu0 %v2389_v47  ;;  %v1424_v47 = vmul.f32 %v3840_v18, %v1423_v38  ;;  %v2443_v38 = vpack.c.bf16 %v2081_v13, %v2080_v25  ;;  %v2082_v18 = vld [vmem:[%s4529_s3 + $0x7b8] sm:$0xff] }
  0xfe   :  { %2426 = vmatpush1.bf16.msra.mxu1 %v2425_v17  ;;  %2391 = vmatprep.subr.bf16.mxu0 %v2504_v3  ;;  %v1583_v17 = vadd.f32 %v1581_v62, %v1577_v14  ;;  %v2446_v53 = vpack.c.bf16 %v2083_v61, %v2082_v18 }
  0xff   :  { %2427 = vmatprep.subr.bf16.mxu1 %v2504_v3  ;;  %v1426_v22 = vadd.f32 %v1424_v47, %v1420_v24 }
 0x100   :  { %v1589_v43 = vadd.f32 %v1587_v21, %v1583_v17 }
 0x101   :  { %2393 = vmatpush1.bf16.msra.mxu0 %v2392_v36  ;;  %v1430_v36 = vadd.f32 %v1429_v0, %v1426_v22 }
 0x102   :  { %2429 = vmatpush1.bf16.msra.mxu1 %v2428_v33  ;;  %2394 = vmatprep.subr.bf16.mxu0 %v2504_v3  ;;  %v1593_v33 = vadd.f32 %v1592_v40, %v1589_v43 }
 0x103   :  { %2430 = vmatprep.subr.bf16.mxu1 %v2504_v3  ;;  %v1432_v48 = vmax.f32 %v1430_v36, 0.0 }
 0x104   :  { %v1595_v0 = vmax.f32 %v1593_v33, 0.0 }
 0x105   :  { %2396 = vmatpush1.bf16.msra.mxu0 %v2395_v46 }
 0x106   :  { %2432 = vmatpush1.bf16.msra.mxu1 %v2431_v10  ;;  %2397 = vmatprep.subr.bf16.mxu0 %v2504_v3 }
 0x107   :  { %2433 = vmatprep.subr.bf16.mxu1 %v2504_v3 }
 0x109   :  { %2399 = vmatpush1.bf16.msra.mxu0 %v2398_v49 }
 0x10a   :  { %2435 = vmatpush1.bf16.msra.mxu1 %v2434_v54  ;;  %2400 = vmatprep.subr.bf16.mxu0 %v2504_v3 }
 0x10b   :  { %2436 = vmatprep.subr.bf16.mxu1 %v2504_v3 }
 0x10d   :  { %2402 = vmatpush1.bf16.msra.mxu0 %v2401_v41  ;;  %v2087_v41 = vld [vmem:[%s4568_s10] ss:$0 sm:$0xff] }
 0x10e   :  { %2438 = vmatpush1.bf16.msra.mxu1 %v2437_v4  ;;  %2403 = vmatprep.subr.bf16.mxu0 %v2504_v3 }
 0x10f   :  { %2439 = vmatprep.subr.bf16.mxu1 %v2504_v3 }
 0x111   :  { %2405 = vmatpush1.bf16.msra.mxu0 %v2404_v31 }
 0x112   :  { %2441 = vmatpush1.bf16.msra.mxu1 %v2440_v42  ;;  %2406 = vmatprep.subr.bf16.mxu0 %v2504_v3 }
 0x113   :  { %2442 = vmatprep.subr.bf16.mxu1 %v2504_v3 }
 0x115   :  { %2408 = vmatpush1.bf16.msra.mxu0 %v2407_v52 }
 0x116   :  { %2444 = vmatpush1.bf16.msra.mxu1 %v2443_v38  ;;  %2409 = vmatprep.subr.bf16.mxu0 %v2504_v3 }
 0x117   :  { %2445 = vmatprep.subr.bf16.mxu1 %v2504_v3 }
 0x119   :  { %2411 = vmatpush1.bf16.msra.mxu0 %v2410_v45 }
 0x11a   :  { %2447 = vmatpush1.bf16.msra.mxu1 %v2446_v53  ;;  %1514 = vmatprep.subr.mxu0 %v2505_v63 }
 0x11b   :  { %1677 = vmatprep.subr.mxu1 %v2505_v63 }
 0x11d   :  { %2048 = vmatpush1.msk.msra.mxu0 %vm246_vm1, %v2047_v60 }
 0x11e   :  { %1531 = vmatmul.mubr.f32.vlgmr.msra.gmra.mrb[8].mxu0 %v1432_v48  ;;  %2085 = vmatpush1.msk.msra.mxu1 %vm246_vm1, %v2084_v39 }
 0x11f   :  { %1694 = vmatmul.mubr.f32.vlgmr.msra.gmra.mrb[8].mxu1 %v1595_v0 }
 0x125   :  { %v316_v3 = vpop.f32.mrb[0].mxu0 }
 0x126   :  { %v318_v40 = vpop.f32.mrb[1].mxu0  ;;  %v392_v29 = vpop.f32.mrb[0].mxu1 }
 0x127   :  { %v393_v5 = vadd.f32 %v392_v29, %v316_v3  ;;  %v394_v35 = vpop.f32.mrb[1].mxu1 }
 0x158   :  { %v554_v20 = vpop.f32.mrb[2].mxu0 }
 0x159   :  { %v558_v26 = vadd.f32 %v554_v20, %v393_v5  ;;  %v556_v46 = vpop.f32.mrb[3].mxu0 }
 0x15a   :  { %v717_v63 = vpop.f32.mrb[2].mxu1 }
 0x15b   :  { %v721_v10 = vadd.f32 %v717_v63, %v558_v26  ;;  %v719_v1 = vpop.f32.mrb[3].mxu1 }
 0x18b   :  { %v880_v9 = vpop.f32.mrb[4].mxu0 }
 0x18c   :  { %v884_v51 = vadd.f32 %v880_v9, %v721_v10  ;;  %v882_v32 = vpop.f32.mrb[5].mxu0 }
 0x18d   :  { %v1043_v28 = vpop.f32.mrb[4].mxu1 }
 0x18e   :  { %v1047_v23 = vadd.f32 %v1043_v28, %v884_v51  ;;  %v1045_v56 = vpop.f32.mrb[5].mxu1 }
 0x1be   :  { %v1206_v7 = vpop.f32.mrb[6].mxu0 }
 0x1bf   :  { %v1210_v49 = vadd.f32 %v1206_v7, %v1047_v23  ;;  %v1208_v54 = vpop.f32.mrb[7].mxu0 }
 0x1c0   :  { %v1369_v19 = vpop.f32.mrb[6].mxu1 }
 0x1c1   :  { %v1373_v58 = vadd.f32 %v1369_v19, %v1210_v49  ;;  %v1371_v57 = vpop.f32.mrb[7].mxu1 }
 0x1f1   :  { %v1532_v16 = vpop.f32.mrb[8].mxu0 }
 0x1f2   :  { %v1536_v2 = vadd.f32 %v1532_v16, %v1373_v58  ;;  %v1534_v12 = vpop.f32.mrb[9].mxu0  ;;  %v1695_v11 = vpop.f32.mrb[8].mxu1 }
 0x1f3   :  { %v1697_v55 = vpop.f32.mrb[9].mxu1 }
 0x1f4   :  { %v1699_v4 = vadd.f32 %v1695_v11, %v1536_v2 }
 0x1f6   :  { %v1707_v6 = vadd.f32 %v2087_v41, %v1699_v4 }
 0x1f8   :  { %v1709_v30 = vsel %vm1708_vm2, %v1707_v6, -inf }
 0x1f9   :  { %1710 = vmax.xlane.f32.xlu0 %v1709_v30 }
 0x286   :  { %v1711_v8 = vpop.xlane.xlu0 %1710 }
 0x287   :  { %v1712_v44 = vsub.f32 %v1707_v6, %v1711_v8 }
 0x289   :  { %v1713_v59 = vmul.f32 1.442695, %v1712_v44 }
 0x28b   :  { %2452 = vpow2.f32 %v1713_v59 }
 0x295   :  { %v2453_v34 = vpop.eup %2452 }
 0x296   :  { %v1715_v14 = vsel %vm1708_vm2, %v2453_v34, 0.0 }
 0x297   :  { %1716 = vadd.xlane.f32.xlu0 %v1715_v14 }
 0x324   :  { %v1717_v62 = vpop.xlane.xlu0 %1716 }
 0x325   :  { %2454 = vlog2.f32 %v1717_v62 }
 0x32f   :  { %v2455_v31 = vpop.eup %2454 }
 0x330   :  { %v1719_v42 = vmul.f32 0.6931472, %v2455_v31 }
 0x332   :  { %v1720_v50 = vsub.f32 %v1712_v44, %v1719_v42 }
 0x334   :  { %1721 = vst.msk [vmem:[%s4569_s7] sm:$0xff] %vm1708_vm2, %v1720_v50 }
 0x335   :  { %1726 = vsyncpa [#allocation3], 1 }
 0x336   :  { %1727 = vsyncpa [#allocation5], 1 }

</bundles_post_ra>
